<compile_context>
chip_gen: v7x
topology: tpu7x:2x2x1
jax: 0.10.0
libtpu: 0.0.40
codegen_flags: <defaults>
</compile_context>

<pallas_src>
import math

import jax
import jax.numpy as jnp
from jax import lax
from jax.experimental import pallas as pl
from jax.experimental.pallas import tpu as pltpu

_NEG = -1e9


# --------------------------- in-kernel building blocks ---------------------------

def _mm(x, w, b=None):
    """MXU matmul: bf16 operands, f32 accumulation, optional f32 bias."""
    y = jnp.dot(x.astype(jnp.bfloat16), w.astype(jnp.bfloat16),
                preferred_element_type=jnp.float32)
    if b is not None:
        y = y + b
    return y


def _ln(x, g, b):
    """LayerNorm over the last dim (f32 epilogue)."""
    mean = jnp.mean(x, axis=-1, keepdims=True)
    var = jnp.mean(jnp.square(x - mean), axis=-1, keepdims=True)
    return (x - mean) * lax.rsqrt(var + 1e-5) * g + b


def _mha(q, k, v, bias, wo_ref, bo, n_heads, scale, need_probs):
    """Multi-head attention for one batch element.

    q: [Tq, D], k/v: [Tk, D], bias: additive [Tq, Tk] (f32).
    The output projection is folded into the head loop:
        out = sum_h ctx_h @ wo[h*Dh:(h+1)*Dh, :]  (+ bo)
    so no lane-dim concatenation of head outputs is needed.
    """
    Tq, D = q.shape
    Do = wo_ref.shape[1]
    Dh = D // n_heads
    out = jnp.zeros((Tq, Do), jnp.float32)
    probs = []
    for h in range(n_heads):
        sl = slice(h * Dh, (h + 1) * Dh)
        qh = q[:, sl].astype(jnp.bfloat16)
        kh = k[:, sl].astype(jnp.bfloat16)
        vh = v[:, sl].astype(jnp.bfloat16)
        # Contract the Dh axis of both operands directly (no k.T materialized).
        s = lax.dot_general(qh, kh, (((1,), (1,)), ((), ())),
                            preferred_element_type=jnp.float32)
        s = s * scale + bias
        m = jnp.max(s, axis=-1, keepdims=True)
        e = jnp.exp(s - m)
        p = e * pl.reciprocal(jnp.sum(e, axis=-1, keepdims=True), approx=True)
        ctx = jnp.dot(p.astype(jnp.bfloat16), vh, preferred_element_type=jnp.float32)
        out = out + _mm(ctx, wo_ref[pl.ds(h * Dh, Dh), :])
        if need_probs:
            probs.append(p)
    return out + bo, probs


def _full_spec(arr):
    """BlockSpec covering the whole (broadcast) array, independent of grid index."""
    shape = arr.shape
    return pl.BlockSpec(shape, lambda *_: (0,) * len(shape))


# --------------------------------- encoder layer ---------------------------------

def _make_encoder_layer_kernel(n_heads):
    def kernel(ilen_ref, x_ref,
               wqkv_ref, bqkv_ref, wo_ref, bo_ref, ln1g_ref, ln1b_ref,
               w1_ref, b1_ref, w2_ref, b2_ref, ln2g_ref, ln2b_ref,
               o_ref):
        b = pl.program_id(0)
        x = x_ref[0].astype(jnp.float32)               # [T, D]
        T, D = x.shape
        scale = 1.0 / math.sqrt(D // n_heads)

        # key-padding mask built in-kernel from prefetched length (SMEM scalar).
        ilen = ilen_ref[b]
        key_ok = lax.broadcasted_iota(jnp.int32, (T, T), 1) < ilen
        bias = jnp.where(key_ok, 0.0, _NEG)

        qkv = _mm(x, wqkv_ref[...], bqkv_ref[...])     # fused QKV: [T, 3D]
        q, k, v = qkv[:, :D], qkv[:, D:2 * D], qkv[:, 2 * D:]
        a, _ = _mha(q, k, v, bias, wo_ref, bo_ref[...], n_heads, scale, False)
        x = _ln(x + a, ln1g_ref[...], ln1b_ref[...])

        f = jnp.maximum(_mm(x, w1_ref[...], b1_ref[...]), 0.0)
        f = _mm(f, w2_ref[...], b2_ref[...])
        x = _ln(x + f, ln2g_ref[...], ln2b_ref[...])
        o_ref[0] = x.astype(o_ref.dtype)
    return kernel


def encoder_layer(x, input_lengths, p, n_heads):
    B, T, D = x.shape
    a = p["attn"]
    weights = [a["wqkv"], a["bqkv"], a["wo"], a["bo"],
               p["ln1_g"], p["ln1_b"],
               p["ffn_w1"], p["ffn_b1"], p["ffn_w2"], p["ffn_b2"],
               p["ln2_g"], p["ln2_b"]]
    grid_spec = pltpu.PrefetchScalarGridSpec(
        num_scalar_prefetch=1,
        grid=(B,),
        in_specs=[pl.BlockSpec((1, T, D), lambda b, *_: (b, 0, 0))]
                 + [_full_spec(w) for w in weights],
        out_specs=pl.BlockSpec((1, T, D), lambda b, *_: (b, 0, 0)),
    )
    return pl.pallas_call(
        _make_encoder_layer_kernel(n_heads),
        out_shape=jax.ShapeDtypeStruct((B, T, D), jnp.float32),
        grid_spec=grid_spec,
        compiler_params=pltpu.CompilerParams(dimension_semantics=("parallel",)),
    )(input_lengths.astype(jnp.int32), x, *weights)


# --------------------------------- decoder stack ---------------------------------

def _make_decoder_kernel(n_heads):
    def kernel(ilen_ref, tlen_ref,
               tgt_ref, enc_ref, pe_ref,
               pw0_ref, pb0_ref, pw1_ref, pb1_ref, pwf_ref,
               sa_wqkv_ref, sa_bqkv_ref, sa_wo_ref, sa_bo_ref, ln1g_ref, ln1b_ref,
               ca_wq_ref, ca_bq_ref, ca_wkv_ref, ca_bkv_ref, ca_wo_ref, ca_bo_ref,
               ln2g_ref, ln2b_ref,
               fw1_ref, fb1_ref, fw2_ref, fb2_ref, ln3g_ref, ln3b_ref,
               proj_w_ref, proj_b_ref,
               ms_ref, align_ref):
        b = pl.program_id(0)
        ilen = ilen_ref[b]
        tlen = tlen_ref[b]
        tgt = tgt_ref[0].astype(jnp.float32)           # [Tq, num_mels]
        enc = enc_ref[0].astype(jnp.float32)           # [Tk, De]
        Tq = tgt.shape[0]
        Tk = enc.shape[0]
        Dd = pe_ref.shape[-1]
        scale = 1.0 / math.sqrt(Dd // n_heads)

        # ---- DecoderPrenet (dropout = identity in eval mode) ----
        h = jnp.maximum(_mm(tgt, pw0_ref[...], pb0_ref[...]), 0.0)
        h = jnp.maximum(_mm(h, pw1_ref[...], pb1_ref[...]), 0.0)
        x = _mm(h, pwf_ref[...])                       # dense_final: no bias
        x = x + pe_ref[...]

        # ---- causal self-attention (keys masked to target length) ----
        rows = lax.broadcasted_iota(jnp.int32, (Tq, Tq), 0)
        cols = lax.broadcasted_iota(jnp.int32, (Tq, Tq), 1)
        self_bias = jnp.where((cols <= rows) & (cols < tlen), 0.0, _NEG)
        qkv = _mm(x, sa_wqkv_ref[...], sa_bqkv_ref[...])
        q, k, v = qkv[:, :Dd], qkv[:, Dd:2 * Dd], qkv[:, 2 * Dd:]
        a, _ = _mha(q, k, v, self_bias, sa_wo_ref, sa_bo_ref[...],
                    n_heads, scale, False)
        x = _ln(x + a, ln1g_ref[...], ln1b_ref[...])

        # ---- cross-attention over encoder memory (keys masked to input length) ----
        cross_bias = jnp.where(
            lax.broadcasted_iota(jnp.int32, (Tq, Tk), 1) < ilen, 0.0, _NEG)
        qc = _mm(x, ca_wq_ref[...], ca_bq_ref[...])
        kvc = _mm(enc, ca_wkv_ref[...], ca_bkv_ref[...])   # fused K|V: [Tk, 2*Dd]
        kc, vc = kvc[:, :Dd], kvc[:, Dd:]
        c, probs = _mha(qc, kc, vc, cross_bias, ca_wo_ref, ca_bo_ref[...],
                        n_heads, scale, True)
        x = _ln(x + c, ln2g_ref[...], ln2b_ref[...])
        for hh in range(n_heads):
            align_ref[0, hh, :, :] = probs[hh]

        # ---- FFN ----
        f = jnp.maximum(_mm(x, fw1_ref[...], fb1_ref[...]), 0.0)
        f = _mm(f, fw2_ref[...], fb2_ref[...])
        out = _ln(x + f, ln3g_ref[...], ln3b_ref[...])

        # ---- fused mel_net (no bias) + stop_net heads, plus impute ----
        # stop_net uses outputs.detach() in PyTorch: forward-identical.
        ms = _mm(out, proj_w_ref[...], proj_b_ref[...])     # [Tq, num_mels+1]
        row_ok = lax.broadcasted_iota(jnp.int32, (Tq, 1), 0) < tlen
        ms = jnp.where(row_ok, ms, 0.0)
        ms_ref[0] = ms.astype(ms_ref.dtype)
    return kernel


def decoder_forward(hp, params, encoder_outputs, input_lengths, targets, target_lengths):
    B, Tq, nm = targets.shape
    Tk, De = encoder_outputs.shape[1], encoder_outputs.shape[2]
    Dd = hp.decoder_hidden
    H = hp.n_heads
    pe = sinusoidal_pe(Tq, Dd)

    d = params["decoder"]
    weights = [
        d["prenet_w0"], d["prenet_b0"], d["prenet_w1"], d["prenet_b1"], d["prenet_wf"],
        d["sa_wqkv"], d["sa_bqkv"], d["sa_wo"], d["sa_bo"], d["ln1_g"], d["ln1_b"],
        d["ca_wq"], d["ca_bq"], d["ca_wkv"], d["ca_bkv"], d["ca_wo"], d["ca_bo"],
        d["ln2_g"], d["ln2_b"],
        d["ffn_w1"], d["ffn_b1"], d["ffn_w2"], d["ffn_b2"], d["ln3_g"], d["ln3_b"],
        d["proj_w"], d["proj_b"],
    ]

    grid_spec = pltpu.PrefetchScalarGridSpec(
        num_scalar_prefetch=2,
        grid=(B,),
        in_specs=[pl.BlockSpec((1, Tq, nm), lambda b, *_: (b, 0, 0)),
                  pl.BlockSpec((1, Tk, De), lambda b, *_: (b, 0, 0)),
                  _full_spec(pe)]
                 + [_full_spec(w) for w in weights],
        out_specs=(pl.BlockSpec((1, Tq, nm + 1), lambda b, *_: (b, 0, 0)),
                   pl.BlockSpec((1, H, Tq, Tk), lambda b, *_: (b, 0, 0, 0))),
    )
    ms, align = pl.pallas_call(
        _make_decoder_kernel(H),
        out_shape=(jax.ShapeDtypeStruct((B, Tq, nm + 1), jnp.float32),
                   jax.ShapeDtypeStruct((B, H, Tq, Tk), jnp.float32)),
        grid_spec=grid_spec,
        compiler_params=pltpu.CompilerParams(dimension_semantics=("parallel",)),
    )(input_lengths.astype(jnp.int32), target_lengths.astype(jnp.int32),
      targets, encoder_outputs, pe, *weights)

    mels = ms[..., :nm]
    stop_logits = ms[..., nm]
    return mels, stop_logits, align


# ----------------------------------- postnet -------------------------------------

def _make_postnet_kernel(n_layers, K, num_mels, C):
    PAD = (K - 1) // 2

    def kernel(*args):
        tlen_ref, x_ref = args[0], args[1]
        w_args = args[2:2 + 3 * n_layers]
        o_ref = args[2 + 3 * n_layers]
        xp_ref = args[3 + 3 * n_layers]       # [T+K-1, C] halo-padded activation
        col_ref = args[4 + 3 * n_layers]      # [T, K*C]   im2col staging buffer

        b = pl.program_id(0)
        tlen = tlen_ref[b]
        T = x_ref.shape[1]
        row_ok = (lax.broadcasted_iota(jnp.int32, (T, 1), 0) < tlen).astype(jnp.float32)

        # zero the halo once; only the interior rows are rewritten per layer.
        xp_ref[...] = jnp.zeros_like(xp_ref)

        x = x_ref[0].astype(jnp.float32)      # [T, C] (channels pre-padded to C)
        for i in range(n_layers):
            w_ref, s_ref, b_ref = w_args[3 * i], w_args[3 * i + 1], w_args[3 * i + 2]
            x = x * row_ok                    # impute before every conv layer
            xp_ref[pl.ds(PAD, T), :] = x
            # im2col: gather the K taps into one [T, K*C] matrix -> single MXU dot
            for kk in range(K):
                col_ref[:, kk * C:(kk + 1) * C] = xp_ref[pl.ds(kk, T), :]
            y = _mm(col_ref[...], w_ref[...])             # [T, C]
            y = y * s_ref[...] + b_ref[...]               # fused eval-mode BatchNorm
            if i != n_layers - 1:
                y = jnp.tanh(y)
            x = y                                         # dropout: identity (eval)
        o_ref[0] = x[:, 0:num_mels].astype(o_ref.dtype)
    return kernel


def postnet_forward(hp, params, inputs, target_lengths):
    B, T, nm = inputs.shape
    C = max(nm, hp.postnet_hidden)
    K = 5
    x_pad = jnp.pad(inputs, ((0, 0), (0, 0), (0, C - nm)))   # channel-pad once (XLA glue)

    w_args = []
    for lyr in params["postnet"]:
        w_args += [lyr["w_flat"], lyr["scale"], lyr["bias"]]

    grid_spec = pltpu.PrefetchScalarGridSpec(
        num_scalar_prefetch=1,
        grid=(B,),
        in_specs=[pl.BlockSpec((1, T, C), lambda b, *_: (b, 0, 0))]
                 + [_full_spec(a) for a in w_args],
        out_specs=pl.BlockSpec((1, T, nm), lambda b, *_: (b, 0, 0)),
        scratch_shapes=[pltpu.VMEM((T + K - 1, C), jnp.float32),
                        pltpu.VMEM((T, K * C), jnp.float32)],
    )
    return pl.pallas_call(
        _make_postnet_kernel(hp.n_postnet_layer, K, nm, C),
        out_shape=jax.ShapeDtypeStruct((B, T, nm), jnp.float32),
        grid_spec=grid_spec,
        compiler_params=pltpu.CompilerParams(dimension_semantics=("parallel",)),
    )(target_lengths.astype(jnp.int32), x_pad, *w_args)


# --------------------------------- model glue -------------------------------------

class HParams:
    vocab_size = 32
    embed_size = 32
    encoder_hidden = 32      # == embed_size (residual transformer)
    decoder_hidden = 32
    prenet_hidden = 32
    num_mels = 8
    postnet_hidden = 16
    n_postnet_layer = 3
    decoder_dropout_rate = 0.0   # eval mode -> dropout is identity
    n_heads = 2
    ffn_hidden = 64
    multi_speaker = False
    multi_lingual = False


def sinusoidal_pe(T, D):
    pos = jnp.arange(T, dtype=jnp.float32)[:, None]
    i = jnp.arange(D)[None, :]
    angle = pos / jnp.power(10000.0, (2.0 * (i // 2)) / D)
    return jnp.where(i % 2 == 0, jnp.sin(angle), jnp.cos(angle)).astype(jnp.float32)


def init_params(hp, key):
    keys = iter(jax.random.split(key, 64))

    def w(shape, scale=0.05):
        # matmul weights stored bf16 (MXU operands); accumulation stays f32.
        return (jax.random.normal(next(keys), shape, jnp.float32) * scale).astype(jnp.bfloat16)

    def zeros(shape):
        return jnp.zeros(shape, jnp.float32)

    def ones(shape):
        return jnp.ones(shape, jnp.float32)

    Dm, Dd, F = hp.embed_size, hp.decoder_hidden, hp.ffn_hidden
    nm, Ph = hp.num_mels, hp.prenet_hidden

    enc_layer = dict(
        attn=dict(wqkv=w((Dm, 3 * Dm)), bqkv=zeros((1, 3 * Dm)),     # fused Q|K|V
                  wo=w((Dm, Dm)), bo=zeros((1, Dm))),
        ln1_g=ones((1, Dm)), ln1_b=zeros((1, Dm)),
        ffn_w1=w((Dm, F)), ffn_b1=zeros((1, F)),
        ffn_w2=w((F, Dm)), ffn_b2=zeros((1, Dm)),
        ln2_g=ones((1, Dm)), ln2_b=zeros((1, Dm)),
    )

    dec = dict(
        prenet_w0=w((nm, Ph)), prenet_b0=zeros((1, Ph)),
        prenet_w1=w((Ph, Ph)), prenet_b1=zeros((1, Ph)),
        prenet_wf=w((Ph, Dd)),                                       # no bias
        sa_wqkv=w((Dd, 3 * Dd)), sa_bqkv=zeros((1, 3 * Dd)),
        sa_wo=w((Dd, Dd)), sa_bo=zeros((1, Dd)),
        ln1_g=ones((1, Dd)), ln1_b=zeros((1, Dd)),
        ca_wq=w((Dd, Dd)), ca_bq=zeros((1, Dd)),
        ca_wkv=w((hp.encoder_hidden, 2 * Dd)), ca_bkv=zeros((1, 2 * Dd)),  # fused K|V
        ca_wo=w((Dd, Dd)), ca_bo=zeros((1, Dd)),
        ln2_g=ones((1, Dd)), ln2_b=zeros((1, Dd)),
        ffn_w1=w((Dd, F)), ffn_b1=zeros((1, F)),
        ffn_w2=w((F, Dd)), ffn_b2=zeros((1, Dd)),
        ln3_g=ones((1, Dd)), ln3_b=zeros((1, Dd)),
        # mel_net (no bias) and stop_net fused into one [Dd, num_mels+1] head.
        proj_w=w((Dd, nm + 1)), proj_b=zeros((1, nm + 1)),
    )

    C = max(nm, hp.postnet_hidden)
    postnet = []
    for i in range(hp.n_postnet_layer):
        cin = nm if i == 0 else hp.postnet_hidden
        cout = nm if i == hp.n_postnet_layer - 1 else hp.postnet_hidden
        wk = jax.random.normal(next(keys), (5, cin, cout), jnp.float32) * 0.05
        wpad = jnp.zeros((5, C, C), jnp.float32).at[:, :cin, :cout].set(wk)
        postnet.append(dict(
            w_flat=wpad.reshape(5 * C, C).astype(jnp.bfloat16),      # im2col weight
            # eval-mode BatchNorm1d folded to per-channel scale/bias
            # (running_mean=0, running_var=1, gamma=1, beta=0).
            scale=jnp.ones((1, C), jnp.float32) / jnp.sqrt(1.0 + 1e-5),
            bias=zeros((1, C)),
        ))

    return dict(
        embed=jax.random.normal(next(keys), (hp.vocab_size, hp.embed_size),
                                jnp.float32) * 0.1,
        enc_layer=enc_layer,
        decoder=dec,
        postnet=postnet,
    )


def encoder_forward(hp, params, inputs, input_lengths):
    x = params["embed"][inputs]                      # embedding lookup (XLA glue)
    T = x.shape[1]
    x = x + sinusoidal_pe(T, hp.embed_size)[None]
    # TODO(synk): TransformerEncoder reference source not provided; using one standard
    # post-LN self-attention + FFN layer with sinusoidal positional encoding.
    return encoder_layer(x, input_lengths, params["enc_layer"], hp.n_heads)


def tacotron_forward(hp, params, inputs, input_lengths, mel_targets, target_lengths,
                     input_spk_ids=None, input_language_vecs=None):
    enc_outputs = encoder_forward(hp, params, inputs, input_lengths)
    # TODO(synk): TransformerDecoder reference source not provided; using one standard
    # post-LN layer: causal self-attention + cross-attention + FFN.
    mel_bef, stop_logits, alignments = decoder_forward(
        hp, params, enc_outputs, input_lengths, mel_targets, target_lengths)
    mel_res = postnet_forward(hp, params, mel_bef, target_lengths)
    mel_aft = mel_bef + mel_res
    return {"mel_bef": mel_bef, "mel_aft": mel_aft,
            "stop_logits": stop_logits, "alignments": alignments}


if __name__ == "__main__":
    hp = HParams()
    key = jax.random.PRNGKey(0)
    kp, k1, k2 = jax.random.split(key, 3)
    params = init_params(hp, kp)

    B, T_in, T_out = 2, 8, 16
    inputs = jax.random.randint(k1, (B, T_in), 0, hp.vocab_size)
    input_lengths = jnp.array([8, 6], jnp.int32)
    mel_targets = jax.random.normal(k2, (B, T_out, hp.num_mels), jnp.float32)
    target_lengths = jnp.array([16, 12], jnp.int32)

    fwd = jax.jit(lambda p, a, il, m, tl: tacotron_forward(hp, p, a, il, m, tl))
    out = fwd(params, inputs, input_lengths, mel_targets, target_lengths)
    out = jax.block_until_ready(out)

    assert out["mel_bef"].shape == (B, T_out, hp.num_mels)
    assert out["mel_aft"].shape == (B, T_out, hp.num_mels)
    assert out["stop_logits"].shape == (B, T_out)
    assert out["alignments"].shape == (B, hp.n_heads, T_out, T_in)
    print("KERNEL_OK")
</pallas_src>

<mosaic_0001>
module attributes {stable_mosaic.version = 11 : i64} {
  func.func @kernel(%arg0: i32, %arg1: memref<2xi32, #tpu.memory_space<smem>>, %arg2: memref<1x8x32xf32, #tpu.memory_space<vmem>>, %arg3: memref<32x96xbf16, #tpu.memory_space<vmem>>, %arg4: memref<1x96xf32, #tpu.memory_space<vmem>>, %arg5: memref<32x32xbf16, #tpu.memory_space<vmem>>, %arg6: memref<1x32xf32, #tpu.memory_space<vmem>>, %arg7: memref<1x32xf32, #tpu.memory_space<vmem>>, %arg8: memref<1x32xf32, #tpu.memory_space<vmem>>, %arg9: memref<32x64xbf16, #tpu.memory_space<vmem>>, %arg10: memref<1x64xf32, #tpu.memory_space<vmem>>, %arg11: memref<64x32xbf16, #tpu.memory_space<vmem>>, %arg12: memref<1x32xf32, #tpu.memory_space<vmem>>, %arg13: memref<1x32xf32, #tpu.memory_space<vmem>>, %arg14: memref<1x32xf32, #tpu.memory_space<vmem>>, %arg15: memref<1x8x32xf32, #tpu.memory_space<vmem>>) attributes {dimension_semantics = [#tpu.dimension_semantics<parallel>], iteration_bounds = array<i64: 2>, scalar_prefetch = 1 : i64, scratch_operands = 0 : i64, tpu.core_type = #tpu.core_type<tc>, window_params = [{transform_indices = @transform_0, window_bounds = array<i64: 1, 8, 32>}, {pipeline_mode = #tpu.pipeline_mode<synchronous>, transform_indices = @transform_1, window_bounds = array<i64: 32, 96>}, {pipeline_mode = #tpu.pipeline_mode<synchronous>, transform_indices = @transform_2, window_bounds = array<i64: 1, 96>}, {pipeline_mode = #tpu.pipeline_mode<synchronous>, transform_indices = @transform_3, window_bounds = array<i64: 32, 32>}, {pipeline_mode = #tpu.pipeline_mode<synchronous>, transform_indices = @transform_4, window_bounds = array<i64: 1, 32>}, {pipeline_mode = #tpu.pipeline_mode<synchronous>, transform_indices = @transform_5, window_bounds = array<i64: 1, 32>}, {pipeline_mode = #tpu.pipeline_mode<synchronous>, transform_indices = @transform_6, window_bounds = array<i64: 1, 32>}, {pipeline_mode = #tpu.pipeline_mode<synchronous>, transform_indices = @transform_7, window_bounds = array<i64: 32, 64>}, {pipeline_mode = #tpu.pipeline_mode<synchronous>, transform_indices = @transform_8, window_bounds = array<i64: 1, 64>}, {pipeline_mode = #tpu.pipeline_mode<synchronous>, transform_indices = @transform_9, window_bounds = array<i64: 64, 32>}, {pipeline_mode = #tpu.pipeline_mode<synchronous>, transform_indices = @transform_10, window_bounds = array<i64: 1, 32>}, {pipeline_mode = #tpu.pipeline_mode<synchronous>, transform_indices = @transform_11, window_bounds = array<i64: 1, 32>}, {pipeline_mode = #tpu.pipeline_mode<synchronous>, transform_indices = @transform_12, window_bounds = array<i64: 1, 32>}, {transform_indices = @transform_13, window_bounds = array<i64: 1, 8, 32>}]} {
    %c0 = arith.constant 0 : index
    %c0_0 = arith.constant 0 : index
    %c0_1 = arith.constant 0 : index
    %0 = vector.load %arg2[%c0, %c0_0, %c0_1] : memref<1x8x32xf32, #tpu.memory_space<vmem>>, vector<1x8x32xf32>
    %1 = vector.shape_cast %0 : vector<1x8x32xf32> to vector<8x32xf32>
    %2 = arith.index_cast %arg0 : i32 to index
    %3 = memref.load %arg1[%2] : memref<2xi32, #tpu.memory_space<smem>>
    %4 = tpu.iota {dimensions = array<i32: 1>} : vector<8x8xi32>
    %5 = vector.broadcast %3 : i32 to vector<8x8xi32>
    %6 = arith.cmpi slt, %4, %5 : vector<8x8xi32>
    %cst = arith.constant 0.000000e+00 : f32
    %cst_2 = arith.constant -1.000000e+09 : f32
    %7 = vector.broadcast %cst : f32 to vector<8x8xf32>
    %8 = vector.broadcast %cst_2 : f32 to vector<8x8xf32>
    %9 = arith.select %6, %7, %8 : vector<8x8xi1>, vector<8x8xf32>
    %c0_3 = arith.constant 0 : index
    %c0_4 = arith.constant 0 : index
    %10 = vector.load %arg3[%c0_3, %c0_4] : memref<32x96xbf16, #tpu.memory_space<vmem>>, vector<32x96xbf16>
    %c0_5 = arith.constant 0 : index
    %c0_6 = arith.constant 0 : index
    %11 = vector.load %arg4[%c0_5, %c0_6] : memref<1x96xf32, #tpu.memory_space<vmem>>, vector<1x96xf32>
    %12 = arith.truncf %1 : vector<8x32xf32> to vector<8x32xbf16>
    %cst_7 = arith.constant dense<0.000000e+00> : vector<8x96xf32>
    %13 = tpu.matmul %12, %10, %cst_7 {dimension_numbers = #tpu.dot_dimension_numbers<[1], [0], [0], [1], [0, 0, 1, 1], [], []>} : vector<8x32xbf16>, vector<32x96xbf16>, vector<8x96xf32> -> vector<8x96xf32>
    %14 = vector.broadcast %11 : vector<1x96xf32> to vector<8x96xf32>
    %15 = arith.addf %13, %14 : vector<8x96xf32>
    %16 = vector.extract_strided_slice %15 {offsets = [0, 0], sizes = [8, 32], strides = [1, 1]} : vector<8x96xf32> to vector<8x32xf32>
    %17 = vector.extract_strided_slice %15 {offsets = [0, 32], sizes = [8, 32], strides = [1, 1]} : vector<8x96xf32> to vector<8x32xf32>
    %18 = vector.extract_strided_slice %15 {offsets = [0, 64], sizes = [8, 32], strides = [1, 1]} : vector<8x96xf32> to vector<8x32xf32>
    %c0_8 = arith.constant 0 : index
    %c0_9 = arith.constant 0 : index
    %19 = vector.load %arg6[%c0_8, %c0_9] : memref<1x32xf32, #tpu.memory_space<vmem>>, vector<1x32xf32>
    %cst_10 = arith.constant 0.000000e+00 : f32
    %20 = vector.broadcast %cst_10 : f32 to vector<8x32xf32>
    %21 = vector.extract_strided_slice %16 {offsets = [0, 0], sizes = [8, 16], strides = [1, 1]} : vector<8x32xf32> to vector<8x16xf32>
    %22 = arith.truncf %21 : vector<8x16xf32> to vector<8x16xbf16>
    %23 = vector.extract_strided_slice %17 {offsets = [0, 0], sizes = [8, 16], strides = [1, 1]} : vector<8x32xf32> to vector<8x16xf32>
    %24 = arith.truncf %23 : vector<8x16xf32> to vector<8x16xbf16>
    %25 = vector.extract_strided_slice %18 {offsets = [0, 0], sizes = [8, 16], strides = [1, 1]} : vector<8x32xf32> to vector<8x16xf32>
    %26 = arith.truncf %25 : vector<8x16xf32> to vector<8x16xbf16>
    %cst_11 = arith.constant dense<0.000000e+00> : vector<8x8xf32>
    %27 = tpu.matmul %22, %24, %cst_11 {dimension_numbers = #tpu.dot_dimension_numbers<[1], [1], [0], [0], [0, 0, 1, 0], [], []>} : vector<8x16xbf16>, vector<8x16xbf16>, vector<8x8xf32> -> vector<8x8xf32>
    %cst_12 = arith.constant 2.500000e-01 : f32
    %28 = vector.broadcast %cst_12 : f32 to vector<8x8xf32>
    %29 = arith.mulf %27, %28 : vector<8x8xf32>
    %30 = arith.addf %29, %9 : vector<8x8xf32>
    %cst_13 = arith.constant dense<0xFF800000> : vector<8xf32>
    %31 = vector.multi_reduction <maximumf>, %30, %cst_13 [1] : vector<8x8xf32> to vector<8xf32>
    %32 = vector.shape_cast %31 : vector<8xf32> to vector<8x1xf32>
    %33 = vector.broadcast %32 : vector<8x1xf32> to vector<8x8xf32>
    %34 = arith.subf %30, %33 : vector<8x8xf32>
    %35 = math.exp %34 : vector<8x8xf32>
    %cst_14 = arith.constant dense<0.000000e+00> : vector<8xf32>
    %36 = vector.multi_reduction <add>, %35, %cst_14 [1] : vector<8x8xf32> to vector<8xf32>
    %37 = vector.shape_cast %36 : vector<8xf32> to vector<8x1xf32>
    %38 = tpu.reciprocal %37 {approx = true} : vector<8x1xf32> -> vector<8x1xf32>
    %39 = vector.broadcast %38 : vector<8x1xf32> to vector<8x8xf32>
    %40 = arith.mulf %35, %39 : vector<8x8xf32>
    %41 = arith.truncf %40 : vector<8x8xf32> to vector<8x8xbf16>
    %cst_15 = arith.constant dense<0.000000e+00> : vector<8x16xf32>
    %42 = tpu.matmul %41, %26, %cst_15 {dimension_numbers = #tpu.dot_dimension_numbers<[1], [0], [0], [1], [0, 0, 1, 1], [], []>} : vector<8x8xbf16>, vector<8x16xbf16>, vector<8x16xf32> -> vector<8x16xf32>
    %c0_16 = arith.constant 0 : index
    %c0_17 = arith.constant 0 : index
    %43 = vector.load %arg5[%c0_16, %c0_17] : memref<32x32xbf16, #tpu.memory_space<vmem>>, vector<16x32xbf16>
    %44 = arith.truncf %42 : vector<8x16xf32> to vector<8x16xbf16>
    %cst_18 = arith.constant dense<0.000000e+00> : vector<8x32xf32>
    %45 = tpu.matmul %44, %43, %cst_18 {dimension_numbers = #tpu.dot_dimension_numbers<[1], [0], [0], [1], [0, 0, 1, 1], [], []>} : vector<8x16xbf16>, vector<16x32xbf16>, vector<8x32xf32> -> vector<8x32xf32>
    %46 = arith.addf %20, %45 : vector<8x32xf32>
    %47 = vector.extract_strided_slice %16 {offsets = [0, 16], sizes = [8, 16], strides = [1, 1]} : vector<8x32xf32> to vector<8x16xf32>
    %48 = arith.truncf %47 : vector<8x16xf32> to vector<8x16xbf16>
    %49 = vector.extract_strided_slice %17 {offsets = [0, 16], sizes = [8, 16], strides = [1, 1]} : vector<8x32xf32> to vector<8x16xf32>
    %50 = arith.truncf %49 : vector<8x16xf32> to vector<8x16xbf16>
    %51 = vector.extract_strided_slice %18 {offsets = [0, 16], sizes = [8, 16], strides = [1, 1]} : vector<8x32xf32> to vector<8x16xf32>
    %52 = arith.truncf %51 : vector<8x16xf32> to vector<8x16xbf16>
    %cst_19 = arith.constant dense<0.000000e+00> : vector<8x8xf32>
    %53 = tpu.matmul %48, %50, %cst_19 {dimension_numbers = #tpu.dot_dimension_numbers<[1], [1], [0], [0], [0, 0, 1, 0], [], []>} : vector<8x16xbf16>, vector<8x16xbf16>, vector<8x8xf32> -> vector<8x8xf32>
    %cst_20 = arith.constant 2.500000e-01 : f32
    %54 = vector.broadcast %cst_20 : f32 to vector<8x8xf32>
    %55 = arith.mulf %53, %54 : vector<8x8xf32>
    %56 = arith.addf %55, %9 : vector<8x8xf32>
    %cst_21 = arith.constant dense<0xFF800000> : vector<8xf32>
    %57 = vector.multi_reduction <maximumf>, %56, %cst_21 [1] : vector<8x8xf32> to vector<8xf32>
    %58 = vector.shape_cast %57 : vector<8xf32> to vector<8x1xf32>
    %59 = vector.broadcast %58 : vector<8x1xf32> to vector<8x8xf32>
    %60 = arith.subf %56, %59 : vector<8x8xf32>
    %61 = math.exp %60 : vector<8x8xf32>
    %cst_22 = arith.constant dense<0.000000e+00> : vector<8xf32>
    %62 = vector.multi_reduction <add>, %61, %cst_22 [1] : vector<8x8xf32> to vector<8xf32>
    %63 = vector.shape_cast %62 : vector<8xf32> to vector<8x1xf32>
    %64 = tpu.reciprocal %63 {approx = true} : vector<8x1xf32> -> vector<8x1xf32>
    %65 = vector.broadcast %64 : vector<8x1xf32> to vector<8x8xf32>
    %66 = arith.mulf %61, %65 : vector<8x8xf32>
    %67 = arith.truncf %66 : vector<8x8xf32> to vector<8x8xbf16>
    %cst_23 = arith.constant dense<0.000000e+00> : vector<8x16xf32>
    %68 = tpu.matmul %67, %52, %cst_23 {dimension_numbers = #tpu.dot_dimension_numbers<[1], [0], [0], [1], [0, 0, 1, 1], [], []>} : vector<8x8xbf16>, vector<8x16xbf16>, vector<8x16xf32> -> vector<8x16xf32>
    %c16 = arith.constant 16 : index
    %c0_24 = arith.constant 0 : index
    %69 = vector.load %arg5[%c16, %c0_24] : memref<32x32xbf16, #tpu.memory_space<vmem>>, vector<16x32xbf16>
    %70 = arith.truncf %68 : vector<8x16xf32> to vector<8x16xbf16>
    %cst_25 = arith.constant dense<0.000000e+00> : vector<8x32xf32>
    %71 = tpu.matmul %70, %69, %cst_25 {dimension_numbers = #tpu.dot_dimension_numbers<[1], [0], [0], [1], [0, 0, 1, 1], [], []>} : vector<8x16xbf16>, vector<16x32xbf16>, vector<8x32xf32> -> vector<8x32xf32>
    %72 = arith.addf %46, %71 : vector<8x32xf32>
    %73 = vector.broadcast %19 : vector<1x32xf32> to vector<8x32xf32>
    %74 = arith.addf %72, %73 : vector<8x32xf32>
    %75 = arith.addf %1, %74 : vector<8x32xf32>
    %c0_26 = arith.constant 0 : index
    %c0_27 = arith.constant 0 : index
    %76 = vector.load %arg7[%c0_26, %c0_27] : memref<1x32xf32, #tpu.memory_space<vmem>>, vector<1x32xf32>
    %c0_28 = arith.constant 0 : index
    %c0_29 = arith.constant 0 : index
    %77 = vector.load %arg8[%c0_28, %c0_29] : memref<1x32xf32, #tpu.memory_space<vmem>>, vector<1x32xf32>
    %cst_30 = arith.constant dense<0.000000e+00> : vector<8xf32>
    %78 = vector.multi_reduction <add>, %75, %cst_30 [1] : vector<8x32xf32> to vector<8xf32>
    %79 = vector.shape_cast %78 : vector<8xf32> to vector<8x1xf32>
    %cst_31 = arith.constant 3.200000e+01 : f32
    %80 = vector.broadcast %cst_31 : f32 to vector<8x1xf32>
    %81 = arith.divf %79, %80 : vector<8x1xf32>
    %82 = vector.broadcast %81 : vector<8x1xf32> to vector<8x32xf32>
    %83 = arith.subf %75, %82 : vector<8x32xf32>
    %84 = arith.mulf %83, %83 : vector<8x32xf32>
    %cst_32 = arith.constant dense<0.000000e+00> : vector<8xf32>
    %85 = vector.multi_reduction <add>, %84, %cst_32 [1] : vector<8x32xf32> to vector<8xf32>
    %86 = vector.shape_cast %85 : vector<8xf32> to vector<8x1xf32>
    %cst_33 = arith.constant 3.200000e+01 : f32
    %87 = vector.broadcast %cst_33 : f32 to vector<8x1xf32>
    %88 = arith.divf %86, %87 : vector<8x1xf32>
    %89 = vector.broadcast %81 : vector<8x1xf32> to vector<8x32xf32>
    %90 = arith.subf %75, %89 : vector<8x32xf32>
    %cst_34 = arith.constant 9.99999974E-6 : f32
    %91 = vector.broadcast %cst_34 : f32 to vector<8x1xf32>
    %92 = arith.addf %88, %91 : vector<8x1xf32>
    %93 = math.rsqrt %92 : vector<8x1xf32>
    %94 = vector.broadcast %93 : vector<8x1xf32> to vector<8x32xf32>
    %95 = arith.mulf %90, %94 : vector<8x32xf32>
    %96 = vector.broadcast %76 : vector<1x32xf32> to vector<8x32xf32>
    %97 = arith.mulf %95, %96 : vector<8x32xf32>
    %98 = vector.broadcast %77 : vector<1x32xf32> to vector<8x32xf32>
    %99 = arith.addf %97, %98 : vector<8x32xf32>
    %c0_35 = arith.constant 0 : index
    %c0_36 = arith.constant 0 : index
    %100 = vector.load %arg9[%c0_35, %c0_36] : memref<32x64xbf16, #tpu.memory_space<vmem>>, vector<32x64xbf16>
    %c0_37 = arith.constant 0 : index
    %c0_38 = arith.constant 0 : index
    %101 = vector.load %arg10[%c0_37, %c0_38] : memref<1x64xf32, #tpu.memory_space<vmem>>, vector<1x64xf32>
    %102 = arith.truncf %99 : vector<8x32xf32> to vector<8x32xbf16>
    %cst_39 = arith.constant dense<0.000000e+00> : vector<8x64xf32>
    %103 = tpu.matmul %102, %100, %cst_39 {dimension_numbers = #tpu.dot_dimension_numbers<[1], [0], [0], [1], [0, 0, 1, 1], [], []>} : vector<8x32xbf16>, vector<32x64xbf16>, vector<8x64xf32> -> vector<8x64xf32>
    %104 = vector.broadcast %101 : vector<1x64xf32> to vector<8x64xf32>
    %105 = arith.addf %103, %104 : vector<8x64xf32>
    %cst_40 = arith.constant 0.000000e+00 : f32
    %106 = vector.broadcast %cst_40 : f32 to vector<8x64xf32>
    %107 = arith.maximumf %105, %106 : vector<8x64xf32>
    %c0_41 = arith.constant 0 : index
    %c0_42 = arith.constant 0 : index
    %108 = vector.load %arg11[%c0_41, %c0_42] : memref<64x32xbf16, #tpu.memory_space<vmem>>, vector<64x32xbf16>
    %c0_43 = arith.constant 0 : index
    %c0_44 = arith.constant 0 : index
    %109 = vector.load %arg12[%c0_43, %c0_44] : memref<1x32xf32, #tpu.memory_space<vmem>>, vector<1x32xf32>
    %110 = arith.truncf %107 : vector<8x64xf32> to vector<8x64xbf16>
    %cst_45 = arith.constant dense<0.000000e+00> : vector<8x32xf32>
    %111 = tpu.matmul %110, %108, %cst_45 {dimension_numbers = #tpu.dot_dimension_numbers<[1], [0], [0], [1], [0, 0, 1, 1], [], []>} : vector<8x64xbf16>, vector<64x32xbf16>, vector<8x32xf32> -> vector<8x32xf32>
    %112 = vector.broadcast %109 : vector<1x32xf32> to vector<8x32xf32>
    %113 = arith.addf %111, %112 : vector<8x32xf32>
    %114 = arith.addf %99, %113 : vector<8x32xf32>
    %c0_46 = arith.constant 0 : index
    %c0_47 = arith.constant 0 : index
    %115 = vector.load %arg13[%c0_46, %c0_47] : memref<1x32xf32, #tpu.memory_space<vmem>>, vector<1x32xf32>
    %c0_48 = arith.constant 0 : index
    %c0_49 = arith.constant 0 : index
    %116 = vector.load %arg14[%c0_48, %c0_49] : memref<1x32xf32, #tpu.memory_space<vmem>>, vector<1x32xf32>
    %cst_50 = arith.constant dense<0.000000e+00> : vector<8xf32>
    %117 = vector.multi_reduction <add>, %114, %cst_50 [1] : vector<8x32xf32> to vector<8xf32>
    %118 = vector.shape_cast %117 : vector<8xf32> to vector<8x1xf32>
    %cst_51 = arith.constant 3.200000e+01 : f32
    %119 = vector.broadcast %cst_51 : f32 to vector<8x1xf32>
    %120 = arith.divf %118, %119 : vector<8x1xf32>
    %121 = vector.broadcast %120 : vector<8x1xf32> to vector<8x32xf32>
    %122 = arith.subf %114, %121 : vector<8x32xf32>
    %123 = arith.mulf %122, %122 : vector<8x32xf32>
    %cst_52 = arith.constant dense<0.000000e+00> : vector<8xf32>
    %124 = vector.multi_reduction <add>, %123, %cst_52 [1] : vector<8x32xf32> to vector<8xf32>
    %125 = vector.shape_cast %124 : vector<8xf32> to vector<8x1xf32>
    %cst_53 = arith.constant 3.200000e+01 : f32
    %126 = vector.broadcast %cst_53 : f32 to vector<8x1xf32>
    %127 = arith.divf %125, %126 : vector<8x1xf32>
    %128 = vector.broadcast %120 : vector<8x1xf32> to vector<8x32xf32>
    %129 = arith.subf %114, %128 : vector<8x32xf32>
    %cst_54 = arith.constant 9.99999974E-6 : f32
    %130 = vector.broadcast %cst_54 : f32 to vector<8x1xf32>
    %131 = arith.addf %127, %130 : vector<8x1xf32>
    %132 = math.rsqrt %131 : vector<8x1xf32>
    %133 = vector.broadcast %132 : vector<8x1xf32> to vector<8x32xf32>
    %134 = arith.mulf %129, %133 : vector<8x32xf32>
    %135 = vector.broadcast %115 : vector<1x32xf32> to vector<8x32xf32>
    %136 = arith.mulf %134, %135 : vector<8x32xf32>
    %137 = vector.broadcast %116 : vector<1x32xf32> to vector<8x32xf32>
    %138 = arith.addf %136, %137 : vector<8x32xf32>
    %c0_55 = arith.constant 0 : index
    %c0_56 = arith.constant 0 : index
    %c0_57 = arith.constant 0 : index
    %139 = vector.load %arg15[%c0_55, %c0_56, %c0_57] : memref<1x8x32xf32, #tpu.memory_space<vmem>>, vector<1x8x32xf32>
    %140 = vector.shape_cast %139 : vector<1x8x32xf32> to vector<8x32xf32>
    %141 = vector.shape_cast %138 : vector<8x32xf32> to vector<1x8x32xf32>
    tpu.vector_store %arg15[%c0_55, %c0_56, %c0_57], %141 {strides = array<i32>} : memref<1x8x32xf32, #tpu.memory_space<vmem>>, vector<1x8x32xf32>,
    return
  }
  func.func @transform_0(%arg0: i32, %arg1: memref<2xi32, #tpu.memory_space<smem>>) -> (i32, i32, i32) {
    %c0_i32 = arith.constant 0 : i32
    %c0_i32_0 = arith.constant 0 : i32
    %c0_i32_1 = arith.constant 0 : i32
    return %arg0, %c0_i32, %c0_i32_0 : i32, i32, i32
  }
  func.func @transform_1(%arg0: i32, %arg1: memref<2xi32, #tpu.memory_space<smem>>) -> (i32, i32) {
    %c0_i32 = arith.constant 0 : i32
    %c0_i32_0 = arith.constant 0 : i32
    %c0_i32_1 = arith.constant 0 : i32
    return %c0_i32, %c0_i32_0 : i32, i32
  }
  func.func @transform_2(%arg0: i32, %arg1: memref<2xi32, #tpu.memory_space<smem>>) -> (i32, i32) {
    %c0_i32 = arith.constant 0 : i32
    %c0_i32_0 = arith.constant 0 : i32
    %c0_i32_1 = arith.constant 0 : i32
    return %c0_i32, %c0_i32_0 : i32, i32
  }
  func.func @transform_3(%arg0: i32, %arg1: memref<2xi32, #tpu.memory_space<smem>>) -> (i32, i32) {
    %c0_i32 = arith.constant 0 : i32
    %c0_i32_0 = arith.constant 0 : i32
    %c0_i32_1 = arith.constant 0 : i32
    return %c0_i32, %c0_i32_0 : i32, i32
  }
  func.func @transform_4(%arg0: i32, %arg1: memref<2xi32, #tpu.memory_space<smem>>) -> (i32, i32) {
    %c0_i32 = arith.constant 0 : i32
    %c0_i32_0 = arith.constant 0 : i32
    %c0_i32_1 = arith.constant 0 : i32
    return %c0_i32, %c0_i32_0 : i32, i32
  }
  func.func @transform_5(%arg0: i32, %arg1: memref<2xi32, #tpu.memory_space<smem>>) -> (i32, i32) {
    %c0_i32 = arith.constant 0 : i32
    %c0_i32_0 = arith.constant 0 : i32
    %c0_i32_1 = arith.constant 0 : i32
    return %c0_i32, %c0_i32_0 : i32, i32
  }
  func.func @transform_6(%arg0: i32, %arg1: memref<2xi32, #tpu.memory_space<smem>>) -> (i32, i32) {
    %c0_i32 = arith.constant 0 : i32
    %c0_i32_0 = arith.constant 0 : i32
    %c0_i32_1 = arith.constant 0 : i32
    return %c0_i32, %c0_i32_0 : i32, i32
  }
  func.func @transform_7(%arg0: i32, %arg1: memref<2xi32, #tpu.memory_space<smem>>) -> (i32, i32) {
    %c0_i32 = arith.constant 0 : i32
    %c0_i32_0 = arith.constant 0 : i32
    %c0_i32_1 = arith.constant 0 : i32
    return %c0_i32, %c0_i32_0 : i32, i32
  }
  func.func @transform_8(%arg0: i32, %arg1: memref<2xi32, #tpu.memory_space<smem>>) -> (i32, i32) {
    %c0_i32 = arith.constant 0 : i32
    %c0_i32_0 = arith.constant 0 : i32
    %c0_i32_1 = arith.constant 0 : i32
    return %c0_i32, %c0_i32_0 : i32, i32
  }
  func.func @transform_9(%arg0: i32, %arg1: memref<2xi32, #tpu.memory_space<smem>>) -> (i32, i32) {
    %c0_i32 = arith.constant 0 : i32
    %c0_i32_0 = arith.constant 0 : i32
    %c0_i32_1 = arith.constant 0 : i32
    return %c0_i32, %c0_i32_0 : i32, i32
  }
  func.func @transform_10(%arg0: i32, %arg1: memref<2xi32, #tpu.memory_space<smem>>) -> (i32, i32) {
    %c0_i32 = arith.constant 0 : i32
    %c0_i32_0 = arith.constant 0 : i32
    %c0_i32_1 = arith.constant 0 : i32
    return %c0_i32, %c0_i32_0 : i32, i32
  }
  func.func @transform_11(%arg0: i32, %arg1: memref<2xi32, #tpu.memory_space<smem>>) -> (i32, i32) {
    %c0_i32 = arith.constant 0 : i32
    %c0_i32_0 = arith.constant 0 : i32
    %c0_i32_1 = arith.constant 0 : i32
    return %c0_i32, %c0_i32_0 : i32, i32
  }
  func.func @transform_12(%arg0: i32, %arg1: memref<2xi32, #tpu.memory_space<smem>>) -> (i32, i32) {
    %c0_i32 = arith.constant 0 : i32
    %c0_i32_0 = arith.constant 0 : i32
    %c0_i32_1 = arith.constant 0 : i32
    return %c0_i32, %c0_i32_0 : i32, i32
  }
  func.func @transform_13(%arg0: i32, %arg1: memref<2xi32, #tpu.memory_space<smem>>) -> (i32, i32, i32) {
    %c0_i32 = arith.constant 0 : i32
    %c0_i32_0 = arith.constant 0 : i32
    %c0_i32_1 = arith.constant 0 : i32
    return %arg0, %c0_i32, %c0_i32_0 : i32, i32, i32
  }
}

module attributes {stable_mosaic.version = 11 : i64} {
  func.func @kernel(%arg0: i32, %arg1: memref<2xi32, #tpu.memory_space<smem>>, %arg2: memref<1x16x16xf32, #tpu.memory_space<vmem>>, %arg3: memref<80x16xbf16, #tpu.memory_space<vmem>>, %arg4: memref<1x16xf32, #tpu.memory_space<vmem>>, %arg5: memref<1x16xf32, #tpu.memory_space<vmem>>, %arg6: memref<80x16xbf16, #tpu.memory_space<vmem>>, %arg7: memref<1x16xf32, #tpu.memory_space<vmem>>, %arg8: memref<1x16xf32, #tpu.memory_space<vmem>>, %arg9: memref<80x16xbf16, #tpu.memory_space<vmem>>, %arg10: memref<1x16xf32, #tpu.memory_space<vmem>>, %arg11: memref<1x16xf32, #tpu.memory_space<vmem>>, %arg12: memref<1x16x8xf32, #tpu.memory_space<vmem>>, %arg13: memref<20x16xf32, #tpu.memory_space<vmem>>, %arg14: memref<16x80xf32, #tpu.memory_space<vmem>>) attributes {dimension_semantics = [#tpu.dimension_semantics<parallel>], iteration_bounds = array<i64: 2>, scalar_prefetch = 1 : i64, scratch_operands = 2 : i64, tpu.core_type = #tpu.core_type<tc>, window_params = [{transform_indices = @transform_0, window_bounds = array<i64: 1, 16, 16>}, {pipeline_mode = #tpu.pipeline_mode<synchronous>, transform_indices = @transform_1, window_bounds = array<i64: 80, 16>}, {pipeline_mode = #tpu.pipeline_mode<synchronous>, transform_indices = @transform_2, window_bounds = array<i64: 1, 16>}, {pipeline_mode = #tpu.pipeline_mode<synchronous>, transform_indices = @transform_3, window_bounds = array<i64: 1, 16>}, {pipeline_mode = #tpu.pipeline_mode<synchronous>, transform_indices = @transform_4, window_bounds = array<i64: 80, 16>}, {pipeline_mode = #tpu.pipeline_mode<synchronous>, transform_indices = @transform_5, window_bounds = array<i64: 1, 16>}, {pipeline_mode = #tpu.pipeline_mode<synchronous>, transform_indices = @transform_6, window_bounds = array<i64: 1, 16>}, {pipeline_mode = #tpu.pipeline_mode<synchronous>, transform_indices = @transform_7, window_bounds = array<i64: 80, 16>}, {pipeline_mode = #tpu.pipeline_mode<synchronous>, transform_indices = @transform_8, window_bounds = array<i64: 1, 16>}, {pipeline_mode = #tpu.pipeline_mode<synchronous>, transform_indices = @transform_9, window_bounds = array<i64: 1, 16>}, {transform_indices = @transform_10, window_bounds = array<i64: 1, 16, 8>}]} {
    %0 = arith.index_cast %arg0 : i32 to index
    %1 = memref.load %arg1[%0] : memref<2xi32, #tpu.memory_space<smem>>
    %2 = tpu.iota {dimensions = array<i32: 0>} : vector<16x1xi32>
    %3 = vector.broadcast %1 : i32 to vector<16x1xi32>
    %4 = arith.cmpi slt, %2, %3 : vector<16x1xi32>
    %5 = arith.extui %4 : vector<16x1xi1> to vector<16x1xi32>
    %6 = arith.sitofp %5 : vector<16x1xi32> to vector<16x1xf32>
    %cst = arith.constant 0.000000e+00 : f32
    %7 = vector.broadcast %cst : f32 to vector<20x16xf32>
    %c0 = arith.constant 0 : index
    %c0_0 = arith.constant 0 : index
    %8 = vector.load %arg13[%c0, %c0_0] : memref<20x16xf32, #tpu.memory_space<vmem>>, vector<20x16xf32>
    tpu.vector_store %arg13[%c0, %c0_0], %7 {strides = array<i32>} : memref<20x16xf32, #tpu.memory_space<vmem>>, vector<20x16xf32>,
    %c0_1 = arith.constant 0 : index
    %c0_2 = arith.constant 0 : index
    %c0_3 = arith.constant 0 : index
    %9 = vector.load %arg2[%c0_1, %c0_2, %c0_3] : memref<1x16x16xf32, #tpu.memory_space<vmem>>, vector<1x16x16xf32>
    %10 = vector.shape_cast %9 : vector<1x16x16xf32> to vector<16x16xf32>
    %11 = vector.broadcast %6 : vector<16x1xf32> to vector<16x16xf32>
    %12 = arith.mulf %10, %11 : vector<16x16xf32>
    %c2 = arith.constant 2 : index
    %c0_4 = arith.constant 0 : index
    %13 = vector.load %arg13[%c2, %c0_4] : memref<20x16xf32, #tpu.memory_space<vmem>>, vector<16x16xf32>
    tpu.vector_store %arg13[%c2, %c0_4], %12 {strides = array<i32>} : memref<20x16xf32, #tpu.memory_space<vmem>>, vector<16x16xf32>,
    %c0_5 = arith.constant 0 : index
    %c0_6 = arith.constant 0 : index
    %14 = vector.load %arg13[%c0_5, %c0_6] : memref<20x16xf32, #tpu.memory_space<vmem>>, vector<16x16xf32>
    %c0_7 = arith.constant 0 : index
    %c0_8 = arith.constant 0 : index
    %15 = vector.load %arg14[%c0_7, %c0_8] : memref<16x80xf32, #tpu.memory_space<vmem>>, vector<16x16xf32>
    tpu.vector_store %arg14[%c0_7, %c0_8], %14 {strides = array<i32>} : memref<16x80xf32, #tpu.memory_space<vmem>>, vector<16x16xf32>,
    %c1 = arith.constant 1 : index
    %c0_9 = arith.constant 0 : index
    %16 = vector.load %arg13[%c1, %c0_9] : memref<20x16xf32, #tpu.memory_space<vmem>>, vector<16x16xf32>
    %c0_10 = arith.constant 0 : index
    %c16 = arith.constant 16 : index
    %17 = vector.load %arg14[%c0_10, %c16] : memref<16x80xf32, #tpu.memory_space<vmem>>, vector<16x16xf32>
    tpu.vector_store %arg14[%c0_10, %c16], %16 {strides = array<i32>} : memref<16x80xf32, #tpu.memory_space<vmem>>, vector<16x16xf32>,
    %c2_11 = arith.constant 2 : index
    %c0_12 = arith.constant 0 : index
    %18 = vector.load %arg13[%c2_11, %c0_12] : memref<20x16xf32, #tpu.memory_space<vmem>>, vector<16x16xf32>
    %c0_13 = arith.constant 0 : index
    %c32 = arith.constant 32 : index
    %19 = vector.load %arg14[%c0_13, %c32] : memref<16x80xf32, #tpu.memory_space<vmem>>, vector<16x16xf32>
    tpu.vector_store %arg14[%c0_13, %c32], %18 {strides = array<i32>} : memref<16x80xf32, #tpu.memory_space<vmem>>, vector<16x16xf32>,
    %c3 = arith.constant 3 : index
    %c0_14 = arith.constant 0 : index
    %20 = vector.load %arg13[%c3, %c0_14] : memref<20x16xf32, #tpu.memory_space<vmem>>, vector<16x16xf32>
    %c0_15 = arith.constant 0 : index
    %c48 = arith.constant 48 : index
    %21 = vector.load %arg14[%c0_15, %c48] : memref<16x80xf32, #tpu.memory_space<vmem>>, vector<16x16xf32>
    tpu.vector_store %arg14[%c0_15, %c48], %20 {strides = array<i32>} : memref<16x80xf32, #tpu.memory_space<vmem>>, vector<16x16xf32>,
    %c4 = arith.constant 4 : index
    %c0_16 = arith.constant 0 : index
    %22 = vector.load %arg13[%c4, %c0_16] : memref<20x16xf32, #tpu.memory_space<vmem>>, vector<16x16xf32>
    %c0_17 = arith.constant 0 : index
    %c64 = arith.constant 64 : index
    %23 = vector.load %arg14[%c0_17, %c64] : memref<16x80xf32, #tpu.memory_space<vmem>>, vector<16x16xf32>
    tpu.vector_store %arg14[%c0_17, %c64], %22 {strides = array<i32>} : memref<16x80xf32, #tpu.memory_space<vmem>>, vector<16x16xf32>,
    %c0_18 = arith.constant 0 : index
    %c0_19 = arith.constant 0 : index
    %24 = vector.load %arg14[%c0_18, %c0_19] : memref<16x80xf32, #tpu.memory_space<vmem>>, vector<16x80xf32>
    %c0_20 = arith.constant 0 : index
    %c0_21 = arith.constant 0 : index
    %25 = vector.load %arg3[%c0_20, %c0_21] : memref<80x16xbf16, #tpu.memory_space<vmem>>, vector<80x16xbf16>
    %26 = arith.truncf %24 : vector<16x80xf32> to vector<16x80xbf16>
    %cst_22 = arith.constant dense<0.000000e+00> : vector<16x16xf32>
    %27 = tpu.matmul %26, %25, %cst_22 {dimension_numbers = #tpu.dot_dimension_numbers<[1], [0], [0], [1], [0, 0, 1, 1], [], []>} : vector<16x80xbf16>, vector<80x16xbf16>, vector<16x16xf32> -> vector<16x16xf32>
    %c0_23 = arith.constant 0 : index
    %c0_24 = arith.constant 0 : index
    %28 = vector.load %arg4[%c0_23, %c0_24] : memref<1x16xf32, #tpu.memory_space<vmem>>, vector<1x16xf32>
    %29 = vector.broadcast %28 : vector<1x16xf32> to vector<16x16xf32>
    %30 = arith.mulf %27, %29 : vector<16x16xf32>
    %c0_25 = arith.constant 0 : index
    %c0_26 = arith.constant 0 : index
    %31 = vector.load %arg5[%c0_25, %c0_26] : memref<1x16xf32, #tpu.memory_space<vmem>>, vector<1x16xf32>
    %32 = vector.broadcast %31 : vector<1x16xf32> to vector<16x16xf32>
    %33 = arith.addf %30, %32 : vector<16x16xf32>
    %34 = math.tanh %33 : vector<16x16xf32>
    %35 = vector.broadcast %6 : vector<16x1xf32> to vector<16x16xf32>
    %36 = arith.mulf %34, %35 : vector<16x16xf32>
    %c2_27 = arith.constant 2 : index
    %c0_28 = arith.constant 0 : index
    %37 = vector.load %arg13[%c2_27, %c0_28] : memref<20x16xf32, #tpu.memory_space<vmem>>, vector<16x16xf32>
    tpu.vector_store %arg13[%c2_27, %c0_28], %36 {strides = array<i32>} : memref<20x16xf32, #tpu.memory_space<vmem>>, vector<16x16xf32>,
    %c0_29 = arith.constant 0 : index
    %c0_30 = arith.constant 0 : index
    %38 = vector.load %arg13[%c0_29, %c0_30] : memref<20x16xf32, #tpu.memory_space<vmem>>, vector<16x16xf32>
    %c0_31 = arith.constant 0 : index
    %c0_32 = arith.constant 0 : index
    %39 = vector.load %arg14[%c0_31, %c0_32] : memref<16x80xf32, #tpu.memory_space<vmem>>, vector<16x16xf32>
    tpu.vector_store %arg14[%c0_31, %c0_32], %38 {strides = array<i32>} : memref<16x80xf32, #tpu.memory_space<vmem>>, vector<16x16xf32>,
    %c1_33 = arith.constant 1 : index
    %c0_34 = arith.constant 0 : index
    %40 = vector.load %arg13[%c1_33, %c0_34] : memref<20x16xf32, #tpu.memory_space<vmem>>, vector<16x16xf32>
    %c0_35 = arith.constant 0 : index
    %c16_36 = arith.constant 16 : index
    %41 = vector.load %arg14[%c0_35, %c16_36] : memref<16x80xf32, #tpu.memory_space<vmem>>, vector<16x16xf32>
    tpu.vector_store %arg14[%c0_35, %c16_36], %40 {strides = array<i32>} : memref<16x80xf32, #tpu.memory_space<vmem>>, vector<16x16xf32>,
    %c2_37 = arith.constant 2 : index
    %c0_38 = arith.constant 0 : index
    %42 = vector.load %arg13[%c2_37, %c0_38] : memref<20x16xf32, #tpu.memory_space<vmem>>, vector<16x16xf32>
    %c0_39 = arith.constant 0 : index
    %c32_40 = arith.constant 32 : index
    %43 = vector.load %arg14[%c0_39, %c32_40] : memref<16x80xf32, #tpu.memory_space<vmem>>, vector<16x16xf32>
    tpu.vector_store %arg14[%c0_39, %c32_40], %42 {strides = array<i32>} : memref<16x80xf32, #tpu.memory_space<vmem>>, vector<16x16xf32>,
    %c3_41 = arith.constant 3 : index
    %c0_42 = arith.constant 0 : index
    %44 = vector.load %arg13[%c3_41, %c0_42] : memref<20x16xf32, #tpu.memory_space<vmem>>, vector<16x16xf32>
    %c0_43 = arith.constant 0 : index
    %c48_44 = arith.constant 48 : index
    %45 = vector.load %arg14[%c0_43, %c48_44] : memref<16x80xf32, #tpu.memory_space<vmem>>, vector<16x16xf32>
    tpu.vector_store %arg14[%c0_43, %c48_44], %44 {strides = array<i32>} : memref<16x80xf32, #tpu.memory_space<vmem>>, vector<16x16xf32>,
    %c4_45 = arith.constant 4 : index
    %c0_46 = arith.constant 0 : index
    %46 = vector.load %arg13[%c4_45, %c0_46] : memref<20x16xf32, #tpu.memory_space<vmem>>, vector<16x16xf32>
    %c0_47 = arith.constant 0 : index
    %c64_48 = arith.constant 64 : index
    %47 = vector.load %arg14[%c0_47, %c64_48] : memref<16x80xf32, #tpu.memory_space<vmem>>, vector<16x16xf32>
    tpu.vector_store %arg14[%c0_47, %c64_48], %46 {strides = array<i32>} : memref<16x80xf32, #tpu.memory_space<vmem>>, vector<16x16xf32>,
    %c0_49 = arith.constant 0 : index
    %c0_50 = arith.constant 0 : index
    %48 = vector.load %arg14[%c0_49, %c0_50] : memref<16x80xf32, #tpu.memory_space<vmem>>, vector<16x80xf32>
    %c0_51 = arith.constant 0 : index
    %c0_52 = arith.constant 0 : index
    %49 = vector.load %arg6[%c0_51, %c0_52] : memref<80x16xbf16, #tpu.memory_space<vmem>>, vector<80x16xbf16>
    %50 = arith.truncf %48 : vector<16x80xf32> to vector<16x80xbf16>
    %cst_53 = arith.constant dense<0.000000e+00> : vector<16x16xf32>
    %51 = tpu.matmul %50, %49, %cst_53 {dimension_numbers = #tpu.dot_dimension_numbers<[1], [0], [0], [1], [0, 0, 1, 1], [], []>} : vector<16x80xbf16>, vector<80x16xbf16>, vector<16x16xf32> -> vector<16x16xf32>
    %c0_54 = arith.constant 0 : index
    %c0_55 = arith.constant 0 : index
    %52 = vector.load %arg7[%c0_54, %c0_55] : memref<1x16xf32, #tpu.memory_space<vmem>>, vector<1x16xf32>
    %53 = vector.broadcast %52 : vector<1x16xf32> to vector<16x16xf32>
    %54 = arith.mulf %51, %53 : vector<16x16xf32>
    %c0_56 = arith.constant 0 : index
    %c0_57 = arith.constant 0 : index
    %55 = vector.load %arg8[%c0_56, %c0_57] : memref<1x16xf32, #tpu.memory_space<vmem>>, vector<1x16xf32>
    %56 = vector.broadcast %55 : vector<1x16xf32> to vector<16x16xf32>
    %57 = arith.addf %54, %56 : vector<16x16xf32>
    %58 = math.tanh %57 : vector<16x16xf32>
    %59 = vector.broadcast %6 : vector<16x1xf32> to vector<16x16xf32>
    %60 = arith.mulf %58, %59 : vector<16x16xf32>
    %c2_58 = arith.constant 2 : index
    %c0_59 = arith.constant 0 : index
    %61 = vector.load %arg13[%c2_58, %c0_59] : memref<20x16xf32, #tpu.memory_space<vmem>>, vector<16x16xf32>
    tpu.vector_store %arg13[%c2_58, %c0_59], %60 {strides = array<i32>} : memref<20x16xf32, #tpu.memory_space<vmem>>, vector<16x16xf32>,
    %c0_60 = arith.constant 0 : index
    %c0_61 = arith.constant 0 : index
    %62 = vector.load %arg13[%c0_60, %c0_61] : memref<20x16xf32, #tpu.memory_space<vmem>>, vector<16x16xf32>
    %c0_62 = arith.constant 0 : index
    %c0_63 = arith.constant 0 : index
    %63 = vector.load %arg14[%c0_62, %c0_63] : memref<16x80xf32, #tpu.memory_space<vmem>>, vector<16x16xf32>
    tpu.vector_store %arg14[%c0_62, %c0_63], %62 {strides = array<i32>} : memref<16x80xf32, #tpu.memory_space<vmem>>, vector<16x16xf32>,
    %c1_64 = arith.constant 1 : index
    %c0_65 = arith.constant 0 : index
    %64 = vector.load %arg13[%c1_64, %c0_65] : memref<20x16xf32, #tpu.memory_space<vmem>>, vector<16x16xf32>
    %c0_66 = arith.constant 0 : index
    %c16_67 = arith.constant 16 : index
    %65 = vector.load %arg14[%c0_66, %c16_67] : memref<16x80xf32, #tpu.memory_space<vmem>>, vector<16x16xf32>
    tpu.vector_store %arg14[%c0_66, %c16_67], %64 {strides = array<i32>} : memref<16x80xf32, #tpu.memory_space<vmem>>, vector<16x16xf32>,
    %c2_68 = arith.constant 2 : index
    %c0_69 = arith.constant 0 : index
    %66 = vector.load %arg13[%c2_68, %c0_69] : memref<20x16xf32, #tpu.memory_space<vmem>>, vector<16x16xf32>
    %c0_70 = arith.constant 0 : index
    %c32_71 = arith.constant 32 : index
    %67 = vector.load %arg14[%c0_70, %c32_71] : memref<16x80xf32, #tpu.memory_space<vmem>>, vector<16x16xf32>
    tpu.vector_store %arg14[%c0_70, %c32_71], %66 {strides = array<i32>} : memref<16x80xf32, #tpu.memory_space<vmem>>, vector<16x16xf32>,
    %c3_72 = arith.constant 3 : index
    %c0_73 = arith.constant 0 : index
    %68 = vector.load %arg13[%c3_72, %c0_73] : memref<20x16xf32, #tpu.memory_space<vmem>>, vector<16x16xf32>
    %c0_74 = arith.constant 0 : index
    %c48_75 = arith.constant 48 : index
    %69 = vector.load %arg14[%c0_74, %c48_75] : memref<16x80xf32, #tpu.memory_space<vmem>>, vector<16x16xf32>
    tpu.vector_store %arg14[%c0_74, %c48_75], %68 {strides = array<i32>} : memref<16x80xf32, #tpu.memory_space<vmem>>, vector<16x16xf32>,
    %c4_76 = arith.constant 4 : index
    %c0_77 = arith.constant 0 : index
    %70 = vector.load %arg13[%c4_76, %c0_77] : memref<20x16xf32, #tpu.memory_space<vmem>>, vector<16x16xf32>
    %c0_78 = arith.constant 0 : index
    %c64_79 = arith.constant 64 : index
    %71 = vector.load %arg14[%c0_78, %c64_79] : memref<16x80xf32, #tpu.memory_space<vmem>>, vector<16x16xf32>
    tpu.vector_store %arg14[%c0_78, %c64_79], %70 {strides = array<i32>} : memref<16x80xf32, #tpu.memory_space<vmem>>, vector<16x16xf32>,
    %c0_80 = arith.constant 0 : index
    %c0_81 = arith.constant 0 : index
    %72 = vector.load %arg14[%c0_80, %c0_81] : memref<16x80xf32, #tpu.memory_space<vmem>>, vector<16x80xf32>
    %c0_82 = arith.constant 0 : index
    %c0_83 = arith.constant 0 : index
    %73 = vector.load %arg9[%c0_82, %c0_83] : memref<80x16xbf16, #tpu.memory_space<vmem>>, vector<80x16xbf16>
    %74 = arith.truncf %72 : vector<16x80xf32> to vector<16x80xbf16>
    %cst_84 = arith.constant dense<0.000000e+00> : vector<16x16xf32>
    %75 = tpu.matmul %74, %73, %cst_84 {dimension_numbers = #tpu.dot_dimension_numbers<[1], [0], [0], [1], [0, 0, 1, 1], [], []>} : vector<16x80xbf16>, vector<80x16xbf16>, vector<16x16xf32> -> vector<16x16xf32>
    %c0_85 = arith.constant 0 : index
    %c0_86 = arith.constant 0 : index
    %76 = vector.load %arg10[%c0_85, %c0_86] : memref<1x16xf32, #tpu.memory_space<vmem>>, vector<1x16xf32>
    %77 = vector.broadcast %76 : vector<1x16xf32> to vector<16x16xf32>
    %78 = arith.mulf %75, %77 : vector<16x16xf32>
    %c0_87 = arith.constant 0 : index
    %c0_88 = arith.constant 0 : index
    %79 = vector.load %arg11[%c0_87, %c0_88] : memref<1x16xf32, #tpu.memory_space<vmem>>, vector<1x16xf32>
    %80 = vector.broadcast %79 : vector<1x16xf32> to vector<16x16xf32>
    %81 = arith.addf %78, %80 : vector<16x16xf32>
    %82 = vector.extract_strided_slice %81 {offsets = [0, 0], sizes = [16, 8], strides = [1, 1]} : vector<16x16xf32> to vector<16x8xf32>
    %c0_89 = arith.constant 0 : index
    %c0_90 = arith.constant 0 : index
    %c0_91 = arith.constant 0 : index
    %83 = vector.load %arg12[%c0_89, %c0_90, %c0_91] : memref<1x16x8xf32, #tpu.memory_space<vmem>>, vector<1x16x8xf32>
    %84 = vector.shape_cast %83 : vector<1x16x8xf32> to vector<16x8xf32>
    %85 = vector.shape_cast %82 : vector<16x8xf32> to vector<1x16x8xf32>
    tpu.vector_store %arg12[%c0_89, %c0_90, %c0_91], %85 {strides = array<i32>} : memref<1x16x8xf32, #tpu.memory_space<vmem>>, vector<1x16x8xf32>,
    return
  }
  func.func @transform_0(%arg0: i32, %arg1: memref<2xi32, #tpu.memory_space<smem>>) -> (i32, i32, i32) {
    %c0_i32 = arith.constant 0 : i32
    %c0_i32_0 = arith.constant 0 : i32
    %c0_i32_1 = arith.constant 0 : i32
    return %arg0, %c0_i32, %c0_i32_0 : i32, i32, i32
  }
  func.func @transform_1(%arg0: i32, %arg1: memref<2xi32, #tpu.memory_space<smem>>) -> (i32, i32) {
    %c0_i32 = arith.constant 0 : i32
    %c0_i32_0 = arith.constant 0 : i32
    %c0_i32_1 = arith.constant 0 : i32
    return %c0_i32, %c0_i32_0 : i32, i32
  }
  func.func @transform_2(%arg0: i32, %arg1: memref<2xi32, #tpu.memory_space<smem>>) -> (i32, i32) {
    %c0_i32 = arith.constant 0 : i32
    %c0_i32_0 = arith.constant 0 : i32
    %c0_i32_1 = arith.constant 0 : i32
    return %c0_i32, %c0_i32_0 : i32, i32
  }
  func.func @transform_3(%arg0: i32, %arg1: memref<2xi32, #tpu.memory_space<smem>>) -> (i32, i32) {
    %c0_i32 = arith.constant 0 : i32
    %c0_i32_0 = arith.constant 0 : i32
    %c0_i32_1 = arith.constant 0 : i32
    return %c0_i32, %c0_i32_0 : i32, i32
  }
  func.func @transform_4(%arg0: i32, %arg1: memref<2xi32, #tpu.memory_space<smem>>) -> (i32, i32) {
    %c0_i32 = arith.constant 0 : i32
    %c0_i32_0 = arith.constant 0 : i32
    %c0_i32_1 = arith.constant 0 : i32
    return %c0_i32, %c0_i32_0 : i32, i32
  }
  func.func @transform_5(%arg0: i32, %arg1: memref<2xi32, #tpu.memory_space<smem>>) -> (i32, i32) {
    %c0_i32 = arith.constant 0 : i32
    %c0_i32_0 = arith.constant 0 : i32
    %c0_i32_1 = arith.constant 0 : i32
    return %c0_i32, %c0_i32_0 : i32, i32
  }
  func.func @transform_6(%arg0: i32, %arg1: memref<2xi32, #tpu.memory_space<smem>>) -> (i32, i32) {
    %c0_i32 = arith.constant 0 : i32
    %c0_i32_0 = arith.constant 0 : i32
    %c0_i32_1 = arith.constant 0 : i32
    return %c0_i32, %c0_i32_0 : i32, i32
  }
  func.func @transform_7(%arg0: i32, %arg1: memref<2xi32, #tpu.memory_space<smem>>) -> (i32, i32) {
    %c0_i32 = arith.constant 0 : i32
    %c0_i32_0 = arith.constant 0 : i32
    %c0_i32_1 = arith.constant 0 : i32
    return %c0_i32, %c0_i32_0 : i32, i32
  }
  func.func @transform_8(%arg0: i32, %arg1: memref<2xi32, #tpu.memory_space<smem>>) -> (i32, i32) {
    %c0_i32 = arith.constant 0 : i32
    %c0_i32_0 = arith.constant 0 : i32
    %c0_i32_1 = arith.constant 0 : i32
    return %c0_i32, %c0_i32_0 : i32, i32
  }
  func.func @transform_9(%arg0: i32, %arg1: memref<2xi32, #tpu.memory_space<smem>>) -> (i32, i32) {
    %c0_i32 = arith.constant 0 : i32
    %c0_i32_0 = arith.constant 0 : i32
    %c0_i32_1 = arith.constant 0 : i32
    return %c0_i32, %c0_i32_0 : i32, i32
  }
  func.func @transform_10(%arg0: i32, %arg1: memref<2xi32, #tpu.memory_space<smem>>) -> (i32, i32, i32) {
    %c0_i32 = arith.constant 0 : i32
    %c0_i32_0 = arith.constant 0 : i32
    %c0_i32_1 = arith.constant 0 : i32
    return %arg0, %c0_i32, %c0_i32_0 : i32, i32, i32
  }
}

module attributes {stable_mosaic.version = 11 : i64} {
  func.func @kernel(%arg0: i32, %arg1: memref<2xi32, #tpu.memory_space<smem>>, %arg2: memref<2xi32, #tpu.memory_space<smem>>, %arg3: memref<1x16x8xf32, #tpu.memory_space<vmem>>, %arg4: memref<1x8x32xf32, #tpu.memory_space<vmem>>, %arg5: memref<16x32xf32, #tpu.memory_space<vmem>>, %arg6: memref<8x32xbf16, #tpu.memory_space<vmem>>, %arg7: memref<1x32xf32, #tpu.memory_space<vmem>>, %arg8: memref<32x32xbf16, #tpu.memory_space<vmem>>, %arg9: memref<1x32xf32, #tpu.memory_space<vmem>>, %arg10: memref<32x32xbf16, #tpu.memory_space<vmem>>, %arg11: memref<32x96xbf16, #tpu.memory_space<vmem>>, %arg12: memref<1x96xf32, #tpu.memory_space<vmem>>, %arg13: memref<32x32xbf16, #tpu.memory_space<vmem>>, %arg14: memref<1x32xf32, #tpu.memory_space<vmem>>, %arg15: memref<1x32xf32, #tpu.memory_space<vmem>>, %arg16: memref<1x32xf32, #tpu.memory_space<vmem>>, %arg17: memref<32x32xbf16, #tpu.memory_space<vmem>>, %arg18: memref<1x32xf32, #tpu.memory_space<vmem>>, %arg19: memref<32x64xbf16, #tpu.memory_space<vmem>>, %arg20: memref<1x64xf32, #tpu.memory_space<vmem>>, %arg21: memref<32x32xbf16, #tpu.memory_space<vmem>>, %arg22: memref<1x32xf32, #tpu.memory_space<vmem>>, %arg23: memref<1x32xf32, #tpu.memory_space<vmem>>, %arg24: memref<1x32xf32, #tpu.memory_space<vmem>>, %arg25: memref<32x64xbf16, #tpu.memory_space<vmem>>, %arg26: memref<1x64xf32, #tpu.memory_space<vmem>>, %arg27: memref<64x32xbf16, #tpu.memory_space<vmem>>, %arg28: memref<1x32xf32, #tpu.memory_space<vmem>>, %arg29: memref<1x32xf32, #tpu.memory_space<vmem>>, %arg30: memref<1x32xf32, #tpu.memory_space<vmem>>, %arg31: memref<32x9xbf16, #tpu.memory_space<vmem>>, %arg32: memref<1x9xf32, #tpu.memory_space<vmem>>, %arg33: memref<1x16x9xf32, #tpu.memory_space<vmem>>, %arg34: memref<1x2x16x8xf32, #tpu.memory_space<vmem>>) attributes {dimension_semantics = [#tpu.dimension_semantics<parallel>], iteration_bounds = array<i64: 2>, scalar_prefetch = 2 : i64, scratch_operands = 0 : i64, tpu.core_type = #tpu.core_type<tc>, window_params = [{transform_indices = @transform_0, window_bounds = array<i64: 1, 16, 8>}, {transform_indices = @transform_1, window_bounds = array<i64: 1, 8, 32>}, {pipeline_mode = #tpu.pipeline_mode<synchronous>, transform_indices = @transform_2, window_bounds = array<i64: 16, 32>}, {pipeline_mode = #tpu.pipeline_mode<synchronous>, transform_indices = @transform_3, window_bounds = array<i64: 8, 32>}, {pipeline_mode = #tpu.pipeline_mode<synchronous>, transform_indices = @transform_4, window_bounds = array<i64: 1, 32>}, {pipeline_mode = #tpu.pipeline_mode<synchronous>, transform_indices = @transform_5, window_bounds = array<i64: 32, 32>}, {pipeline_mode = #tpu.pipeline_mode<synchronous>, transform_indices = @transform_6, window_bounds = array<i64: 1, 32>}, {pipeline_mode = #tpu.pipeline_mode<synchronous>, transform_indices = @transform_7, window_bounds = array<i64: 32, 32>}, {pipeline_mode = #tpu.pipeline_mode<synchronous>, transform_indices = @transform_8, window_bounds = array<i64: 32, 96>}, {pipeline_mode = #tpu.pipeline_mode<synchronous>, transform_indices = @transform_9, window_bounds = array<i64: 1, 96>}, {pipeline_mode = #tpu.pipeline_mode<synchronous>, transform_indices = @transform_10, window_bounds = array<i64: 32, 32>}, {pipeline_mode = #tpu.pipeline_mode<synchronous>, transform_indices = @transform_11, window_bounds = array<i64: 1, 32>}, {pipeline_mode = #tpu.pipeline_mode<synchronous>, transform_indices = @transform_12, window_bounds = array<i64: 1, 32>}, {pipeline_mode = #tpu.pipeline_mode<synchronous>, transform_indices = @transform_13, window_bounds = array<i64: 1, 32>}, {pipeline_mode = #tpu.pipeline_mode<synchronous>, transform_indices = @transform_14, window_bounds = array<i64: 32, 32>}, {pipeline_mode = #tpu.pipeline_mode<synchronous>, transform_indices = @transform_15, window_bounds = array<i64: 1, 32>}, {pipeline_mode = #tpu.pipeline_mode<synchronous>, transform_indices = @transform_16, window_bounds = array<i64: 32, 64>}, {pipeline_mode = #tpu.pipeline_mode<synchronous>, transform_indices = @transform_17, window_bounds = array<i64: 1, 64>}, {pipeline_mode = #tpu.pipeline_mode<synchronous>, transform_indices = @transform_18, window_bounds = array<i64: 32, 32>}, {pipeline_mode = #tpu.pipeline_mode<synchronous>, transform_indices = @transform_19, window_bounds = array<i64: 1, 32>}, {pipeline_mode = #tpu.pipeline_mode<synchronous>, transform_indices = @transform_20, window_bounds = array<i64: 1, 32>}, {pipeline_mode = #tpu.pipeline_mode<synchronous>, transform_indices = @transform_21, window_bounds = array<i64: 1, 32>}, {pipeline_mode = #tpu.pipeline_mode<synchronous>, transform_indices = @transform_22, window_bounds = array<i64: 32, 64>}, {pipeline_mode = #tpu.pipeline_mode<synchronous>, transform_indices = @transform_23, window_bounds = array<i64: 1, 64>}, {pipeline_mode = #tpu.pipeline_mode<synchronous>, transform_indices = @transform_24, window_bounds = array<i64: 64, 32>}, {pipeline_mode = #tpu.pipeline_mode<synchronous>, transform_indices = @transform_25, window_bounds = array<i64: 1, 32>}, {pipeline_mode = #tpu.pipeline_mode<synchronous>, transform_indices = @transform_26, window_bounds = array<i64: 1, 32>}, {pipeline_mode = #tpu.pipeline_mode<synchronous>, transform_indices = @transform_27, window_bounds = array<i64: 1, 32>}, {pipeline_mode = #tpu.pipeline_mode<synchronous>, transform_indices = @transform_28, window_bounds = array<i64: 32, 9>}, {pipeline_mode = #tpu.pipeline_mode<synchronous>, transform_indices = @transform_29, window_bounds = array<i64: 1, 9>}, {transform_indices = @transform_30, window_bounds = array<i64: 1, 16, 9>}, {transform_indices = @transform_31, window_bounds = array<i64: 1, 2, 16, 8>}]} {
    %0 = arith.index_cast %arg0 : i32 to index
    %1 = memref.load %arg1[%0] : memref<2xi32, #tpu.memory_space<smem>>
    %2 = arith.index_cast %arg0 : i32 to index
    %3 = memref.load %arg2[%2] : memref<2xi32, #tpu.memory_space<smem>>
    %c0 = arith.constant 0 : index
    %c0_0 = arith.constant 0 : index
    %c0_1 = arith.constant 0 : index
    %4 = vector.load %arg3[%c0, %c0_0, %c0_1] : memref<1x16x8xf32, #tpu.memory_space<vmem>>, vector<1x16x8xf32>
    %5 = vector.shape_cast %4 : vector<1x16x8xf32> to vector<16x8xf32>
    %c0_2 = arith.constant 0 : index
    %c0_3 = arith.constant 0 : index
    %c0_4 = arith.constant 0 : index
    %6 = vector.load %arg4[%c0_2, %c0_3, %c0_4] : memref<1x8x32xf32, #tpu.memory_space<vmem>>, vector<1x8x32xf32>
    %7 = vector.shape_cast %6 : vector<1x8x32xf32> to vector<8x32xf32>
    %c0_5 = arith.constant 0 : index
    %c0_6 = arith.constant 0 : index
    %8 = vector.load %arg6[%c0_5, %c0_6] : memref<8x32xbf16, #tpu.memory_space<vmem>>, vector<8x32xbf16>
    %c0_7 = arith.constant 0 : index
    %c0_8 = arith.constant 0 : index
    %9 = vector.load %arg7[%c0_7, %c0_8] : memref<1x32xf32, #tpu.memory_space<vmem>>, vector<1x32xf32>
    %10 = arith.truncf %5 : vector<16x8xf32> to vector<16x8xbf16>
    %cst = arith.constant dense<0.000000e+00> : vector<16x32xf32>
    %11 = tpu.matmul %10, %8, %cst {dimension_numbers = #tpu.dot_dimension_numbers<[1], [0], [0], [1], [0, 0, 1, 1], [], []>} : vector<16x8xbf16>, vector<8x32xbf16>, vector<16x32xf32> -> vector<16x32xf32>
    %12 = vector.broadcast %9 : vector<1x32xf32> to vector<16x32xf32>
    %13 = arith.addf %11, %12 : vector<16x32xf32>
    %cst_9 = arith.constant 0.000000e+00 : f32
    %14 = vector.broadcast %cst_9 : f32 to vector<16x32xf32>
    %15 = arith.maximumf %13, %14 : vector<16x32xf32>
    %c0_10 = arith.constant 0 : index
    %c0_11 = arith.constant 0 : index
    %16 = vector.load %arg8[%c0_10, %c0_11] : memref<32x32xbf16, #tpu.memory_space<vmem>>, vector<32x32xbf16>
    %c0_12 = arith.constant 0 : index
    %c0_13 = arith.constant 0 : index
    %17 = vector.load %arg9[%c0_12, %c0_13] : memref<1x32xf32, #tpu.memory_space<vmem>>, vector<1x32xf32>
    %18 = arith.truncf %15 : vector<16x32xf32> to vector<16x32xbf16>
    %cst_14 = arith.constant dense<0.000000e+00> : vector<16x32xf32>
    %19 = tpu.matmul %18, %16, %cst_14 {dimension_numbers = #tpu.dot_dimension_numbers<[1], [0], [0], [1], [0, 0, 1, 1], [], []>} : vector<16x32xbf16>, vector<32x32xbf16>, vector<16x32xf32> -> vector<16x32xf32>
    %20 = vector.broadcast %17 : vector<1x32xf32> to vector<16x32xf32>
    %21 = arith.addf %19, %20 : vector<16x32xf32>
    %cst_15 = arith.constant 0.000000e+00 : f32
    %22 = vector.broadcast %cst_15 : f32 to vector<16x32xf32>
    %23 = arith.maximumf %21, %22 : vector<16x32xf32>
    %c0_16 = arith.constant 0 : index
    %c0_17 = arith.constant 0 : index
    %24 = vector.load %arg10[%c0_16, %c0_17] : memref<32x32xbf16, #tpu.memory_space<vmem>>, vector<32x32xbf16>
    %25 = arith.truncf %23 : vector<16x32xf32> to vector<16x32xbf16>
    %cst_18 = arith.constant dense<0.000000e+00> : vector<16x32xf32>
    %26 = tpu.matmul %25, %24, %cst_18 {dimension_numbers = #tpu.dot_dimension_numbers<[1], [0], [0], [1], [0, 0, 1, 1], [], []>} : vector<16x32xbf16>, vector<32x32xbf16>, vector<16x32xf32> -> vector<16x32xf32>
    %c0_19 = arith.constant 0 : index
    %c0_20 = arith.constant 0 : index
    %27 = vector.load %arg5[%c0_19, %c0_20] : memref<16x32xf32, #tpu.memory_space<vmem>>, vector<16x32xf32>
    %28 = arith.addf %26, %27 : vector<16x32xf32>
    %29 = tpu.iota {dimensions = array<i32: 0>} : vector<16x16xi32>
    %30 = tpu.iota {dimensions = array<i32: 1>} : vector<16x16xi32>
    %31 = arith.cmpi sle, %30, %29 : vector<16x16xi32>
    %32 = vector.broadcast %3 : i32 to vector<16x16xi32>
    %33 = arith.cmpi slt, %30, %32 : vector<16x16xi32>
    %34 = arith.andi %31, %33 : vector<16x16xi1>
    %cst_21 = arith.constant 0.000000e+00 : f32
    %cst_22 = arith.constant -1.000000e+09 : f32
    %35 = vector.broadcast %cst_21 : f32 to vector<16x16xf32>
    %36 = vector.broadcast %cst_22 : f32 to vector<16x16xf32>
    %37 = arith.select %34, %35, %36 : vector<16x16xi1>, vector<16x16xf32>
    %c0_23 = arith.constant 0 : index
    %c0_24 = arith.constant 0 : index
    %38 = vector.load %arg11[%c0_23, %c0_24] : memref<32x96xbf16, #tpu.memory_space<vmem>>, vector<32x96xbf16>
    %c0_25 = arith.constant 0 : index
    %c0_26 = arith.constant 0 : index
    %39 = vector.load %arg12[%c0_25, %c0_26] : memref<1x96xf32, #tpu.memory_space<vmem>>, vector<1x96xf32>
    %40 = arith.truncf %28 : vector<16x32xf32> to vector<16x32xbf16>
    %cst_27 = arith.constant dense<0.000000e+00> : vector<16x96xf32>
    %41 = tpu.matmul %40, %38, %cst_27 {dimension_numbers = #tpu.dot_dimension_numbers<[1], [0], [0], [1], [0, 0, 1, 1], [], []>} : vector<16x32xbf16>, vector<32x96xbf16>, vector<16x96xf32> -> vector<16x96xf32>
    %42 = vector.broadcast %39 : vector<1x96xf32> to vector<16x96xf32>
    %43 = arith.addf %41, %42 : vector<16x96xf32>
    %44 = vector.extract_strided_slice %43 {offsets = [0, 0], sizes = [16, 32], strides = [1, 1]} : vector<16x96xf32> to vector<16x32xf32>
    %45 = vector.extract_strided_slice %43 {offsets = [0, 32], sizes = [16, 32], strides = [1, 1]} : vector<16x96xf32> to vector<16x32xf32>
    %46 = vector.extract_strided_slice %43 {offsets = [0, 64], sizes = [16, 32], strides = [1, 1]} : vector<16x96xf32> to vector<16x32xf32>
    %c0_28 = arith.constant 0 : index
    %c0_29 = arith.constant 0 : index
    %47 = vector.load %arg14[%c0_28, %c0_29] : memref<1x32xf32, #tpu.memory_space<vmem>>, vector<1x32xf32>
    %cst_30 = arith.constant 0.000000e+00 : f32
    %48 = vector.broadcast %cst_30 : f32 to vector<16x32xf32>
    %49 = vector.extract_strided_slice %44 {offsets = [0, 0], sizes = [16, 16], strides = [1, 1]} : vector<16x32xf32> to vector<16x16xf32>
    %50 = arith.truncf %49 : vector<16x16xf32> to vector<16x16xbf16>
    %51 = vector.extract_strided_slice %45 {offsets = [0, 0], sizes = [16, 16], strides = [1, 1]} : vector<16x32xf32> to vector<16x16xf32>
    %52 = arith.truncf %51 : vector<16x16xf32> to vector<16x16xbf16>
    %53 = vector.extract_strided_slice %46 {offsets = [0, 0], sizes = [16, 16], strides = [1, 1]} : vector<16x32xf32> to vector<16x16xf32>
    %54 = arith.truncf %53 : vector<16x16xf32> to vector<16x16xbf16>
    %cst_31 = arith.constant dense<0.000000e+00> : vector<16x16xf32>
    %55 = tpu.matmul %50, %52, %cst_31 {dimension_numbers = #tpu.dot_dimension_numbers<[1], [1], [0], [0], [0, 0, 1, 0], [], []>} : vector<16x16xbf16>, vector<16x16xbf16>, vector<16x16xf32> -> vector<16x16xf32>
    %cst_32 = arith.constant 2.500000e-01 : f32
    %56 = vector.broadcast %cst_32 : f32 to vector<16x16xf32>
    %57 = arith.mulf %55, %56 : vector<16x16xf32>
    %58 = arith.addf %57, %37 : vector<16x16xf32>
    %cst_33 = arith.constant dense<0xFF800000> : vector<16xf32>
    %59 = vector.multi_reduction <maximumf>, %58, %cst_33 [1] : vector<16x16xf32> to vector<16xf32>
    %60 = vector.shape_cast %59 : vector<16xf32> to vector<16x1xf32>
    %61 = vector.broadcast %60 : vector<16x1xf32> to vector<16x16xf32>
    %62 = arith.subf %58, %61 : vector<16x16xf32>
    %63 = math.exp %62 : vector<16x16xf32>
    %cst_34 = arith.constant dense<0.000000e+00> : vector<16xf32>
    %64 = vector.multi_reduction <add>, %63, %cst_34 [1] : vector<16x16xf32> to vector<16xf32>
    %65 = vector.shape_cast %64 : vector<16xf32> to vector<16x1xf32>
    %66 = tpu.reciprocal %65 {approx = true} : vector<16x1xf32> -> vector<16x1xf32>
    %67 = vector.broadcast %66 : vector<16x1xf32> to vector<16x16xf32>
    %68 = arith.mulf %63, %67 : vector<16x16xf32>
    %69 = arith.truncf %68 : vector<16x16xf32> to vector<16x16xbf16>
    %cst_35 = arith.constant dense<0.000000e+00> : vector<16x16xf32>
    %70 = tpu.matmul %69, %54, %cst_35 {dimension_numbers = #tpu.dot_dimension_numbers<[1], [0], [0], [1], [0, 0, 1, 1], [], []>} : vector<16x16xbf16>, vector<16x16xbf16>, vector<16x16xf32> -> vector<16x16xf32>
    %c0_36 = arith.constant 0 : index
    %c0_37 = arith.constant 0 : index
    %71 = vector.load %arg13[%c0_36, %c0_37] : memref<32x32xbf16, #tpu.memory_space<vmem>>, vector<16x32xbf16>
    %72 = arith.truncf %70 : vector<16x16xf32> to vector<16x16xbf16>
    %cst_38 = arith.constant dense<0.000000e+00> : vector<16x32xf32>
    %73 = tpu.matmul %72, %71, %cst_38 {dimension_numbers = #tpu.dot_dimension_numbers<[1], [0], [0], [1], [0, 0, 1, 1], [], []>} : vector<16x16xbf16>, vector<16x32xbf16>, vector<16x32xf32> -> vector<16x32xf32>
    %74 = arith.addf %48, %73 : vector<16x32xf32>
    %75 = vector.extract_strided_slice %44 {offsets = [0, 16], sizes = [16, 16], strides = [1, 1]} : vector<16x32xf32> to vector<16x16xf32>
    %76 = arith.truncf %75 : vector<16x16xf32> to vector<16x16xbf16>
    %77 = vector.extract_strided_slice %45 {offsets = [0, 16], sizes = [16, 16], strides = [1, 1]} : vector<16x32xf32> to vector<16x16xf32>
    %78 = arith.truncf %77 : vector<16x16xf32> to vector<16x16xbf16>
    %79 = vector.extract_strided_slice %46 {offsets = [0, 16], sizes = [16, 16], strides = [1, 1]} : vector<16x32xf32> to vector<16x16xf32>
    %80 = arith.truncf %79 : vector<16x16xf32> to vector<16x16xbf16>
    %cst_39 = arith.constant dense<0.000000e+00> : vector<16x16xf32>
    %81 = tpu.matmul %76, %78, %cst_39 {dimension_numbers = #tpu.dot_dimension_numbers<[1], [1], [0], [0], [0, 0, 1, 0], [], []>} : vector<16x16xbf16>, vector<16x16xbf16>, vector<16x16xf32> -> vector<16x16xf32>
    %cst_40 = arith.constant 2.500000e-01 : f32
    %82 = vector.broadcast %cst_40 : f32 to vector<16x16xf32>
    %83 = arith.mulf %81, %82 : vector<16x16xf32>
    %84 = arith.addf %83, %37 : vector<16x16xf32>
    %cst_41 = arith.constant dense<0xFF800000> : vector<16xf32>
    %85 = vector.multi_reduction <maximumf>, %84, %cst_41 [1] : vector<16x16xf32> to vector<16xf32>
    %86 = vector.shape_cast %85 : vector<16xf32> to vector<16x1xf32>
    %87 = vector.broadcast %86 : vector<16x1xf32> to vector<16x16xf32>
    %88 = arith.subf %84, %87 : vector<16x16xf32>
    %89 = math.exp %88 : vector<16x16xf32>
    %cst_42 = arith.constant dense<0.000000e+00> : vector<16xf32>
    %90 = vector.multi_reduction <add>, %89, %cst_42 [1] : vector<16x16xf32> to vector<16xf32>
    %91 = vector.shape_cast %90 : vector<16xf32> to vector<16x1xf32>
    %92 = tpu.reciprocal %91 {approx = true} : vector<16x1xf32> -> vector<16x1xf32>
    %93 = vector.broadcast %92 : vector<16x1xf32> to vector<16x16xf32>
    %94 = arith.mulf %89, %93 : vector<16x16xf32>
    %95 = arith.truncf %94 : vector<16x16xf32> to vector<16x16xbf16>
    %cst_43 = arith.constant dense<0.000000e+00> : vector<16x16xf32>
    %96 = tpu.matmul %95, %80, %cst_43 {dimension_numbers = #tpu.dot_dimension_numbers<[1], [0], [0], [1], [0, 0, 1, 1], [], []>} : vector<16x16xbf16>, vector<16x16xbf16>, vector<16x16xf32> -> vector<16x16xf32>
    %c16 = arith.constant 16 : index
    %c0_44 = arith.constant 0 : index
    %97 = vector.load %arg13[%c16, %c0_44] : memref<32x32xbf16, #tpu.memory_space<vmem>>, vector<16x32xbf16>
    %98 = arith.truncf %96 : vector<16x16xf32> to vector<16x16xbf16>
    %cst_45 = arith.constant dense<0.000000e+00> : vector<16x32xf32>
    %99 = tpu.matmul %98, %97, %cst_45 {dimension_numbers = #tpu.dot_dimension_numbers<[1], [0], [0], [1], [0, 0, 1, 1], [], []>} : vector<16x16xbf16>, vector<16x32xbf16>, vector<16x32xf32> -> vector<16x32xf32>
    %100 = arith.addf %74, %99 : vector<16x32xf32>
    %101 = vector.broadcast %47 : vector<1x32xf32> to vector<16x32xf32>
    %102 = arith.addf %100, %101 : vector<16x32xf32>
    %103 = arith.addf %28, %102 : vector<16x32xf32>
    %c0_46 = arith.constant 0 : index
    %c0_47 = arith.constant 0 : index
    %104 = vector.load %arg15[%c0_46, %c0_47] : memref<1x32xf32, #tpu.memory_space<vmem>>, vector<1x32xf32>
    %c0_48 = arith.constant 0 : index
    %c0_49 = arith.constant 0 : index
    %105 = vector.load %arg16[%c0_48, %c0_49] : memref<1x32xf32, #tpu.memory_space<vmem>>, vector<1x32xf32>
    %cst_50 = arith.constant dense<0.000000e+00> : vector<16xf32>
    %106 = vector.multi_reduction <add>, %103, %cst_50 [1] : vector<16x32xf32> to vector<16xf32>
    %107 = vector.shape_cast %106 : vector<16xf32> to vector<16x1xf32>
    %cst_51 = arith.constant 3.200000e+01 : f32
    %108 = vector.broadcast %cst_51 : f32 to vector<16x1xf32>
    %109 = arith.divf %107, %108 : vector<16x1xf32>
    %110 = vector.broadcast %109 : vector<16x1xf32> to vector<16x32xf32>
    %111 = arith.subf %103, %110 : vector<16x32xf32>
    %112 = arith.mulf %111, %111 : vector<16x32xf32>
    %cst_52 = arith.constant dense<0.000000e+00> : vector<16xf32>
    %113 = vector.multi_reduction <add>, %112, %cst_52 [1] : vector<16x32xf32> to vector<16xf32>
    %114 = vector.shape_cast %113 : vector<16xf32> to vector<16x1xf32>
    %cst_53 = arith.constant 3.200000e+01 : f32
    %115 = vector.broadcast %cst_53 : f32 to vector<16x1xf32>
    %116 = arith.divf %114, %115 : vector<16x1xf32>
    %117 = vector.broadcast %109 : vector<16x1xf32> to vector<16x32xf32>
    %118 = arith.subf %103, %117 : vector<16x32xf32>
    %cst_54 = arith.constant 9.99999974E-6 : f32
    %119 = vector.broadcast %cst_54 : f32 to vector<16x1xf32>
    %120 = arith.addf %116, %119 : vector<16x1xf32>
    %121 = math.rsqrt %120 : vector<16x1xf32>
    %122 = vector.broadcast %121 : vector<16x1xf32> to vector<16x32xf32>
    %123 = arith.mulf %118, %122 : vector<16x32xf32>
    %124 = vector.broadcast %104 : vector<1x32xf32> to vector<16x32xf32>
    %125 = arith.mulf %123, %124 : vector<16x32xf32>
    %126 = vector.broadcast %105 : vector<1x32xf32> to vector<16x32xf32>
    %127 = arith.addf %125, %126 : vector<16x32xf32>
    %128 = tpu.iota {dimensions = array<i32: 1>} : vector<16x8xi32>
    %129 = vector.broadcast %1 : i32 to vector<16x8xi32>
    %130 = arith.cmpi slt, %128, %129 : vector<16x8xi32>
    %cst_55 = arith.constant 0.000000e+00 : f32
    %cst_56 = arith.constant -1.000000e+09 : f32
    %131 = vector.broadcast %cst_55 : f32 to vector<16x8xf32>
    %132 = vector.broadcast %cst_56 : f32 to vector<16x8xf32>
    %133 = arith.select %130, %131, %132 : vector<16x8xi1>, vector<16x8xf32>
    %c0_57 = arith.constant 0 : index
    %c0_58 = arith.constant 0 : index
    %134 = vector.load %arg17[%c0_57, %c0_58] : memref<32x32xbf16, #tpu.memory_space<vmem>>, vector<32x32xbf16>
    %c0_59 = arith.constant 0 : index
    %c0_60 = arith.constant 0 : index
    %135 = vector.load %arg18[%c0_59, %c0_60] : memref<1x32xf32, #tpu.memory_space<vmem>>, vector<1x32xf32>
    %136 = arith.truncf %127 : vector<16x32xf32> to vector<16x32xbf16>
    %cst_61 = arith.constant dense<0.000000e+00> : vector<16x32xf32>
    %137 = tpu.matmul %136, %134, %cst_61 {dimension_numbers = #tpu.dot_dimension_numbers<[1], [0], [0], [1], [0, 0, 1, 1], [], []>} : vector<16x32xbf16>, vector<32x32xbf16>, vector<16x32xf32> -> vector<16x32xf32>
    %138 = vector.broadcast %135 : vector<1x32xf32> to vector<16x32xf32>
    %139 = arith.addf %137, %138 : vector<16x32xf32>
    %c0_62 = arith.constant 0 : index
    %c0_63 = arith.constant 0 : index
    %140 = vector.load %arg19[%c0_62, %c0_63] : memref<32x64xbf16, #tpu.memory_space<vmem>>, vector<32x64xbf16>
    %c0_64 = arith.constant 0 : index
    %c0_65 = arith.constant 0 : index
    %141 = vector.load %arg20[%c0_64, %c0_65] : memref<1x64xf32, #tpu.memory_space<vmem>>, vector<1x64xf32>
    %142 = arith.truncf %7 : vector<8x32xf32> to vector<8x32xbf16>
    %cst_66 = arith.constant dense<0.000000e+00> : vector<8x64xf32>
    %143 = tpu.matmul %142, %140, %cst_66 {dimension_numbers = #tpu.dot_dimension_numbers<[1], [0], [0], [1], [0, 0, 1, 1], [], []>} : vector<8x32xbf16>, vector<32x64xbf16>, vector<8x64xf32> -> vector<8x64xf32>
    %144 = vector.broadcast %141 : vector<1x64xf32> to vector<8x64xf32>
    %145 = arith.addf %143, %144 : vector<8x64xf32>
    %146 = vector.extract_strided_slice %145 {offsets = [0, 0], sizes = [8, 32], strides = [1, 1]} : vector<8x64xf32> to vector<8x32xf32>
    %147 = vector.extract_strided_slice %145 {offsets = [0, 32], sizes = [8, 32], strides = [1, 1]} : vector<8x64xf32> to vector<8x32xf32>
    %c0_67 = arith.constant 0 : index
    %c0_68 = arith.constant 0 : index
    %148 = vector.load %arg22[%c0_67, %c0_68] : memref<1x32xf32, #tpu.memory_space<vmem>>, vector<1x32xf32>
    %cst_69 = arith.constant 0.000000e+00 : f32
    %149 = vector.broadcast %cst_69 : f32 to vector<16x32xf32>
    %150 = vector.extract_strided_slice %139 {offsets = [0, 0], sizes = [16, 16], strides = [1, 1]} : vector<16x32xf32> to vector<16x16xf32>
    %151 = arith.truncf %150 : vector<16x16xf32> to vector<16x16xbf16>
    %152 = vector.extract_strided_slice %146 {offsets = [0, 0], sizes = [8, 16], strides = [1, 1]} : vector<8x32xf32> to vector<8x16xf32>
    %153 = arith.truncf %152 : vector<8x16xf32> to vector<8x16xbf16>
    %154 = vector.extract_strided_slice %147 {offsets = [0, 0], sizes = [8, 16], strides = [1, 1]} : vector<8x32xf32> to vector<8x16xf32>
    %155 = arith.truncf %154 : vector<8x16xf32> to vector<8x16xbf16>
    %cst_70 = arith.constant dense<0.000000e+00> : vector<16x8xf32>
    %156 = tpu.matmul %151, %153, %cst_70 {dimension_numbers = #tpu.dot_dimension_numbers<[1], [1], [0], [0], [0, 0, 1, 0], [], []>} : vector<16x16xbf16>, vector<8x16xbf16>, vector<16x8xf32> -> vector<16x8xf32>
    %cst_71 = arith.constant 2.500000e-01 : f32
    %157 = vector.broadcast %cst_71 : f32 to vector<16x8xf32>
    %158 = arith.mulf %156, %157 : vector<16x8xf32>
    %159 = arith.addf %158, %133 : vector<16x8xf32>
    %cst_72 = arith.constant dense<0xFF800000> : vector<16xf32>
    %160 = vector.multi_reduction <maximumf>, %159, %cst_72 [1] : vector<16x8xf32> to vector<16xf32>
    %161 = vector.shape_cast %160 : vector<16xf32> to vector<16x1xf32>
    %162 = vector.broadcast %161 : vector<16x1xf32> to vector<16x8xf32>
    %163 = arith.subf %159, %162 : vector<16x8xf32>
    %164 = math.exp %163 : vector<16x8xf32>
    %cst_73 = arith.constant dense<0.000000e+00> : vector<16xf32>
    %165 = vector.multi_reduction <add>, %164, %cst_73 [1] : vector<16x8xf32> to vector<16xf32>
    %166 = vector.shape_cast %165 : vector<16xf32> to vector<16x1xf32>
    %167 = tpu.reciprocal %166 {approx = true} : vector<16x1xf32> -> vector<16x1xf32>
    %168 = vector.broadcast %167 : vector<16x1xf32> to vector<16x8xf32>
    %169 = arith.mulf %164, %168 : vector<16x8xf32>
    %170 = arith.truncf %169 : vector<16x8xf32> to vector<16x8xbf16>
    %cst_74 = arith.constant dense<0.000000e+00> : vector<16x16xf32>
    %171 = tpu.matmul %170, %155, %cst_74 {dimension_numbers = #tpu.dot_dimension_numbers<[1], [0], [0], [1], [0, 0, 1, 1], [], []>} : vector<16x8xbf16>, vector<8x16xbf16>, vector<16x16xf32> -> vector<16x16xf32>
    %c0_75 = arith.constant 0 : index
    %c0_76 = arith.constant 0 : index
    %172 = vector.load %arg21[%c0_75, %c0_76] : memref<32x32xbf16, #tpu.memory_space<vmem>>, vector<16x32xbf16>
    %173 = arith.truncf %171 : vector<16x16xf32> to vector<16x16xbf16>
    %cst_77 = arith.constant dense<0.000000e+00> : vector<16x32xf32>
    %174 = tpu.matmul %173, %172, %cst_77 {dimension_numbers = #tpu.dot_dimension_numbers<[1], [0], [0], [1], [0, 0, 1, 1], [], []>} : vector<16x16xbf16>, vector<16x32xbf16>, vector<16x32xf32> -> vector<16x32xf32>
    %175 = arith.addf %149, %174 : vector<16x32xf32>
    %176 = vector.extract_strided_slice %139 {offsets = [0, 16], sizes = [16, 16], strides = [1, 1]} : vector<16x32xf32> to vector<16x16xf32>
    %177 = arith.truncf %176 : vector<16x16xf32> to vector<16x16xbf16>
    %178 = vector.extract_strided_slice %146 {offsets = [0, 16], sizes = [8, 16], strides = [1, 1]} : vector<8x32xf32> to vector<8x16xf32>
    %179 = arith.truncf %178 : vector<8x16xf32> to vector<8x16xbf16>
    %180 = vector.extract_strided_slice %147 {offsets = [0, 16], sizes = [8, 16], strides = [1, 1]} : vector<8x32xf32> to vector<8x16xf32>
    %181 = arith.truncf %180 : vector<8x16xf32> to vector<8x16xbf16>
    %cst_78 = arith.constant dense<0.000000e+00> : vector<16x8xf32>
    %182 = tpu.matmul %177, %179, %cst_78 {dimension_numbers = #tpu.dot_dimension_numbers<[1], [1], [0], [0], [0, 0, 1, 0], [], []>} : vector<16x16xbf16>, vector<8x16xbf16>, vector<16x8xf32> -> vector<16x8xf32>
    %cst_79 = arith.constant 2.500000e-01 : f32
    %183 = vector.broadcast %cst_79 : f32 to vector<16x8xf32>
    %184 = arith.mulf %182, %183 : vector<16x8xf32>
    %185 = arith.addf %184, %133 : vector<16x8xf32>
    %cst_80 = arith.constant dense<0xFF800000> : vector<16xf32>
    %186 = vector.multi_reduction <maximumf>, %185, %cst_80 [1] : vector<16x8xf32> to vector<16xf32>
    %187 = vector.shape_cast %186 : vector<16xf32> to vector<16x1xf32>
    %188 = vector.broadcast %187 : vector<16x1xf32> to vector<16x8xf32>
    %189 = arith.subf %185, %188 : vector<16x8xf32>
    %190 = math.exp %189 : vector<16x8xf32>
    %cst_81 = arith.constant dense<0.000000e+00> : vector<16xf32>
    %191 = vector.multi_reduction <add>, %190, %cst_81 [1] : vector<16x8xf32> to vector<16xf32>
    %192 = vector.shape_cast %191 : vector<16xf32> to vector<16x1xf32>
    %193 = tpu.reciprocal %192 {approx = true} : vector<16x1xf32> -> vector<16x1xf32>
    %194 = vector.broadcast %193 : vector<16x1xf32> to vector<16x8xf32>
    %195 = arith.mulf %190, %194 : vector<16x8xf32>
    %196 = arith.truncf %195 : vector<16x8xf32> to vector<16x8xbf16>
    %cst_82 = arith.constant dense<0.000000e+00> : vector<16x16xf32>
    %197 = tpu.matmul %196, %181, %cst_82 {dimension_numbers = #tpu.dot_dimension_numbers<[1], [0], [0], [1], [0, 0, 1, 1], [], []>} : vector<16x8xbf16>, vector<8x16xbf16>, vector<16x16xf32> -> vector<16x16xf32>
    %c16_83 = arith.constant 16 : index
    %c0_84 = arith.constant 0 : index
    %198 = vector.load %arg21[%c16_83, %c0_84] : memref<32x32xbf16, #tpu.memory_space<vmem>>, vector<16x32xbf16>
    %199 = arith.truncf %197 : vector<16x16xf32> to vector<16x16xbf16>
    %cst_85 = arith.constant dense<0.000000e+00> : vector<16x32xf32>
    %200 = tpu.matmul %199, %198, %cst_85 {dimension_numbers = #tpu.dot_dimension_numbers<[1], [0], [0], [1], [0, 0, 1, 1], [], []>} : vector<16x16xbf16>, vector<16x32xbf16>, vector<16x32xf32> -> vector<16x32xf32>
    %201 = arith.addf %175, %200 : vector<16x32xf32>
    %202 = vector.broadcast %148 : vector<1x32xf32> to vector<16x32xf32>
    %203 = arith.addf %201, %202 : vector<16x32xf32>
    %204 = arith.addf %127, %203 : vector<16x32xf32>
    %c0_86 = arith.constant 0 : index
    %c0_87 = arith.constant 0 : index
    %205 = vector.load %arg23[%c0_86, %c0_87] : memref<1x32xf32, #tpu.memory_space<vmem>>, vector<1x32xf32>
    %c0_88 = arith.constant 0 : index
    %c0_89 = arith.constant 0 : index
    %206 = vector.load %arg24[%c0_88, %c0_89] : memref<1x32xf32, #tpu.memory_space<vmem>>, vector<1x32xf32>
    %cst_90 = arith.constant dense<0.000000e+00> : vector<16xf32>
    %207 = vector.multi_reduction <add>, %204, %cst_90 [1] : vector<16x32xf32> to vector<16xf32>
    %208 = vector.shape_cast %207 : vector<16xf32> to vector<16x1xf32>
    %cst_91 = arith.constant 3.200000e+01 : f32
    %209 = vector.broadcast %cst_91 : f32 to vector<16x1xf32>
    %210 = arith.divf %208, %209 : vector<16x1xf32>
    %211 = vector.broadcast %210 : vector<16x1xf32> to vector<16x32xf32>
    %212 = arith.subf %204, %211 : vector<16x32xf32>
    %213 = arith.mulf %212, %212 : vector<16x32xf32>
    %cst_92 = arith.constant dense<0.000000e+00> : vector<16xf32>
    %214 = vector.multi_reduction <add>, %213, %cst_92 [1] : vector<16x32xf32> to vector<16xf32>
    %215 = vector.shape_cast %214 : vector<16xf32> to vector<16x1xf32>
    %cst_93 = arith.constant 3.200000e+01 : f32
    %216 = vector.broadcast %cst_93 : f32 to vector<16x1xf32>
    %217 = arith.divf %215, %216 : vector<16x1xf32>
    %218 = vector.broadcast %210 : vector<16x1xf32> to vector<16x32xf32>
    %219 = arith.subf %204, %218 : vector<16x32xf32>
    %cst_94 = arith.constant 9.99999974E-6 : f32
    %220 = vector.broadcast %cst_94 : f32 to vector<16x1xf32>
    %221 = arith.addf %217, %220 : vector<16x1xf32>
    %222 = math.rsqrt %221 : vector<16x1xf32>
    %223 = vector.broadcast %222 : vector<16x1xf32> to vector<16x32xf32>
    %224 = arith.mulf %219, %223 : vector<16x32xf32>
    %225 = vector.broadcast %205 : vector<1x32xf32> to vector<16x32xf32>
    %226 = arith.mulf %224, %225 : vector<16x32xf32>
    %227 = vector.broadcast %206 : vector<1x32xf32> to vector<16x32xf32>
    %228 = arith.addf %226, %227 : vector<16x32xf32>
    %c0_95 = arith.constant 0 : index
    %c0_96 = arith.constant 0 : index
    %c0_97 = arith.constant 0 : index
    %c0_98 = arith.constant 0 : index
    %229 = vector.load %arg34[%c0_95, %c0_96, %c0_97, %c0_98] : memref<1x2x16x8xf32, #tpu.memory_space<vmem>>, vector<1x1x16x8xf32>
    %230 = vector.shape_cast %229 : vector<1x1x16x8xf32> to vector<16x8xf32>
    %231 = vector.shape_cast %169 : vector<16x8xf32> to vector<1x1x16x8xf32>
    tpu.vector_store %arg34[%c0_95, %c0_96, %c0_97, %c0_98], %231 {strides = array<i32>} : memref<1x2x16x8xf32, #tpu.memory_space<vmem>>, vector<1x1x16x8xf32>,
    %c0_99 = arith.constant 0 : index
    %c1 = arith.constant 1 : index
    %c0_100 = arith.constant 0 : index
    %c0_101 = arith.constant 0 : index
    %232 = vector.load %arg34[%c0_99, %c1, %c0_100, %c0_101] : memref<1x2x16x8xf32, #tpu.memory_space<vmem>>, vector<1x1x16x8xf32>
    %233 = vector.shape_cast %232 : vector<1x1x16x8xf32> to vector<16x8xf32>
    %234 = vector.shape_cast %195 : vector<16x8xf32> to vector<1x1x16x8xf32>
    tpu.vector_store %arg34[%c0_99, %c1, %c0_100, %c0_101], %234 {strides = array<i32>} : memref<1x2x16x8xf32, #tpu.memory_space<vmem>>, vector<1x1x16x8xf32>,
    %c0_102 = arith.constant 0 : index
    %c0_103 = arith.constant 0 : index
    %235 = vector.load %arg25[%c0_102, %c0_103] : memref<32x64xbf16, #tpu.memory_space<vmem>>, vector<32x64xbf16>
    %c0_104 = arith.constant 0 : index
    %c0_105 = arith.constant 0 : index
    %236 = vector.load %arg26[%c0_104, %c0_105] : memref<1x64xf32, #tpu.memory_space<vmem>>, vector<1x64xf32>
    %237 = arith.truncf %228 : vector<16x32xf32> to vector<16x32xbf16>
    %cst_106 = arith.constant dense<0.000000e+00> : vector<16x64xf32>
    %238 = tpu.matmul %237, %235, %cst_106 {dimension_numbers = #tpu.dot_dimension_numbers<[1], [0], [0], [1], [0, 0, 1, 1], [], []>} : vector<16x32xbf16>, vector<32x64xbf16>, vector<16x64xf32> -> vector<16x64xf32>
    %239 = vector.broadcast %236 : vector<1x64xf32> to vector<16x64xf32>
    %240 = arith.addf %238, %239 : vector<16x64xf32>
    %cst_107 = arith.constant 0.000000e+00 : f32
    %241 = vector.broadcast %cst_107 : f32 to vector<16x64xf32>
    %242 = arith.maximumf %240, %241 : vector<16x64xf32>
    %c0_108 = arith.constant 0 : index
    %c0_109 = arith.constant 0 : index
    %243 = vector.load %arg27[%c0_108, %c0_109] : memref<64x32xbf16, #tpu.memory_space<vmem>>, vector<64x32xbf16>
    %c0_110 = arith.constant 0 : index
    %c0_111 = arith.constant 0 : index
    %244 = vector.load %arg28[%c0_110, %c0_111] : memref<1x32xf32, #tpu.memory_space<vmem>>, vector<1x32xf32>
    %245 = arith.truncf %242 : vector<16x64xf32> to vector<16x64xbf16>
    %cst_112 = arith.constant dense<0.000000e+00> : vector<16x32xf32>
    %246 = tpu.matmul %245, %243, %cst_112 {dimension_numbers = #tpu.dot_dimension_numbers<[1], [0], [0], [1], [0, 0, 1, 1], [], []>} : vector<16x64xbf16>, vector<64x32xbf16>, vector<16x32xf32> -> vector<16x32xf32>
    %247 = vector.broadcast %244 : vector<1x32xf32> to vector<16x32xf32>
    %248 = arith.addf %246, %247 : vector<16x32xf32>
    %249 = arith.addf %228, %248 : vector<16x32xf32>
    %c0_113 = arith.constant 0 : index
    %c0_114 = arith.constant 0 : index
    %250 = vector.load %arg29[%c0_113, %c0_114] : memref<1x32xf32, #tpu.memory_space<vmem>>, vector<1x32xf32>
    %c0_115 = arith.constant 0 : index
    %c0_116 = arith.constant 0 : index
    %251 = vector.load %arg30[%c0_115, %c0_116] : memref<1x32xf32, #tpu.memory_space<vmem>>, vector<1x32xf32>
    %cst_117 = arith.constant dense<0.000000e+00> : vector<16xf32>
    %252 = vector.multi_reduction <add>, %249, %cst_117 [1] : vector<16x32xf32> to vector<16xf32>
    %253 = vector.shape_cast %252 : vector<16xf32> to vector<16x1xf32>
    %cst_118 = arith.constant 3.200000e+01 : f32
    %254 = vector.broadcast %cst_118 : f32 to vector<16x1xf32>
    %255 = arith.divf %253, %254 : vector<16x1xf32>
    %256 = vector.broadcast %255 : vector<16x1xf32> to vector<16x32xf32>
    %257 = arith.subf %249, %256 : vector<16x32xf32>
    %258 = arith.mulf %257, %257 : vector<16x32xf32>
    %cst_119 = arith.constant dense<0.000000e+00> : vector<16xf32>
    %259 = vector.multi_reduction <add>, %258, %cst_119 [1] : vector<16x32xf32> to vector<16xf32>
    %260 = vector.shape_cast %259 : vector<16xf32> to vector<16x1xf32>
    %cst_120 = arith.constant 3.200000e+01 : f32
    %261 = vector.broadcast %cst_120 : f32 to vector<16x1xf32>
    %262 = arith.divf %260, %261 : vector<16x1xf32>
    %263 = vector.broadcast %255 : vector<16x1xf32> to vector<16x32xf32>
    %264 = arith.subf %249, %263 : vector<16x32xf32>
    %cst_121 = arith.constant 9.99999974E-6 : f32
    %265 = vector.broadcast %cst_121 : f32 to vector<16x1xf32>
    %266 = arith.addf %262, %265 : vector<16x1xf32>
    %267 = math.rsqrt %266 : vector<16x1xf32>
    %268 = vector.broadcast %267 : vector<16x1xf32> to vector<16x32xf32>
    %269 = arith.mulf %264, %268 : vector<16x32xf32>
    %270 = vector.broadcast %250 : vector<1x32xf32> to vector<16x32xf32>
    %271 = arith.mulf %269, %270 : vector<16x32xf32>
    %272 = vector.broadcast %251 : vector<1x32xf32> to vector<16x32xf32>
    %273 = arith.addf %271, %272 : vector<16x32xf32>
    %c0_122 = arith.constant 0 : index
    %c0_123 = arith.constant 0 : index
    %274 = vector.load %arg31[%c0_122, %c0_123] : memref<32x9xbf16, #tpu.memory_space<vmem>>, vector<32x9xbf16>
    %c0_124 = arith.constant 0 : index
    %c0_125 = arith.constant 0 : index
    %275 = vector.load %arg32[%c0_124, %c0_125] : memref<1x9xf32, #tpu.memory_space<vmem>>, vector<1x9xf32>
    %276 = arith.truncf %273 : vector<16x32xf32> to vector<16x32xbf16>
    %cst_126 = arith.constant dense<0.000000e+00> : vector<16x9xf32>
    %277 = tpu.matmul %276, %274, %cst_126 {dimension_numbers = #tpu.dot_dimension_numbers<[1], [0], [0], [1], [0, 0, 1, 1], [], []>} : vector<16x32xbf16>, vector<32x9xbf16>, vector<16x9xf32> -> vector<16x9xf32>
    %278 = vector.broadcast %275 : vector<1x9xf32> to vector<16x9xf32>
    %279 = arith.addf %277, %278 : vector<16x9xf32>
    %280 = tpu.iota {dimensions = array<i32: 0>} : vector<16x1xi32>
    %281 = vector.broadcast %3 : i32 to vector<16x1xi32>
    %282 = arith.cmpi slt, %280, %281 : vector<16x1xi32>
    %cst_127 = arith.constant 0.000000e+00 : f32
    %283 = vector.shape_cast %282 : vector<16x1xi1> to vector<16x1xi1>
    %284 = vector.broadcast %283 : vector<16x1xi1> to vector<16x9xi1>
    %285 = vector.broadcast %cst_127 : f32 to vector<16x9xf32>
    %286 = arith.select %284, %279, %285 : vector<16x9xi1>, vector<16x9xf32>
    %c0_128 = arith.constant 0 : index
    %c0_129 = arith.constant 0 : index
    %c0_130 = arith.constant 0 : index
    %287 = vector.load %arg33[%c0_128, %c0_129, %c0_130] : memref<1x16x9xf32, #tpu.memory_space<vmem>>, vector<1x16x9xf32>
    %288 = vector.shape_cast %287 : vector<1x16x9xf32> to vector<16x9xf32>
    %289 = vector.shape_cast %286 : vector<16x9xf32> to vector<1x16x9xf32>
    tpu.vector_store %arg33[%c0_128, %c0_129, %c0_130], %289 {strides = array<i32>} : memref<1x16x9xf32, #tpu.memory_space<vmem>>, vector<1x16x9xf32>,
    return
  }
  func.func @transform_0(%arg0: i32, %arg1: memref<2xi32, #tpu.memory_space<smem>>, %arg2: memref<2xi32, #tpu.memory_space<smem>>) -> (i32, i32, i32) {
    %c0_i32 = arith.constant 0 : i32
    %c0_i32_0 = arith.constant 0 : i32
    %c0_i32_1 = arith.constant 0 : i32
    return %arg0, %c0_i32, %c0_i32_0 : i32, i32, i32
  }
  func.func @transform_1(%arg0: i32, %arg1: memref<2xi32, #tpu.memory_space<smem>>, %arg2: memref<2xi32, #tpu.memory_space<smem>>) -> (i32, i32, i32) {
    %c0_i32 = arith.constant 0 : i32
    %c0_i32_0 = arith.constant 0 : i32
    %c0_i32_1 = arith.constant 0 : i32
    return %arg0, %c0_i32, %c0_i32_0 : i32, i32, i32
  }
  func.func @transform_2(%arg0: i32, %arg1: memref<2xi32, #tpu.memory_space<smem>>, %arg2: memref<2xi32, #tpu.memory_space<smem>>) -> (i32, i32) {
    %c0_i32 = arith.constant 0 : i32
    %c0_i32_0 = arith.constant 0 : i32
    %c0_i32_1 = arith.constant 0 : i32
    return %c0_i32, %c0_i32_0 : i32, i32
  }
  func.func @transform_3(%arg0: i32, %arg1: memref<2xi32, #tpu.memory_space<smem>>, %arg2: memref<2xi32, #tpu.memory_space<smem>>) -> (i32, i32) {
    %c0_i32 = arith.constant 0 : i32
    %c0_i32_0 = arith.constant 0 : i32
    %c0_i32_1 = arith.constant 0 : i32
    return %c0_i32, %c0_i32_0 : i32, i32
  }
  func.func @transform_4(%arg0: i32, %arg1: memref<2xi32, #tpu.memory_space<smem>>, %arg2: memref<2xi32, #tpu.memory_space<smem>>) -> (i32, i32) {
    %c0_i32 = arith.constant 0 : i32
    %c0_i32_0 = arith.constant 0 : i32
    %c0_i32_1 = arith.constant 0 : i32
    return %c0_i32, %c0_i32_0 : i32, i32
  }
  func.func @transform_5(%arg0: i32, %arg1: memref<2xi32, #tpu.memory_space<smem>>, %arg2: memref<2xi32, #tpu.memory_space<smem>>) -> (i32, i32) {
    %c0_i32 = arith.constant 0 : i32
    %c0_i32_0 = arith.constant 0 : i32
    %c0_i32_1 = arith.constant 0 : i32
    return %c0_i32, %c0_i32_0 : i32, i32
  }
  func.func @transform_6(%arg0: i32, %arg1: memref<2xi32, #tpu.memory_space<smem>>, %arg2: memref<2xi32, #tpu.memory_space<smem>>) -> (i32, i32) {
    %c0_i32 = arith.constant 0 : i32
    %c0_i32_0 = arith.constant 0 : i32
    %c0_i32_1 = arith.constant 0 : i32
    return %c0_i32, %c0_i32_0 : i32, i32
  }
  func.func @transform_7(%arg0: i32, %arg1: memref<2xi32, #tpu.memory_space<smem>>, %arg2: memref<2xi32, #tpu.memory_space<smem>>) -> (i32, i32) {
    %c0_i32 = arith.constant 0 : i32
    %c0_i32_0 = arith.constant 0 : i32
    %c0_i32_1 = arith.constant 0 : i32
    return %c0_i32, %c0_i32_0 : i32, i32
  }
  func.func @transform_8(%arg0: i32, %arg1: memref<2xi32, #tpu.memory_space<smem>>, %arg2: memref<2xi32, #tpu.memory_space<smem>>) -> (i32, i32) {
    %c0_i32 = arith.constant 0 : i32
    %c0_i32_0 = arith.constant 0 : i32
    %c0_i32_1 = arith.constant 0 : i32
    return %c0_i32, %c0_i32_0 : i32, i32
  }
  func.func @transform_9(%arg0: i32, %arg1: memref<2xi32, #tpu.memory_space<smem>>, %arg2: memref<2xi32, #tpu.memory_space<smem>>) -> (i32, i32) {
    %c0_i32 = arith.constant 0 : i32
    %c0_i32_0 = arith.constant 0 : i32
    %c0_i32_1 = arith.constant 0 : i32
    return %c0_i32, %c0_i32_0 : i32, i32
  }
  func.func @transform_10(%arg0: i32, %arg1: memref<2xi32, #tpu.memory_space<smem>>, %arg2: memref<2xi32, #tpu.memory_space<smem>>) -> (i32, i32) {
    %c0_i32 = arith.constant 0 : i32
    %c0_i32_0 = arith.constant 0 : i32
    %c0_i32_1 = arith.constant 0 : i32
    return %c0_i32, %c0_i32_0 : i32, i32
  }
  func.func @transform_11(%arg0: i32, %arg1: memref<2xi32, #tpu.memory_space<smem>>, %arg2: memref<2xi32, #tpu.memory_space<smem>>) -> (i32, i32) {
    %c0_i32 = arith.constant 0 : i32
    %c0_i32_0 = arith.constant 0 : i32
    %c0_i32_1 = arith.constant 0 : i32
    return %c0_i32, %c0_i32_0 : i32, i32
  }
  func.func @transform_12(%arg0: i32, %arg1: memref<2xi32, #tpu.memory_space<smem>>, %arg2: memref<2xi32, #tpu.memory_space<smem>>) -> (i32, i32) {
    %c0_i32 = arith.constant 0 : i32
    %c0_i32_0 = arith.constant 0 : i32
    %c0_i32_1 = arith.constant 0 : i32
    return %c0_i32, %c0_i32_0 : i32, i32
  }
  func.func @transform_13(%arg0: i32, %arg1: memref<2xi32, #tpu.memory_space<smem>>, %arg2: memref<2xi32, #tpu.memory_space<smem>>) -> (i32, i32) {
    %c0_i32 = arith.constant 0 : i32
    %c0_i32_0 = arith.constant 0 : i32
    %c0_i32_1 = arith.constant 0 : i32
    return %c0_i32, %c0_i32_0 : i32, i32
  }
  func.func @transform_14(%arg0: i32, %arg1: memref<2xi32, #tpu.memory_space<smem>>, %arg2: memref<2xi32, #tpu.memory_space<smem>>) -> (i32, i32) {
    %c0_i32 = arith.constant 0 : i32
    %c0_i32_0 = arith.constant 0 : i32
    %c0_i32_1 = arith.constant 0 : i32
    return %c0_i32, %c0_i32_0 : i32, i32
  }
  func.func @transform_15(%arg0: i32, %arg1: memref<2xi32, #tpu.memory_space<smem>>, %arg2: memref<2xi32, #tpu.memory_space<smem>>) -> (i32, i32) {
    %c0_i32 = arith.constant 0 : i32
    %c0_i32_0 = arith.constant 0 : i32
    %c0_i32_1 = arith.constant 0 : i32
    return %c0_i32, %c0_i32_0 : i32, i32
  }
  func.func @transform_16(%arg0: i32, %arg1: memref<2xi32, #tpu.memory_space<smem>>, %arg2: memref<2xi32, #tpu.memory_space<smem>>) -> (i32, i32) {
    %c0_i32 = arith.constant 0 : i32
    %c0_i32_0 = arith.constant 0 : i32
    %c0_i32_1 = arith.constant 0 : i32
    return %c0_i32, %c0_i32_0 : i32, i32
  }
  func.func @transform_17(%arg0: i32, %arg1: memref<2xi32, #tpu.memory_space<smem>>, %arg2: memref<2xi32, #tpu.memory_space<smem>>) -> (i32, i32) {
    %c0_i32 = arith.constant 0 : i32
    %c0_i32_0 = arith.constant 0 : i32
    %c0_i32_1 = arith.constant 0 : i32
    return %c0_i32, %c0_i32_0 : i32, i32
  }
  func.func @transform_18(%arg0: i32, %arg1: memref<2xi32, #tpu.memory_space<smem>>, %arg2: memref<2xi32, #tpu.memory_space<smem>>) -> (i32, i32) {
    %c0_i32 = arith.constant 0 : i32
    %c0_i32_0 = arith.constant 0 : i32
    %c0_i32_1 = arith.constant 0 : i32
    return %c0_i32, %c0_i32_0 : i32, i32
  }
  func.func @transform_19(%arg0: i32, %arg1: memref<2xi32, #tpu.memory_space<smem>>, %arg2: memref<2xi32, #tpu.memory_space<smem>>) -> (i32, i32) {
    %c0_i32 = arith.constant 0 : i32
    %c0_i32_0 = arith.constant 0 : i32
    %c0_i32_1 = arith.constant 0 : i32
    return %c0_i32, %c0_i32_0 : i32, i32
  }
  func.func @transform_20(%arg0: i32, %arg1: memref<2xi32, #tpu.memory_space<smem>>, %arg2: memref<2xi32, #tpu.memory_space<smem>>) -> (i32, i32) {
    %c0_i32 = arith.constant 0 : i32
    %c0_i32_0 = arith.constant 0 : i32
    %c0_i32_1 = arith.constant 0 : i32
    return %c0_i32, %c0_i32_0 : i32, i32
  }
  func.func @transform_21(%arg0: i32, %arg1: memref<2xi32, #tpu.memory_space<smem>>, %arg2: memref<2xi32, #tpu.memory_space<smem>>) -> (i32, i32) {
    %c0_i32 = arith.constant 0 : i32
    %c0_i32_0 = arith.constant 0 : i32
    %c0_i32_1 = arith.constant 0 : i32
    return %c0_i32, %c0_i32_0 : i32, i32
  }
  func.func @transform_22(%arg0: i32, %arg1: memref<2xi32, #tpu.memory_space<smem>>, %arg2: memref<2xi32, #tpu.memory_space<smem>>) -> (i32, i32) {
    %c0_i32 = arith.constant 0 : i32
    %c0_i32_0 = arith.constant 0 : i32
    %c0_i32_1 = arith.constant 0 : i32
    return %c0_i32, %c0_i32_0 : i32, i32
  }
  func.func @transform_23(%arg0: i32, %arg1: memref<2xi32, #tpu.memory_space<smem>>, %arg2: memref<2xi32, #tpu.memory_space<smem>>) -> (i32, i32) {
    %c0_i32 = arith.constant 0 : i32
    %c0_i32_0 = arith.constant 0 : i32
    %c0_i32_1 = arith.constant 0 : i32
    return %c0_i32, %c0_i32_0 : i32, i32
  }
  func.func @transform_24(%arg0: i32, %arg1: memref<2xi32, #tpu.memory_space<smem>>, %arg2: memref<2xi32, #tpu.memory_space<smem>>) -> (i32, i32) {
    %c0_i32 = arith.constant 0 : i32
    %c0_i32_0 = arith.constant 0 : i32
    %c0_i32_1 = arith.constant 0 : i32
    return %c0_i32, %c0_i32_0 : i32, i32
  }
  func.func @transform_25(%arg0: i32, %arg1: memref<2xi32, #tpu.memory_space<smem>>, %arg2: memref<2xi32, #tpu.memory_space<smem>>) -> (i32, i32) {
    %c0_i32 = arith.constant 0 : i32
    %c0_i32_0 = arith.constant 0 : i32
    %c0_i32_1 = arith.constant 0 : i32
    return %c0_i32, %c0_i32_0 : i32, i32
  }
  func.func @transform_26(%arg0: i32, %arg1: memref<2xi32, #tpu.memory_space<smem>>, %arg2: memref<2xi32, #tpu.memory_space<smem>>) -> (i32, i32) {
    %c0_i32 = arith.constant 0 : i32
    %c0_i32_0 = arith.constant 0 : i32
    %c0_i32_1 = arith.constant 0 : i32
    return %c0_i32, %c0_i32_0 : i32, i32
  }
  func.func @transform_27(%arg0: i32, %arg1: memref<2xi32, #tpu.memory_space<smem>>, %arg2: memref<2xi32, #tpu.memory_space<smem>>) -> (i32, i32) {
    %c0_i32 = arith.constant 0 : i32
    %c0_i32_0 = arith.constant 0 : i32
    %c0_i32_1 = arith.constant 0 : i32
    return %c0_i32, %c0_i32_0 : i32, i32
  }
  func.func @transform_28(%arg0: i32, %arg1: memref<2xi32, #tpu.memory_space<smem>>, %arg2: memref<2xi32, #tpu.memory_space<smem>>) -> (i32, i32) {
    %c0_i32 = arith.constant 0 : i32
    %c0_i32_0 = arith.constant 0 : i32
    %c0_i32_1 = arith.constant 0 : i32
    return %c0_i32, %c0_i32_0 : i32, i32
  }
  func.func @transform_29(%arg0: i32, %arg1: memref<2xi32, #tpu.memory_space<smem>>, %arg2: memref<2xi32, #tpu.memory_space<smem>>) -> (i32, i32) {
    %c0_i32 = arith.constant 0 : i32
    %c0_i32_0 = arith.constant 0 : i32
    %c0_i32_1 = arith.constant 0 : i32
    return %c0_i32, %c0_i32_0 : i32, i32
  }
  func.func @transform_30(%arg0: i32, %arg1: memref<2xi32, #tpu.memory_space<smem>>, %arg2: memref<2xi32, #tpu.memory_space<smem>>) -> (i32, i32, i32) {
    %c0_i32 = arith.constant 0 : i32
    %c0_i32_0 = arith.constant 0 : i32
    %c0_i32_1 = arith.constant 0 : i32
    return %arg0, %c0_i32, %c0_i32_0 : i32, i32, i32
  }
  func.func @transform_31(%arg0: i32, %arg1: memref<2xi32, #tpu.memory_space<smem>>, %arg2: memref<2xi32, #tpu.memory_space<smem>>) -> (i32, i32, i32, i32) {
    %c0_i32 = arith.constant 0 : i32
    %c0_i32_0 = arith.constant 0 : i32
    %c0_i32_1 = arith.constant 0 : i32
    %c0_i32_2 = arith.constant 0 : i32
    return %arg0, %c0_i32, %c0_i32_0, %c0_i32_1 : i32, i32, i32, i32
  }
}

</mosaic_0001>

<bundles_post_ra>
// kernel: _lambda_.3
= control target key start
LH: loop header
LB: loop body
LE: loop exit
PB: predicated region body
PF: predicated region fallthrough
CT: control target
= control target key end

     0   :  { %s1535_s0 = inlined_call_operand.vmem [shape: s32[2], index: 0, kind: input, shape index: {}]   ;;  %s1536_s1 = inlined_call_operand.vmem [shape: f32[2,8,32], index: 1, kind: input, shape index: {}]   ;;  %s1537_s2 = inlined_call_operand.vmem [shape: bf16[32,96], index: 2, kind: input, shape index: {}]   ;;  %s1538_s3 = inlined_call_operand.vmem [shape: f32[1,96], index: 3, kind: input, shape index: {}]   ;;  %s1539_s4 = inlined_call_operand.vmem [shape: bf16[32,32], index: 4, kind: input, shape index: {}]   ;;  %s1540_s5 = inlined_call_operand.vmem [shape: f32[1,32], index: 5, kind: input, shape index: {}]   ;;  %s1541_s6 = inlined_call_operand.vmem [shape: f32[1,32], index: 6, kind: input, shape index: {}]   ;;  %s1542_s7 = inlined_call_operand.vmem [shape: f32[1,32], index: 7, kind: input, shape index: {}]   ;;  %s1543_s8 = inlined_call_operand.vmem [shape: bf16[32,64], index: 8, kind: input, shape index: {}]   ;;  %s1544_s9 = inlined_call_operand.vmem [shape: f32[1,64], index: 9, kind: input, shape index: {}]   ;;  %s1545_s10 = inlined_call_operand.vmem [shape: bf16[64,32], index: 10, kind: input, shape index: {}]   ;;  %s1546_s11 = inlined_call_operand.vmem [shape: f32[1,32], index: 11, kind: input, shape index: {}]   ;;  %s1547_s12 = inlined_call_operand.vmem [shape: f32[1,32], index: 12, kind: input, shape index: {}]   ;;  %s1548_s13 = inlined_call_operand.vmem [shape: f32[1,32], index: 13, kind: input, shape index: {}]   ;;  %s1549_s14 = inlined_call_operand.vmem [shape: f32[2,8,32], index: 14, kind: output, shape index: {}]  }
   0x1   :  { %s19_s15 = sshll.u32 %s1535_s0, 4  ;;  %s20_s15 = int_to_ptr.vmem [resolvable:$true] %s19_s15 }
   0x2   :  { %s1287_s16 = scalar_lea.vmem %s20_s15, 16  ;;  %p1292_p1 = scmp.lt.s32.totalorder %s20_s15, %s20_s15 }
   0x3   :  { %p1288_p0 = scmp.ne.s32.totalorder %s20_s15, %s1287_s16  ;;  %p1293_p2 = scmp.lt.s32.totalorder %s1287_s16, %s1287_s16 }
   0x5   :  { %p1294_p3 = por %p1293_p2, %p1292_p1 }
   0x7   :  { %p1295_p4 = pnand %p1294_p3, %p1288_p0 }
   0x9   :  { %1298 = shalt.err (!%p1295_p4)  }
   0xa   :  { %s1309_s17 = smov [#allocation3]  }
   0xb   :  { %22 = dma.vmem_to_smem %s20_s15, 16, %s1309_s17, [#allocation2] }
   0xc   :  { %1303 = dma.done.wait [#allocation2], 16 }
   0xd   :  { %1304 = vsyncadd [#allocation2], 4294967280 }
   0xe   :  { %24 = sfence }
   0xf   :  { %s1396_s18 = smov 0  }
  0x10 LB: > { %s1402_s0 = sadd.s32 4294967295, %s1307_s18   ;;  %p1129_p5 = scmp.ge.s32.totalorder %s1307_s18, 1  ;;  %s1307_s18 = sphi %s1396_s18, %s30_s18  }
  0x11   : > { %p393_p6 = scmp.lt.s32.totalorder %s1307_s18, 3 }
  0x13   : > { %p394_p7 = pnand %p1129_p5, %p393_p6 }
  0x14   : > { %v1265_v0 = vld [vmem:[%s1537_s2] sm:$0xff] (!%p394_p7)   ;;  %v1310_v1 = vmov (!%p394_p7), 0.0   ;;  %v1266_v2 = vld [vmem:[%s1537_s2 + $0x8] sm:$0xff] (!%p394_p7)   ;;  %vm1311_vm0 = vmmov (!%p394_p7), 0   ;;  %p435_p8 = scmp.lt.s32.totalorder (!%p394_p7), %s1402_s0, 1  ;;  %vm475_vm1 = vcmask (!%p394_p7), 261120   ;;  %v446_v17 = vlaneseq (!%p394_p7) }
  0x15   : > { %397 = sbr.rel (%p394_p7) target bundleno = 2409 (0x969), region = 72  ;;  %1184 = vmatprep.subr.bf16.mxu1 (!%p394_p7), %v1310_v1  ;;  %1198 = vmatprep.subr.bf16.mxu0 (!%p394_p7), %v1310_v1  ;;  %v1132_v5 = vld [vmem:[%s1538_s3] ss:$0 sm:$0xff] (!%p394_p7)  ;;  %s1312_s30 = smov (!%p394_p7), 112   ;;  %vm524_vm2 = vcmask (!%p394_p7), 130048   ;;  %vm573_vm4 = vcmask (!%p394_p7), 64512  }
  0x16   : > { %1185 = vmatpush3.bf16.msra.mxu1 (!%p394_p7), %v1265_v0  ;;  %1188 = vmatprep.mubr.msk.bf16.mxu1 (!%p394_p7), %vm1311_vm0, %v1310_v1  ;;  %s1313_s15 = smov (!%p394_p7), 96   ;;  %s1314_s16 = smov (!%p394_p7), 80   ;;  %v447_v18 = vand.u32 (!%p394_p7), 127, %v446_v17  ;;  %v1315_v21 = vmov (!%p394_p7), -1e+09   ;;  %vm591_vm5 = vcmask (!%p394_p7), 1043456  }
  0x17   : > { %1186 = vmatprep.subr.bf16.mxu1 (!%p394_p7), %v1310_v1  ;;  %1200 = vmatprep.mubr.msk.bf16.mxu0 (!%p394_p7), %vm1311_vm0, %v1310_v1  ;;  %s445_s17 = sld [smem:[#allocation3 + %s1402_s0]] (!%p394_p7)  ;;  %s1317_s19 = smov (!%p394_p7), 48   ;;  %v1267_v58 = vld [vmem:[%s1539_s4] sm:$0xff] (!%p394_p7)   ;;  %v1268_v59 = vld [vmem:[%s1539_s4 + $0x8] sm:$0xff] (!%p394_p7)   ;;  %vm997_vm6 = vcmask (!%p394_p7), 523264  }
  0x1a   : > { %1187 = vmatpush3.bf16.msra.mxu1 (!%p394_p7), %v1266_v2 }
  0x1b   : > { %1192 = vmatprep.subr.bf16.mxu1 (!%p394_p7), %v1310_v1 }
  0x1c   : > { %s1421_s23 = scalar_select %p435_p8, %s1402_s0, 1 }
  0x1d   : > { %v448_v19 = vstv %s445_s17  ;;  %s1316_s0 = smov 64  }
  0x1e   : > { %s1130_s24 = sshll.u32 %s1421_s23, 3  ;;  %vm449_vm3 = vcmp.lt.s32.totalorder %v447_v18, %v448_v19 }
  0x1f   : > { %s438_s27 = scalar_lea.vmem %s1536_s1, %s1130_s24  ;;  %v450_v22 = vsel %vm449_vm3, 0.0, %v1315_v21  ;;  %s442_s26 = scalar_lea.vmem %s1549_s14, %s1130_s24 }
  0x20   : > { %v1430_v3 = vld [vmem:[%s438_s27] sm:$0xff] }
  0x21   : > { %v456_v4 = vpack.c.bf16 %v1430_v3, %v1430_v3 }
  0x23   : > { %1189 = vmatmul.mubr.msk.bf16.vlgmr.msra.gmra.mrb[0].mxu1 %vm475_vm1, %v456_v4 }
  0x24   : > { %1194 = vmatprep.mubr.msk.bf16.mxu1 %vm1311_vm0, %v1310_v1 }
  0xf6   : > { %v513_v6 = vpop.f32.mrb[0].mxu1 }
  0xf7   : > { %v514_v7 = vadd.f32 %v1132_v5, %v513_v6  ;;  %v1190_v8 = vpop.f32.mrb[1].mxu1 }
  0xf8   : > { %v516_v9 = vpop.f32.mrb[2].mxu1 }
  0xf9   : > { %v520_v10 = vpack.c.bf16 %v514_v7, %v514_v7  ;;  %v1191_v11 = vpop.f32.mrb[3].mxu1 }
  0xfb   : > { %638 = vrot.lane.b32.xlu1 %v520_v10, %s1312_s30  ;;  %522 = vrot.lane.b32.xlu0 %v520_v10, %s1313_s15 }
  0xff   : > { %640 = vrot.lane.b32.xlu0 %v520_v10, %s1314_s16 }
 0x16d   : > { %v523_v12 = vpop.permute.xlu0 %522  ;;  %v639_v16 = vpop.permute.xlu1 %638 }
 0x16e   : > { %v529_v13 = vsel %vm524_vm2, %v523_v12, 0  ;;  %v1144_v12 = vld [vmem:[%s1540_s5] ss:$0 sm:$0xff] }
 0x16f   : > { %1193 = vmatpush3.bf16.xpose.msra.mxu1 %v529_v13 }
 0x170   : > { %1204 = vmatprep.subr.bf16.mxu1 %v1310_v1 }
 0x171   : > { %v641_v14 = vpop.permute.xlu0 %640 }
 0x172   : > { %v646_v15 = vsel %vm524_vm2, %v641_v14, 0 }
 0x176   : > { %1195 = vmatmul.mubr.msk.bf16.vlgmr.msra.gmra.mrb[4].mxu1 %vm524_vm2, %v520_v10 }
 0x177   : > { %1205 = vmatpush3.bf16.xpose.msra.mxu1 %v646_v15  ;;  %1206 = vmatprep.mubr.msk.bf16.mxu1 %vm1311_vm0, %v1310_v1 }
 0x178   : > { %1216 = vmatprep.subr.bf16.mxu1 %v1310_v1 }
 0x17e   : > { %1207 = vmatmul.mubr.msk.bf16.vlgmr.msra.gmra.mrb[8].mxu1 %vm524_vm2, %v639_v16 }
 0x17f   : > { %1218 = vmatprep.mubr.msk.bf16.mxu1 %vm1311_vm0, %v1310_v1  ;;  %1217 = vmatpush3.bf16.msra.mxu1 %v1268_v59 }
 0x180   : > { %1228 = vmatprep.subr.bf16.mxu1 %v1310_v1 }
 0x249   : > { %v565_v20 = vpop.f32.mrb[4].mxu1 }
 0x24a   : > { %v571_v23 = vmul.f32 0.25, %v565_v20  ;;  %v1196_v24 = vpop.f32.mrb[5].mxu1 }
 0x24b   : > { %v568_v25 = vpop.f32.mrb[6].mxu1 }
 0x24c   : > { %v1197_v26 = vpop.f32.mrb[7].mxu1  ;;  %v572_v27 = vadd.f32 %v571_v23, %v450_v22 }
 0x24d   : > { %v1269_v26 = vld [vmem:[%s1543_s8] sm:$0xff]  }
 0x24e   : > { %v574_v28 = vsel %vm573_vm4, %v572_v27, -inf }
 0x24f   : > { %575 = vmax.xlane.f32.xlu1 %v574_v28  ;;  %v1272_v28 = vld [vmem:[%s1545_s10 + $0x8] sm:$0xff]  }
 0x251   : > { %v682_v29 = vpop.f32.mrb[8].mxu1 }
 0x252   : > { %v688_v30 = vmul.f32 0.25, %v682_v29  ;;  %v1208_v31 = vpop.f32.mrb[9].mxu1 }
 0x253   : > { %v685_v32 = vpop.f32.mrb[10].mxu1 }
 0x254   : > { %v1209_v33 = vpop.f32.mrb[11].mxu1  ;;  %v689_v34 = vadd.f32 %v688_v30, %v450_v22 }
 0x255   : > { %v1145_v33 = vld [vmem:[%s1541_s6] ss:$0 sm:$0xff] }
 0x256   : > { %v690_v35 = vsel %vm573_vm4, %v689_v34, -inf }
 0x257   : > { %691 = vmax.xlane.f32.xlu0 %v690_v35  ;;  %v1146_v35 = vld [vmem:[%s1542_s7] ss:$0 sm:$0xff] }
 0x2dc   : > { %v576_v36 = vpop.xlane.xlu1 %575 }
 0x2dd   : > { %v577_v37 = vsub.f32 %v572_v27, %v576_v36  ;;  %v1270_v27 = vld [vmem:[%s1543_s8 + $0x8] sm:$0xff]  }
 0x2df   : > { %v578_v38 = vmul.f32 1.442695, %v577_v37 }
 0x2e1   : > { %1275 = vpow2.f32 %v578_v38 }
 0x2e4   : > { %v692_v39 = vpop.xlane.xlu0 %691 }
 0x2e5   : > { %v693_v40 = vsub.f32 %v689_v34, %v692_v39  ;;  %v1273_v39 = vld [vmem:[%s1545_s10 + $0x10] sm:$0xff]  }
 0x2e7   : > { %v694_v41 = vmul.f32 1.442695, %v693_v40  ;;  %v1274_v40 = vld [vmem:[%s1545_s10 + $0x18] sm:$0xff]  }
 0x2e9   : > { %1277 = vpow2.f32 %v694_v41  ;;  %v1147_v41 = vld [vmem:[%s1544_s9] ss:$0 sm:$0xff] }
 0x2eb   : > { %v1276_v42 = vpop.eup %1275 }
 0x2ec   : > { %v580_v43 = vsel %vm573_vm4, %v1276_v42, 0.0 }
 0x2ed   : > { %581 = vadd.xlane.f32.xlu0 %v580_v43 }
 0x2f3   : > { %v1278_v44 = vpop.eup %1277 }
 0x2f4   : > { %v696_v45 = vsel %vm573_vm4, %v1278_v44, 0.0 }
 0x2f5   : > { %697 = vadd.xlane.f32.xlu1 %v696_v45 }
 0x303   : > { %586 = vrot.lane.b32.xlu0 %v520_v10, %s1316_s0 }
 0x306   : > { %702 = vrot.lane.b32.xlu1 %v520_v10, %s1317_s19 }
 0x37a   : > { %v582_v46 = vpop.xlane.xlu0 %581 }
 0x37b   : > { %1279 = vrcp.f32 %v582_v46 }
 0x37e   : > { %v587_v47 = vpop.permute.xlu0 %586 }
 0x37f   : > { %v593_v48 = vsel %vm591_vm5, %v587_v47, 0 }
 0x380   : > { %1199 = vmatpush3.bf16.msra.mxu0 %v593_v48 }
 0x381   : > { %1210 = vmatprep.subr.bf16.mxu0 %v1310_v1 }
 0x382   : > { %v698_v49 = vpop.xlane.xlu1 %697 }
 0x383   : > { %1281 = vrcp.f32 %v698_v49 }
 0x385   : > { %v1280_v50 = vpop.eup %1279 }
 0x386   : > { %v584_v51 = vmul.f32 %v1280_v50, %v1276_v42  ;;  %v703_v52 = vpop.permute.xlu1 %702 }
 0x387   : > { %v708_v54 = vsel %vm591_vm5, %v703_v52, 0 }
 0x388   : > { %v585_v53 = vpack.c.bf16 %v584_v51, %v584_v51 }
 0x38a   : > { %1201 = vmatmul.mubr.msk.bf16.vlgmr.msra.gmra.mrb[0].mxu0 %vm573_vm4, %v585_v53 }
 0x38b   : > { %1211 = vmatpush3.bf16.msra.mxu0 %v708_v54  ;;  %1212 = vmatprep.mubr.msk.bf16.mxu0 %vm1311_vm0, %v1310_v1 }
 0x38c   : > { %1222 = vmatprep.subr.bf16.mxu0 %v1310_v1 }
 0x38d   : > { %v1282_v55 = vpop.eup %1281 }
 0x38e   : > { %v700_v56 = vmul.f32 %v1282_v55, %v1278_v44 }
 0x390   : > { %v701_v57 = vpack.c.bf16 %v700_v56, %v700_v56 }
 0x392   : > { %1213 = vmatmul.mubr.msk.bf16.vlgmr.msra.gmra.mrb[4].mxu0 %vm573_vm4, %v701_v57 }
 0x393   : > { %1224 = vmatprep.mubr.msk.bf16.mxu0 %vm1311_vm0, %v1310_v1  ;;  %1223 = vmatpush3.bf16.msra.mxu0 %v1267_v58 }
 0x394   : > { %1236 = vmatprep.subr.bf16.mxu0 %v1310_v1 }
 0x45d   : > { %v629_v60 = vpop.f32.mrb[0].mxu0 }
 0x45e   : > { %v637_v61 = vpack.c.bf16 %v629_v60, %v629_v60  ;;  %v1202_v62 = vpop.f32.mrb[1].mxu0 }
 0x45f   : > { %v632_v63 = vpop.f32.mrb[2].mxu0 }
 0x460   : > { %v1203_v0 = vpop.f32.mrb[3].mxu0  ;;  %1225 = vmatmul.mubr.msk.bf16.vlgmr.msra.gmra.mrb[8].mxu0 %vm524_vm2, %v637_v61 }
 0x461   : > { %1244 = vmatprep.mubr.msk.bf16.mxu0 %vm1311_vm0, %v1310_v1 }
 0x465   : > { %v744_v2 = vpop.f32.mrb[4].mxu0 }
 0x466   : > { %v752_v4 = vpack.c.bf16 %v744_v2, %v744_v2  ;;  %v1214_v5 = vpop.f32.mrb[5].mxu0  ;;  %v1157_v2 = vld [vmem:[%s1547_s12] ss:$0 sm:$0xff] }
 0x467   : > { %v747_v6 = vpop.f32.mrb[6].mxu0  ;;  %v1158_v5 = vld [vmem:[%s1548_s13] ss:$0 sm:$0xff] }
 0x468   : > { %v1215_v7 = vpop.f32.mrb[7].mxu0  ;;  %1219 = vmatmul.mubr.msk.bf16.vlgmr.msra.gmra.mrb[12].mxu1 %vm524_vm2, %v752_v4 }
 0x469   : > { %1232 = vmatprep.mubr.msk.bf16.mxu1 %vm1311_vm0, %v1310_v1  ;;  %1229 = vmatpush3.bf16.msra.mxu1 %v1269_v26 }
 0x46a   : > { %1230 = vmatprep.subr.bf16.mxu1 %v1310_v1 }
 0x46d   : > { %1231 = vmatpush3.bf16.msra.mxu1 %v1270_v27 }
 0x533   : > { %v845_v8 = vpop.f32.mrb[8].mxu0 }
 0x534   : > { %v1226_v9 = vpop.f32.mrb[9].mxu0 }
 0x535   : > { %v848_v10 = vpop.f32.mrb[10].mxu0 }
 0x536   : > { %v1227_v11 = vpop.f32.mrb[11].mxu0 }
 0x53b   : > { %v796_v13 = vpop.f32.mrb[12].mxu1 }
 0x53c   : > { %v846_v14 = vadd.f32 %v845_v8, %v796_v13  ;;  %v1220_v15 = vpop.f32.mrb[13].mxu1 }
 0x53d   : > { %v799_v16 = vpop.f32.mrb[14].mxu1 }
 0x53e   : > { %v857_v17 = vadd.f32 %v1144_v12, %v846_v14  ;;  %v1221_v18 = vpop.f32.mrb[15].mxu1 }
 0x540   : > { %v858_v19 = vadd.f32 %v857_v17, %v1430_v3  ;;  %v1271_v3 = vld [vmem:[%s1545_s10] sm:$0xff]  }
 0x541   : > { %1237 = vmatpush3.bf16.msra.mxu0 %v1271_v3 }
 0x542   : > { %v861_v20 = vsel %vm475_vm1, %v858_v19, 0.0  ;;  %1238 = vmatprep.subr.bf16.mxu0 %v1310_v1 }
 0x543   : > { %862 = vadd.xlane.f32.xlu1 %v861_v20 }
 0x545   : > { %1239 = vmatpush3.bf16.msra.mxu0 %v1272_v28 }
 0x546   : > { %1240 = vmatprep.subr.bf16.mxu0 %v1310_v1 }
 0x549   : > { %1241 = vmatpush3.bf16.msra.mxu0 %v1273_v39 }
 0x54a   : > { %1242 = vmatprep.subr.bf16.mxu0 %v1310_v1  ;;  %v1151_v1 = vld [vmem:[%s1546_s11] ss:$0 sm:$0xff] }
 0x54d   : > { %1243 = vmatpush3.bf16.msra.mxu0 %v1274_v40 }
 0x5d0   : > { %v863_v21 = vpop.xlane.xlu1 %862 }
 0x5d1   : > { %v865_v22 = vmul.f32 0.03125, %v863_v21 }
 0x5d3   : > { %v866_v23 = vsub.f32 %v858_v19, %v865_v22 }
 0x5d5   : > { %v867_v24 = vmul.f32 %v866_v23, %v866_v23 }
 0x5d7   : > { %v868_v25 = vsel %vm475_vm1, %v867_v24, 0.0 }
 0x5d8   : > { %869 = vadd.xlane.f32.xlu0 %v868_v25 }
 0x665   : > { %v870_v29 = vpop.xlane.xlu0 %869 }
 0x666   : > { %v871_v30 = vmul.f32 0.03125, %v870_v29 }
 0x668   : > { %v872_v31 = vadd.f32 1e-05, %v871_v30 }
 0x66a   : > { %1283 = vrsqrt.f32 %v872_v31 }
 0x674   : > { %v1284_v32 = vpop.eup %1283 }
 0x675   : > { %v874_v34 = vmul.f32 %v1284_v32, %v866_v23 }
 0x677   : > { %v881_v36 = vmul.f32 %v1145_v33, %v874_v34 }
 0x679   : > { %v888_v37 = vadd.f32 %v1146_v35, %v881_v36 }
 0x67b   : > { %v894_v38 = vpack.c.bf16 %v888_v37, %v888_v37 }
 0x67d   : > { %1233 = vmatmul.mubr.msk.bf16.vlgmr.msra.gmra.mrb[16].mxu1 %vm475_vm1, %v894_v38 }
 0x750   : > { %v950_v42 = vpop.f32.mrb[16].mxu1 }
 0x751   : > { %v951_v43 = vadd.f32 %v1147_v41, %v950_v42  ;;  %v1234_v44 = vpop.f32.mrb[17].mxu1 }
 0x752   : > { %v953_v45 = vpop.f32.mrb[18].mxu1 }
 0x753   : > { %v956_v46 = vmax.f32 %v951_v43, 0.0  ;;  %v1235_v47 = vpop.f32.mrb[19].mxu1 }
 0x755   : > { %v966_v48 = vpack.c.bf16 %v956_v46, %v956_v46 }
 0x757   : > { %1245 = vmatmul.mubr.msk.bf16.vlgmr.msra.gmra.mrb[12].mxu0 %vm997_vm6, %v966_v48 }
 0x82a   : > { %v1035_v49 = vpop.f32.mrb[12].mxu0 }
 0x82b   : > { %v1036_v50 = vadd.f32 %v1151_v1, %v1035_v49  ;;  %v1246_v51 = vpop.f32.mrb[13].mxu0 }
 0x82c   : > { %v1038_v52 = vpop.f32.mrb[14].mxu0 }
 0x82d   : > { %v1247_v53 = vpop.f32.mrb[15].mxu0  ;;  %v1041_v54 = vadd.f32 %v1036_v50, %v888_v37 }
 0x82f   : > { %v1044_v55 = vsel %vm475_vm1, %v1041_v54, 0.0 }
 0x830   : > { %1045 = vadd.xlane.f32.xlu0 %v1044_v55 }
 0x8bd   : > { %v1046_v56 = vpop.xlane.xlu0 %1045 }
 0x8be   : > { %v1047_v57 = vmul.f32 0.03125, %v1046_v56 }
 0x8c0   : > { %v1048_v58 = vsub.f32 %v1041_v54, %v1047_v57 }
 0x8c2   : > { %v1049_v59 = vmul.f32 %v1048_v58, %v1048_v58 }
 0x8c4   : > { %v1050_v60 = vsel %vm475_vm1, %v1049_v59, 0.0 }
 0x8c5   : > { %1051 = vadd.xlane.f32.xlu1 %v1050_v60 }
 0x952   : > { %v1052_v61 = vpop.xlane.xlu1 %1051 }
 0x953   : > { %v1053_v62 = vmul.f32 0.03125, %v1052_v61 }
 0x955   : > { %v1054_v63 = vadd.f32 1e-05, %v1053_v62 }
 0x957   : > { %1285 = vrsqrt.f32 %v1054_v63 }
 0x961   : > { %v1286_v0 = vpop.eup %1285 }
 0x962   : > { %v1056_v4 = vmul.f32 %v1286_v0, %v1048_v58 }
 0x964   : > { %v1063_v6 = vmul.f32 %v1157_v2, %v1056_v4 }
 0x966   : > { %v1070_v7 = vadd.f32 %v1158_v5, %v1063_v6 }
 0x968   : > { %1071 = vst.msk [vmem:[%s442_s26] sm:$0xff] %vm475_vm1, %v1070_v7 }
 0x969 PF: > { %s30_s18 = sadd.s32 1, %s1307_s18  }
 0x96a   : > { %p27_p9 = scmp.ge.s32.totalorder %s30_s18, 4  }
 0x96c   :  { %29 = sbr.rel (!%p27_p9) target bundleno = 16 (0x10), region = 102 }

// kernel: _lambda_.5
= control target key start
LH: loop header
LB: loop body
LE: loop exit
PB: predicated region body
PF: predicated region fallthrough
CT: control target
= control target key end

     0   :  { %s1353_s0 = inlined_call_operand.vmem [shape: s32[2], index: 0, kind: input, shape index: {}]   ;;  %s1354_s1 = inlined_call_operand.vmem [shape: f32[2,16,16], index: 1, kind: input, shape index: {}]   ;;  %s1355_s2 = inlined_call_operand.vmem [shape: bf16[80,16], index: 2, kind: input, shape index: {}]   ;;  %s1356_s3 = inlined_call_operand.vmem [shape: f32[1,16], index: 3, kind: input, shape index: {}]   ;;  %s1357_s4 = inlined_call_operand.vmem [shape: f32[1,16], index: 4, kind: input, shape index: {}]   ;;  %s1358_s5 = inlined_call_operand.vmem [shape: bf16[80,16], index: 5, kind: input, shape index: {}]   ;;  %s1359_s6 = inlined_call_operand.vmem [shape: f32[1,16], index: 6, kind: input, shape index: {}]   ;;  %s1360_s7 = inlined_call_operand.vmem [shape: f32[1,16], index: 7, kind: input, shape index: {}]   ;;  %s1361_s8 = inlined_call_operand.vmem [shape: bf16[80,16], index: 8, kind: input, shape index: {}]   ;;  %s1362_s9 = inlined_call_operand.vmem [shape: f32[1,16], index: 9, kind: input, shape index: {}]   ;;  %s1363_s10 = inlined_call_operand.vmem [shape: f32[1,16], index: 10, kind: input, shape index: {}]   ;;  %s1364_s11 = inlined_call_operand.vmem [shape: f32[2,16,8], index: 11, kind: output, shape index: {}]  }
   0x1   :  { %s16_s19 = sshll.u32 %s1353_s0, 4  ;;  %s17_s19 = int_to_ptr.vmem [resolvable:$true] %s16_s19 }
   0x2   :  { %s1073_s20 = scalar_lea.vmem %s17_s19, 16  ;;  %p1078_p1 = scmp.lt.s32.totalorder %s17_s19, %s17_s19 }
   0x3   :  { %p1074_p0 = scmp.ne.s32.totalorder %s17_s19, %s1073_s20  ;;  %p1079_p2 = scmp.lt.s32.totalorder %s1073_s20, %s1073_s20 }
   0x5   :  { %p1080_p3 = por %p1079_p2, %p1078_p1 }
   0x7   :  { %p1081_p4 = pnand %p1080_p3, %p1074_p0 }
   0x9   :  { %1084 = shalt.err (!%p1081_p4)  }
   0xa   :  { %s1095_s21 = smov [#allocation5]  }
   0xb   :  { %19 = dma.vmem_to_smem %s17_s19, 16, %s1095_s21, [#allocation4] }
   0xc   :  { %1089 = dma.done.wait [#allocation4], 16 }
   0xd   :  { %1090 = vsyncadd [#allocation4], 4294967280 }
   0xe   :  { %21 = sfence }
   0xf   :  { %s1165_s22 = smov 0  }
  0x10 LB: > { %s936_s0 = sadd.s32 4294967295, %s1093_s22   ;;  %p940_p5 = scmp.ge.s32.totalorder %s1093_s22, 1  ;;  %s1093_s22 = sphi %s1165_s22, %s27_s22  }
  0x11   : > { %p319_p6 = scmp.lt.s32.totalorder %s1093_s22, 3 }
  0x13   : > { %p320_p7 = pnand %p940_p5, %p319_p6 }
  0x14   : > { %p357_p8 = scmp.lt.s32.totalorder (!%p320_p7), %s936_s0, 1  ;;  %s368_s23 = sld [smem:[#allocation5 + %s936_s0]] (!%p320_p7)  ;;  %v369_v0 = vlaneseq (!%p320_p7)  ;;  %vm379_vm0 = vcmask (!%p320_p7), 130048   ;;  %vm382_vm1 = vcmask (!%p320_p7), 125952   ;;  %v1096_v1 = vmov (!%p320_p7), 0.0   ;;  %v1050_v7 = vld [vmem:[%s1355_s2] sm:$0xff] (!%p320_p7)  }
  0x15   : > { %323 = sbr.rel (%p320_p7) target bundleno = 1151 (0x47f), region = 60  ;;  %380 = vst.msk [vmem:[#allocation2] sm:$0xff] (!%p320_p7), %vm379_vm0, %v1096_v1  ;;  %381 = vst.msk [vmem:[#allocation2 + $0x8] sm:$0xff] (!%p320_p7), %vm379_vm0, %v1096_v1  ;;  %993 = vmatprep.subr.bf16.mxu0 (!%p320_p7), %v1096_v1  ;;  %1007 = vmatprep.subr.bf16.mxu1 (!%p320_p7), %v1096_v1  ;;  %v1051_v12 = vld [vmem:[%s1355_s2 + $0x8] sm:$0xff] (!%p320_p7)   ;;  %v1052_v13 = vld [vmem:[%s1355_s2 + $0x10] sm:$0xff] (!%p320_p7)   ;;  %s1097_s15 = smov (!%p320_p7), 32  }
  0x16   : > { %383 = vst.msk [vmem:[#allocation2 + $0x10] sm:$0xf] (!%p320_p7), %vm382_vm1, %v1096_v1  ;;  %v370_v2 = vshrl.u32 (!%p320_p7), %v369_v0, 7  ;;  %994 = vmatpush3.bf16.msra.mxu0 (!%p320_p7), %v1050_v7  ;;  %s1098_s16 = smov (!%p320_p7), 16   ;;  %vm1099_vm4 = vmmov (!%p320_p7), 0   ;;  %v1053_v20 = vld [vmem:[%s1355_s2 + $0x18] sm:$0xff] (!%p320_p7)  }
  0x17   : > { %995 = vmatprep.subr.bf16.mxu0 (!%p320_p7), %v1096_v1  ;;  %1003 = vmatprep.mubr.msk.bf16.mxu0 (!%p320_p7), %vm1099_vm4, %v1096_v1  ;;  %v1054_v23 = vld [vmem:[%s1355_s2 + $0x20] sm:$0xff] (!%p320_p7)   ;;  %s1100_s21 = smov (!%p320_p7), 48   ;;  %vm404_vm5 = vcmask (!%p320_p7), 261248   ;;  %vm417_vm6 = vcmask (!%p320_p7), 392448   ;;  %vm430_vm7 = vcmask (!%p320_p7), 523648   ;;  %vm443_vm8 = vcmask (!%p320_p7), 654848  }
  0x18   : > { %v371_v3 = vadd.s32 (!%p320_p7), 8, %v370_v2  ;;  %1017 = vmatprep.mubr.msk.bf16.mxu1 (!%p320_p7), %vm1099_vm4, %v1096_v1  ;;  %vm489_vm9 = vcmask (!%p320_p7), 654336   ;;  %v953_v37 = vld [vmem:[%s1356_s3] ss:$0 sm:$0xff] (!%p320_p7)  ;;  %v1056_v52 = vld [vmem:[%s1358_s5 + $0x8] sm:$0xff] (!%p320_p7)   ;;  %v1057_v55 = vld [vmem:[%s1358_s5 + $0x10] sm:$0xff] (!%p320_p7)  }
  0x19   : > { %v954_v39 = vld [vmem:[%s1357_s4] ss:$0 sm:$0xff] (!%p320_p7)  ;;  %v1058_v59 = vld [vmem:[%s1358_s5 + $0x18] sm:$0xff] (!%p320_p7)   ;;  %vm878_vm10 = vcmask (!%p320_p7), 64512  }
  0x1a   : > { %v372_v4 = vstv (!%p320_p7), %s368_s23  ;;  %996 = vmatpush3.bf16.msra.mxu0 (!%p320_p7), %v1051_v12  ;;  %s1101_s23 = smov (!%p320_p7), 64   ;;  %v1055_v50 = vld [vmem:[%s1358_s5] sm:$0xff] (!%p320_p7)  }
  0x1b   : > { %vm373_vm2 = vcmp.lt.s32.totalorder (!%p320_p7), %v370_v2, %v372_v4  ;;  %vm374_vm3 = vcmp.lt.s32.totalorder (!%p320_p7), %v371_v3, %v372_v4  ;;  %997 = vmatprep.subr.bf16.mxu0 (!%p320_p7), %v1096_v1  ;;  %1008 = vmatpush3.bf16.msra.mxu1 (!%p320_p7), %v1055_v50  ;;  %v1059_v61 = vld [vmem:[%s1358_s5 + $0x20] sm:$0xff] (!%p320_p7)  }
  0x1c   : > { %s1366_s0 = smov (!%p357_p8, %s936_s0), 1  ;;  %v1192_v8 = vsel %vm373_vm2, 1.0, %v1096_v1  ;;  %v1195_v9 = vsel %vm374_vm3, 1.0, %v1096_v1  ;;  %1009 = vmatprep.subr.bf16.mxu1 %v1096_v1 }
  0x1d   : > { %s973_s24 = sshll.u32 %s1366_s0, 4 }
  0x1e   : > { %s361_s27 = scalar_lea.vmem %s1354_s1, %s973_s24  ;;  %998 = vmatpush3.bf16.msra.mxu0 %v1052_v13  ;;  %s366_s29 = scalar_lea.vmem %s1364_s11, %s973_s24 }
  0x1f   : > { %v384_v5 = vld [vmem:[%s361_s27] sm:$0xff]  ;;  %v385_v6 = vld [vmem:[%s361_s27 + $0x8] sm:$0xff]  ;;  %999 = vmatprep.subr.bf16.mxu0 %v1096_v1  ;;  %1010 = vmatpush3.bf16.msra.mxu1 %v1056_v52 }
  0x20   : > { %v386_v10 = vmul.f32 %v1192_v8, %v384_v5  ;;  %v387_v11 = vmul.f32 %v1195_v9, %v385_v6  ;;  %1011 = vmatprep.subr.bf16.mxu1 %v1096_v1 }
  0x22   : > { %388 = vst.msk [vmem:[#allocation2 + $0x2] sm:$0xff] %vm379_vm0, %v386_v10  ;;  %389 = vst.msk [vmem:[#allocation2 + $0xa] sm:$0xff] %vm379_vm0, %v387_v11  ;;  %1000 = vmatpush3.bf16.msra.mxu0 %v1053_v20 }
  0x23   : > { %1001 = vmatprep.subr.bf16.mxu0 %v1096_v1  ;;  %1012 = vmatpush3.bf16.msra.mxu1 %v1057_v55  ;;  %v970_v55 = vld [vmem:[%s1363_s10] ss:$0 sm:$0xff] }
  0x24   : > { %1013 = vmatprep.subr.bf16.mxu1 %v1096_v1 }
  0x26   : > { %1002 = vmatpush3.bf16.msra.mxu0 %v1054_v23 }
  0x27   : > { %1021 = vmatprep.subr.bf16.mxu0 %v1096_v1  ;;  %1014 = vmatpush3.bf16.msra.mxu1 %v1058_v59 }
  0x28   : > { %1015 = vmatprep.subr.bf16.mxu1 %v1096_v1 }
  0x29   : > { %v407_v14 = vld [vmem:[#allocation2 + $0x2] sm:$0xff]  ;;  %v408_v16 = vld [vmem:[#allocation2 + $0xa] sm:$0xff] }
  0x2a   : > { %v394_v15 = vld [vmem:[#allocation2 + $0x1] sm:$0xff]  ;;  %411 = vrot.lane.b32.xlu1 %v407_v14, %s1097_s15  ;;  %v395_v17 = vld [vmem:[#allocation2 + $0x9] sm:$0xff] }
  0x2b   : > { %398 = vrot.lane.b32.xlu0 %v394_v15, %s1098_s16  ;;  %v390_v18 = vld [vmem:[#allocation2] sm:$0xff]  ;;  %v391_v19 = vld [vmem:[#allocation2 + $0x8] sm:$0xff]  ;;  %1016 = vmatpush3.bf16.msra.mxu1 %v1059_v61 }
  0x2c   : > { %392 = vst.msk [vmem:[#allocation3] sm:$0xff] %vm379_vm0, %v390_v18  ;;  %393 = vst.msk [vmem:[#allocation3 + $0x8] sm:$0xff] %vm379_vm0, %v391_v19  ;;  %v421_v21 = vld [vmem:[#allocation2 + $0xb] sm:$0xff]  ;;  %v420_v22 = vld [vmem:[#allocation2 + $0x3] sm:$0xff] }
  0x2d   : > { %v434_v24 = vld [vmem:[#allocation2 + $0xc] sm:$0xff]  ;;  %v433_v25 = vld [vmem:[#allocation2 + $0x4] sm:$0xff]  ;;  %v962_v18 = vld [vmem:[%s1360_s7] ss:$0 sm:$0xff] }
  0x2e   : > { %413 = vrot.lane.b32.xlu1 %v408_v16, %s1097_s15  ;;  %v961_v16 = vld [vmem:[%s1359_s6] ss:$0 sm:$0xff] }
  0x2f   : > { %400 = vrot.lane.b32.xlu0 %v395_v17, %s1098_s16 }
  0x32   : > { %426 = vrot.lane.b32.xlu1 %v421_v21, %s1100_s21 }
  0x33   : > { %424 = vrot.lane.b32.xlu0 %v420_v22, %s1100_s21 }
  0x36   : > { %439 = vrot.lane.b32.xlu1 %v434_v24, %s1101_s23 }
  0x37   : > { %437 = vrot.lane.b32.xlu0 %v433_v25, %s1101_s23 }
  0x9c   : > { %v412_v26 = vpop.permute.xlu1 %411 }
  0x9d   : > { %v399_v27 = vpop.permute.xlu0 %398 }
  0x9e   : > { %405 = vst.msk [vmem:[#allocation3] sm:$0xff] %vm404_vm5, %v399_v27 }
  0x9f   : > { %418 = vst.msk [vmem:[#allocation3] sm:$0xff] %vm417_vm6, %v412_v26 }
  0xa0   : > { %v414_v28 = vpop.permute.xlu1 %413 }
  0xa1   : > { %v401_v29 = vpop.permute.xlu0 %400 }
  0xa2   : > { %406 = vst.msk [vmem:[#allocation3 + $0x8] sm:$0xff] %vm404_vm5, %v401_v29  ;;  %v1060_v29 = vld [vmem:[%s1361_s8] sm:$0xff]  }
  0xa3   : > { %419 = vst.msk [vmem:[#allocation3 + $0x8] sm:$0xff] %vm417_vm6, %v414_v28 }
  0xa4   : > { %v427_v30 = vpop.permute.xlu1 %426 }
  0xa5   : > { %v425_v31 = vpop.permute.xlu0 %424  ;;  %432 = vst.msk [vmem:[#allocation3 + $0x8] sm:$0xff] %vm430_vm7, %v427_v30 }
  0xa6   : > { %431 = vst.msk [vmem:[#allocation3] sm:$0xff] %vm430_vm7, %v425_v31  ;;  %v1061_v31 = vld [vmem:[%s1361_s8 + $0x8] sm:$0xff]  }
  0xa8   : > { %v440_v32 = vpop.permute.xlu1 %439 }
  0xa9   : > { %v438_v33 = vpop.permute.xlu0 %437  ;;  %445 = vst.msk [vmem:[#allocation3 + $0x8] sm:$0xff] %vm443_vm8, %v440_v32 }
  0xaa   : > { %444 = vst.msk [vmem:[#allocation3] sm:$0xff] %vm443_vm8, %v438_v33 }
  0xb0   : > { %v447_v35 = vld [vmem:[#allocation3 + $0x8] sm:$0xff] }
  0xb1   : > { %v446_v34 = vld [vmem:[#allocation3] sm:$0xff] }
  0xb2   : > { %v458_v36 = vpack.c.bf16 %v447_v35, %v446_v34 }
  0xb4   : > { %1004 = vmatmul.mubr.msk.bf16.vlgmr.msra.gmra.mrb[0].mxu0 %vm489_vm9, %v458_v36  ;;  %v1063_v36 = vld [vmem:[%s1361_s8 + $0x18] sm:$0xff]  }
  0xb5   : > { %1031 = vmatprep.mubr.msk.bf16.mxu0 %vm1099_vm4, %v1096_v1  ;;  %1022 = vmatpush3.bf16.msra.mxu0 %v1060_v29 }
  0xb6   : > { %1023 = vmatprep.subr.bf16.mxu0 %v1096_v1 }
  0xb9   : > { %1024 = vmatpush3.bf16.msra.mxu0 %v1061_v31 }
  0xba   : > { %1025 = vmatprep.subr.bf16.mxu0 %v1096_v1 }
 0x187   : > { %v527_v38 = vpop.f32.mrb[0].mxu0 }
 0x188   : > { %v541_v40 = vmul.f32 %v953_v37, %v527_v38  ;;  %v1005_v41 = vpop.f32.mrb[1].mxu0  ;;  %v1064_v38 = vld [vmem:[%s1361_s8 + $0x20] sm:$0xff]  }
 0x189   : > { %v530_v42 = vpop.f32.mrb[2].mxu0 }
 0x18a   : > { %v550_v43 = vadd.f32 %v954_v39, %v541_v40  ;;  %v542_v44 = vmul.f32 %v953_v37, %v530_v42  ;;  %v1006_v45 = vpop.f32.mrb[3].mxu0 }
 0x18c   : > { %1065 = vtanh.f32 %v550_v43  ;;  %v551_v46 = vadd.f32 %v954_v39, %v542_v44 }
 0x18e   : > { %1067 = vtanh.f32 %v551_v46 }
 0x196   : > { %v1066_v47 = vpop.eup %1065 }
 0x197   : > { %v554_v48 = vmul.f32 %v1066_v47, %v1192_v8 }
 0x198   : > { %v1068_v49 = vpop.eup %1067 }
 0x199   : > { %556 = vst.msk [vmem:[#allocation2 + $0x2] sm:$0xff] %vm379_vm0, %v554_v48  ;;  %v555_v51 = vmul.f32 %v1068_v49, %v1195_v9 }
 0x19b   : > { %557 = vst.msk [vmem:[#allocation2 + $0xa] sm:$0xff] %vm379_vm0, %v555_v51 }
 0x1a0   : > { %v562_v53 = vld [vmem:[#allocation2 + $0x1] sm:$0xff] }
 0x1a1   : > { %v558_v54 = vld [vmem:[#allocation2] sm:$0xff]  ;;  %566 = vrot.lane.b32.xlu0 %v562_v53, %s1098_s16 }
 0x1a2   : > { %560 = vst.msk [vmem:[#allocation3] sm:$0xff] %vm379_vm0, %v558_v54  ;;  %v563_v56 = vld [vmem:[#allocation2 + $0x9] sm:$0xff]  ;;  %v969_v53 = vld [vmem:[%s1362_s9] ss:$0 sm:$0xff] }
 0x1a3   : > { %568 = vrot.lane.b32.xlu1 %v563_v56, %s1098_s16  ;;  %v574_v57 = vld [vmem:[#allocation2 + $0x2] sm:$0xff]  ;;  %v575_v60 = vld [vmem:[#allocation2 + $0xa] sm:$0xff] }
 0x1a4   : > { %v559_v58 = vld [vmem:[#allocation2 + $0x8] sm:$0xff] }
 0x1a5   : > { %578 = vrot.lane.b32.xlu0 %v574_v57, %s1097_s15  ;;  %561 = vst.msk [vmem:[#allocation3 + $0x8] sm:$0xff] %vm379_vm0, %v559_v58  ;;  %v586_v62 = vld [vmem:[#allocation2 + $0x3] sm:$0xff]  ;;  %v587_v63 = vld [vmem:[#allocation2 + $0xb] sm:$0xff] }
 0x1a6   : > { %v598_v0 = vld [vmem:[#allocation2 + $0x4] sm:$0xff]  ;;  %v599_v2 = vld [vmem:[#allocation2 + $0xc] sm:$0xff] }
 0x1a7   : > { %580 = vrot.lane.b32.xlu1 %v575_v60, %s1097_s15 }
 0x1a9   : > { %590 = vrot.lane.b32.xlu0 %v586_v62, %s1100_s21 }
 0x1ab   : > { %592 = vrot.lane.b32.xlu1 %v587_v63, %s1100_s21 }
 0x1ad   : > { %602 = vrot.lane.b32.xlu0 %v598_v0, %s1101_s23 }
 0x1af   : > { %604 = vrot.lane.b32.xlu1 %v599_v2, %s1101_s23 }
 0x213   : > { %v567_v3 = vpop.permute.xlu0 %566 }
 0x214   : > { %572 = vst.msk [vmem:[#allocation3] sm:$0xff] %vm404_vm5, %v567_v3 }
 0x215   : > { %v569_v4 = vpop.permute.xlu1 %568 }
 0x216   : > { %573 = vst.msk [vmem:[#allocation3 + $0x8] sm:$0xff] %vm404_vm5, %v569_v4 }
 0x217   : > { %v579_v5 = vpop.permute.xlu0 %578 }
 0x218   : > { %584 = vst.msk [vmem:[#allocation3] sm:$0xff] %vm417_vm6, %v579_v5 }
 0x219   : > { %v581_v6 = vpop.permute.xlu1 %580 }
 0x21a   : > { %585 = vst.msk [vmem:[#allocation3 + $0x8] sm:$0xff] %vm417_vm6, %v581_v6 }
 0x21b   : > { %v591_v7 = vpop.permute.xlu0 %590 }
 0x21c   : > { %596 = vst.msk [vmem:[#allocation3] sm:$0xff] %vm430_vm7, %v591_v7 }
 0x21d   : > { %v593_v10 = vpop.permute.xlu1 %592 }
 0x21e   : > { %597 = vst.msk [vmem:[#allocation3 + $0x8] sm:$0xff] %vm430_vm7, %v593_v10 }
 0x21f   : > { %v603_v11 = vpop.permute.xlu0 %602 }
 0x220   : > { %608 = vst.msk [vmem:[#allocation3] sm:$0xff] %vm443_vm8, %v603_v11 }
 0x221   : > { %v605_v12 = vpop.permute.xlu1 %604 }
 0x222   : > { %609 = vst.msk [vmem:[#allocation3 + $0x8] sm:$0xff] %vm443_vm8, %v605_v12 }
 0x227   : > { %v610_v13 = vld [vmem:[#allocation3] sm:$0xff] }
 0x229   : > { %v611_v14 = vld [vmem:[#allocation3 + $0x8] sm:$0xff] }
 0x22a   : > { %v622_v15 = vpack.c.bf16 %v611_v14, %v610_v13 }
 0x22c   : > { %1018 = vmatmul.mubr.msk.bf16.vlgmr.msra.gmra.mrb[0].mxu1 %vm489_vm9, %v622_v15 }
 0x2ff   : > { %v690_v17 = vpop.f32.mrb[0].mxu1 }
 0x300   : > { %v704_v19 = vmul.f32 %v961_v16, %v690_v17  ;;  %v1019_v20 = vpop.f32.mrb[1].mxu1 }
 0x301   : > { %v693_v21 = vpop.f32.mrb[2].mxu1 }
 0x302   : > { %v713_v22 = vadd.f32 %v962_v18, %v704_v19  ;;  %v705_v23 = vmul.f32 %v961_v16, %v693_v21  ;;  %v1020_v24 = vpop.f32.mrb[3].mxu1 }
 0x304   : > { %1069 = vtanh.f32 %v713_v22  ;;  %v714_v25 = vadd.f32 %v962_v18, %v705_v23 }
 0x306   : > { %1071 = vtanh.f32 %v714_v25 }
 0x30e   : > { %v1070_v26 = vpop.eup %1069 }
 0x30f   : > { %v717_v27 = vmul.f32 %v1070_v26, %v1192_v8 }
 0x310   : > { %v1072_v28 = vpop.eup %1071 }
 0x311   : > { %719 = vst.msk [vmem:[#allocation2 + $0x2] sm:$0xff] %vm379_vm0, %v717_v27  ;;  %v718_v30 = vmul.f32 %v1072_v28, %v1195_v9  ;;  %v1062_v9 = vld [vmem:[%s1361_s8 + $0x10] sm:$0xff]  }
 0x312   : > { %1026 = vmatpush3.bf16.msra.mxu0 %v1062_v9 }
 0x313   : > { %720 = vst.msk [vmem:[#allocation2 + $0xa] sm:$0xff] %vm379_vm0, %v718_v30  ;;  %1027 = vmatprep.subr.bf16.mxu0 %v1096_v1 }
 0x316   : > { %1028 = vmatpush3.bf16.msra.mxu0 %v1063_v36 }
 0x317   : > { %1029 = vmatprep.subr.bf16.mxu0 %v1096_v1 }
 0x318   : > { %v725_v8 = vld [vmem:[#allocation2 + $0x1] sm:$0xff] }
 0x319   : > { %v721_v32 = vld [vmem:[#allocation2] sm:$0xff]  ;;  %729 = vrot.lane.b32.xlu0 %v725_v8, %s1098_s16 }
 0x31a   : > { %723 = vst.msk [vmem:[#allocation3] sm:$0xff] %vm379_vm0, %v721_v32  ;;  %v726_v33 = vld [vmem:[#allocation2 + $0x9] sm:$0xff]  ;;  %1030 = vmatpush3.bf16.msra.mxu0 %v1064_v38 }
 0x31b   : > { %731 = vrot.lane.b32.xlu1 %v726_v33, %s1098_s16  ;;  %v737_v34 = vld [vmem:[#allocation2 + $0x2] sm:$0xff]  ;;  %v738_v37 = vld [vmem:[#allocation2 + $0xa] sm:$0xff] }
 0x31c   : > { %v722_v35 = vld [vmem:[#allocation2 + $0x8] sm:$0xff] }
 0x31d   : > { %741 = vrot.lane.b32.xlu0 %v737_v34, %s1097_s15  ;;  %724 = vst.msk [vmem:[#allocation3 + $0x8] sm:$0xff] %vm379_vm0, %v722_v35  ;;  %v749_v39 = vld [vmem:[#allocation2 + $0x3] sm:$0xff]  ;;  %v750_v40 = vld [vmem:[#allocation2 + $0xb] sm:$0xff] }
 0x31e   : > { %v761_v41 = vld [vmem:[#allocation2 + $0x4] sm:$0xff]  ;;  %v762_v42 = vld [vmem:[#allocation2 + $0xc] sm:$0xff] }
 0x31f   : > { %743 = vrot.lane.b32.xlu1 %v738_v37, %s1097_s15 }
 0x321   : > { %753 = vrot.lane.b32.xlu0 %v749_v39, %s1100_s21 }
 0x323   : > { %755 = vrot.lane.b32.xlu1 %v750_v40, %s1100_s21 }
 0x325   : > { %765 = vrot.lane.b32.xlu0 %v761_v41, %s1101_s23 }
 0x327   : > { %767 = vrot.lane.b32.xlu1 %v762_v42, %s1101_s23 }
 0x38b   : > { %v730_v43 = vpop.permute.xlu0 %729 }
 0x38c   : > { %735 = vst.msk [vmem:[#allocation3] sm:$0xff] %vm404_vm5, %v730_v43 }
 0x38d   : > { %v732_v44 = vpop.permute.xlu1 %731 }
 0x38e   : > { %736 = vst.msk [vmem:[#allocation3 + $0x8] sm:$0xff] %vm404_vm5, %v732_v44 }
 0x38f   : > { %v742_v45 = vpop.permute.xlu0 %741 }
 0x390   : > { %747 = vst.msk [vmem:[#allocation3] sm:$0xff] %vm417_vm6, %v742_v45 }
 0x391   : > { %v744_v1 = vpop.permute.xlu1 %743 }
 0x392   : > { %748 = vst.msk [vmem:[#allocation3 + $0x8] sm:$0xff] %vm417_vm6, %v744_v1 }
 0x393   : > { %v754_v46 = vpop.permute.xlu0 %753 }
 0x394   : > { %759 = vst.msk [vmem:[#allocation3] sm:$0xff] %vm430_vm7, %v754_v46 }
 0x395   : > { %v756_v47 = vpop.permute.xlu1 %755 }
 0x396   : > { %760 = vst.msk [vmem:[#allocation3 + $0x8] sm:$0xff] %vm430_vm7, %v756_v47 }
 0x397   : > { %v766_v48 = vpop.permute.xlu0 %765 }
 0x398   : > { %771 = vst.msk [vmem:[#allocation3] sm:$0xff] %vm443_vm8, %v766_v48 }
 0x399   : > { %v768_v49 = vpop.permute.xlu1 %767 }
 0x39a   : > { %772 = vst.msk [vmem:[#allocation3 + $0x8] sm:$0xff] %vm443_vm8, %v768_v49 }
 0x39f   : > { %v773_v50 = vld [vmem:[#allocation3] sm:$0xff] }
 0x3a1   : > { %v774_v51 = vld [vmem:[#allocation3 + $0x8] sm:$0xff] }
 0x3a2   : > { %v785_v52 = vpack.c.bf16 %v774_v51, %v773_v50 }
 0x3a4   : > { %1032 = vmatmul.mubr.msk.bf16.vlgmr.msra.gmra.mrb[4].mxu0 %vm489_vm9, %v785_v52 }
 0x477   : > { %v853_v54 = vpop.f32.mrb[4].mxu0 }
 0x478   : > { %v867_v56 = vmul.f32 %v969_v53, %v853_v54  ;;  %v1033_v57 = vpop.f32.mrb[5].mxu0 }
 0x479   : > { %v856_v58 = vpop.f32.mrb[6].mxu0 }
 0x47a   : > { %v876_v59 = vadd.f32 %v970_v55, %v867_v56  ;;  %v868_v60 = vmul.f32 %v969_v53, %v856_v58  ;;  %v1034_v61 = vpop.f32.mrb[7].mxu0 }
 0x47c   : > { %879 = vst.msk [vmem:[%s366_s29] sm:$0xff] %vm878_vm10, %v876_v59  ;;  %v877_v62 = vadd.f32 %v970_v55, %v868_v60 }
 0x47e   : > { %880 = vst.msk [vmem:[%s366_s29 + $0x8] sm:$0xff] %vm878_vm10, %v877_v62 }
 0x47f PF: > { %s27_s22 = sadd.s32 1, %s1093_s22  }
 0x480   : > { %p24_p9 = scmp.ge.s32.totalorder %s27_s22, 4  }
 0x482   :  { %26 = sbr.rel (!%p24_p9) target bundleno = 16 (0x10), region = 90 }

// kernel: _lambda_.4
= control target key start
LH: loop header
LB: loop body
LE: loop exit
PB: predicated region body
PF: predicated region fallthrough
CT: control target
= control target key end

     0   :  { %s3165_s6 = smov 2   ;;  %s3166_s10 = smov 3   ;;  %s3672_s0 = inlined_call_operand.smem [shape: u32[34], index: -1, kind: input, shape index: {}] }
   0x1   :  { %s3217_s5 = sld [smem:[%s3672_s0]]   ;;  %s3167_s14 = smov 4  }
   0x2   :  { %s3222_s9 = sld [smem:[%s3672_s0 + %s3165_s6]]   ;;  %s3168_s18 = smov 5  }
   0x3   :  { %s3227_s13 = sld [smem:[%s3672_s0 + %s3166_s10]]   ;;  %s3169_s22 = smov 6  }
   0x4   :  { %s3232_s17 = sld [smem:[%s3672_s0 + %s3167_s14]]   ;;  %s3170_s26 = smov 7  }
   0x5   :  { %s3237_s21 = sld [smem:[%s3672_s0 + %s3168_s18]]   ;;  %s3171_s30 = smov 8  }
   0x6   :  { %s3242_s25 = sld [smem:[%s3672_s0 + %s3169_s22]]   ;;  %s3172_s4 = smov 9  }
   0x7   :  { %s3247_s29 = sld [smem:[%s3672_s0 + %s3170_s26]]   ;;  %s3173_s10 = smov 10  }
   0x8   :  { %s3252_s3 = sld [smem:[%s3672_s0 + %s3171_s30]]   ;;  %s3174_s15 = smov 11  }
   0x9   :  { %s3257_s8 = sld [smem:[%s3672_s0 + %s3172_s4]]   ;;  %s3175_s20 = smov 12  }
   0xa   :  { %s3262_s14 = sld [smem:[%s3672_s0 + %s3173_s10]]   ;;  %s3176_s26 = smov 13  }
   0xb   :  { %s3267_s19 = sld [smem:[%s3672_s0 + %s3174_s15]]   ;;  %s3177_s1 = smov 14  }
   0xc   :  { %s3272_s24 = sld [smem:[%s3672_s0 + %s3175_s20]]   ;;  %s3178_s7 = smov 15  }
   0xd   :  { %s3277_s30 = sld [smem:[%s3672_s0 + %s3176_s26]]   ;;  %s3179_s15 = smov 16  }
   0xe   :  { %s3282_s6 = sld [smem:[%s3672_s0 + %s3177_s1]]   ;;  %s3180_s22 = smov 17  }
   0xf   :  { %s3287_s12 = sld [smem:[%s3672_s0 + %s3178_s7]]   ;;  %s3181_s28 = smov 18  }
  0x10   :  { %s3292_s20 = sld [smem:[%s3672_s0 + %s3179_s15]]   ;;  %s3182_s7 = smov 19  }
  0x11   :  { %s3297_s27 = sld [smem:[%s3672_s0 + %s3180_s22]]   ;;  %s3183_s15 = smov 20  }
  0x12   :  { %s3302_s4 = sld [smem:[%s3672_s0 + %s3181_s28]]   ;;  %s3184_s22 = smov 21  }
  0x13   :  { %s3185_s28 = smov 22  }
  0x14   :  { %3679 = sst [smem:[#allocation9_spill]] %s3282_s6 }
  0x15   :  { %3680 = sst [smem:[#allocation10_spill]] %s3287_s12 }
  0x16   :  { %3681 = sst [smem:[#allocation11_spill]] %s3292_s20 }
  0x17   :  { %3682 = sst [smem:[#allocation12_spill]] %s3297_s27 }
  0x18   :  { %s3307_s12 = sld [smem:[%s3672_s0 + %s3182_s7]]   ;;  %s3186_s7 = smov 23  }
  0x19   :  { %s3312_s6 = sld [smem:[%s3672_s0 + %s3183_s15]]   ;;  %s3187_s15 = smov 24  }
  0x1a   :  { %s3317_s27 = sld [smem:[%s3672_s0 + %s3184_s22]]   ;;  %s3188_s22 = smov 25  }
  0x1b   :  { %s3322_s20 = sld [smem:[%s3672_s0 + %s3185_s28]]   ;;  %s3189_s28 = smov 26  }
  0x1c   :  { %s3342_s10 = sld [smem:[%s3672_s0 + %s3189_s28]]   ;;  %s3193_s28 = smov 30  }
  0x1e   :  { %3683 = sst [smem:[#allocation13_spill]] %s3307_s12 }
  0x1f   :  { %3684 = sst [smem:[#allocation14_spill]] %s3312_s6 }
  0x20   :  { %3685 = sst [smem:[#allocation15_spill]] %s3317_s27 }
  0x21   :  { %3686 = sst [smem:[#allocation16_spill]] %s3322_s20  ;;  %s3195_s20 = smov 32  }
  0x22   :  { %s3327_s12 = sld [smem:[%s3672_s0 + %s3186_s7]]   ;;  %s3190_s7 = smov 27  }
  0x23   :  { %s3332_s6 = sld [smem:[%s3672_s0 + %s3187_s15]]   ;;  %s3191_s15 = smov 28  }
  0x24   :  { %s3337_s27 = sld [smem:[%s3672_s0 + %s3188_s22]]   ;;  %s3192_s22 = smov 29  }
  0x25   :  { %3690 = sst [smem:[#allocation20_spill]] %s3342_s10  ;;  %s73_s10 = sshll.u32 %s3217_s5, 4  ;;  %s74_s10 = int_to_ptr.vmem [resolvable:$true] %s73_s10 }
  0x26   :  { %s3347_s16 = sld [smem:[%s3672_s0 + %s3190_s7]]   ;;  %p3104_p1 = scmp.lt.s32.totalorder %s74_s10, %s74_s10 }
  0x27   :  { %s3352_s23 = sld [smem:[%s3672_s0 + %s3191_s15]]  }
  0x28   :  { %3687 = sst [smem:[#allocation17_spill]] %s3327_s12  ;;  %s3194_s12 = smov 31  }
  0x29   :  { %3688 = sst [smem:[#allocation18_spill]] %s3332_s6 }
  0x2a   :  { %3689 = sst [smem:[#allocation19_spill]] %s3337_s27  ;;  %s3196_s27 = smov 33  }
  0x2b   :  { %s3357_s1 = sld [smem:[%s3672_s0 + %s3192_s22]]  }
  0x2c   :  { %3691 = sst [smem:[#allocation21_spill]] %s3347_s16 }
  0x2d   :  { %3692 = sst [smem:[#allocation22_spill]] %s3352_s23 }
  0x2e   :  { %s3362_s6 = sld [smem:[%s3672_s0 + %s3193_s28]]   ;;  %s3099_s28 = scalar_lea.vmem %s74_s10, 16 }
  0x2f   :  { %s3367_s16 = sld [smem:[%s3672_s0 + %s3194_s12]]   ;;  %p3100_p0 = scmp.ne.s32.totalorder %s74_s10, %s3099_s28 }
  0x30   :  { %s3372_s23 = sld [smem:[%s3672_s0 + %s3195_s20]]   ;;  %p3105_p2 = scmp.lt.s32.totalorder %s3099_s28, %s3099_s28 }
  0x31   :  { %3693 = sst [smem:[#allocation23_spill]] %s3357_s1 }
  0x32   :  { %s3377_s1 = sld [smem:[%s3672_s0 + %s3196_s27]]   ;;  %p3106_p3 = por %p3105_p2, %p3104_p1 }
  0x34   :  { %p3107_p4 = pnand %p3106_p3, %p3100_p0 }
  0x36   :  { %3110 = shalt.err (!%p3107_p4)  }
  0x37   :  { %s3197_s2 = smov [#allocation3]   ;;  %s3198_s12 = smov 1  }
  0x38   :  { %76 = dma.vmem_to_smem %s74_s10, 16, %s3197_s2, [#allocation2] }
  0x39   :  { %s2660_s20 = sld [smem:[%s3672_s0 + %s3198_s12]]  }
  0x3f   :  { %s77_s15 = sshll.u32 %s2660_s20, 4  ;;  %s78_s15 = int_to_ptr.vmem [resolvable:$true] %s77_s15 }
  0x40   :  { %s3111_s18 = scalar_lea.vmem %s78_s15, 16  ;;  %p3116_p6 = scmp.lt.s32.totalorder %s78_s15, %s78_s15 }
  0x41   :  { %p3112_p5 = scmp.ne.s32.totalorder %s78_s15, %s3111_s18  ;;  %p3117_p7 = scmp.lt.s32.totalorder %s3111_s18, %s3111_s18 }
  0x43   :  { %p3118_p8 = por %p3117_p7, %p3116_p6 }
  0x45   :  { %p3119_p9 = pnand %p3118_p8, %p3112_p5 }
  0x47   :  { %3122 = shalt.err (!%p3119_p9)  }
  0x48   :  { %s3199_s5 = smov [#allocation4]  }
  0x49   :  { %80 = dma.vmem_to_smem %s78_s15, 16, %s3199_s5, [#allocation2] }
  0x4a   :  { %3155 = dma.done.wait [#allocation2], 32 }
  0x4b   :  { %3156 = vsyncadd [#allocation2], 4294967264 }
  0x4c   :  { %82 = sfence }
  0x4d   :  { %83 = vsyncpa [#allocation6], 0  ;;  %s3383_s27 = smov 0  }
  0x4e LB: > { %s3389_s0 = sadd.s32 4294967295, %s3163_s27   ;;  %p2695_p10 = scmp.ge.s32.totalorder %s3163_s27, 1  ;;  %s3163_s27 = sphi %s3383_s27, %s89_s27  }
  0x4f   : > { %p786_p11 = scmp.lt.s32.totalorder %s3163_s27, 3  ;;  %p3677_p13 = scmp.eq.s32.totalorder %s3389_s0, 0 }
  0x50   : > { %s3200_s26 = smov [#allocation5]   ;;  %s3123_s2 = scalar_lea.hbm %s3367_s16, 16 }
  0x51   : > { %p3393_p12 = pnand %p2695_p10, %p786_p11  ;;  %s880_s10 = sshll.u32 %s3200_s26, 4  ;;  %s881_s10 = int_to_ptr.vmem [resolvable:$true] %s880_s10 }
  0x52   : > { %p3124_p2 = scmp.ne.s32.totalorder %s3367_s16, %s3123_s2  ;;  %p3130_p6 = scmp.lt.u32.totalorder %s3123_s2, %s3367_s16 }
  0x53   : > { %s3694_s22 = scalar_select %p3393_p12, 1, 0 }
  0x54   : > { %p2975_p0 = pneg %p3393_p12 }
  0x56   : > { %p3402_p1 = pnand %p3677_p13, %p2975_p0 }
  0x58   : > { %p3125_p3 = pneg %p3402_p1 }
  0x5a   : > { %p3126_p4 = pnand %p3125_p3, %p3124_p2 }
  0x5c   : > { %p3127_p5 = pneg %p3126_p4 }
  0x5e   : > { %p3132_p7 = pnand %p3130_p6, %p3127_p5 }
  0x60   : > { %3135 = shalt.err (!%p3132_p7)
}
  0x61   : > { %s3136_s12 = scalar_lea.vmem %s881_s10, 16  ;;  %s3143_s7 = scalar_lea.vmem %s881_s10, 32 }
  0x62   : > { %p3137_p8 = scmp.ne.s32.totalorder %s881_s10, %s3136_s12  ;;  %p3144_p11 = scmp.lt.s32.totalorder %s881_s10, %s881_s10 }
  0x63   : > { %p3145_p0 = scmp.lt.s32.totalorder %s3143_s7, %s3136_s12 }
  0x64   : > { %p3139_p9 = pnand %p3137_p8, %p3125_p3 }
  0x65   : > { %p3146_p13 = por %p3145_p0, %p3144_p11 }
  0x66   : > { %p3140_p10 = pneg %p3139_p9 }
  0x68   : > { %p3147_p12 = pnand %p3146_p13, %p3140_p10 }
  0x6a   : > { %3150 = shalt.err (!%p3147_p12)
}
  0x6b   : > { %2978 = dma.hbm_to_vmem [thread:$0]  (!%p3402_p1), %s3367_s16, 16, %s881_s10, [#allocation6]  }
  0x6c   : > { %p3696_p2 = scmp.ne.s32.totalorder %s3694_s22, 0 }
  0x6d   : > { %p3697_p4 = scmp.eq.s32.totalorder (!%p3696_p2), %s3389_s0, 0 }
  0x6e   : > { %908 = sbr.rel (%p3696_p2) target bundleno = 5008 (0x1390), region = 140 }
  0x75   : > { %3158 = dma.done.wait (%p3697_p4), [#allocation6], 16   ;;  %p3698_p5 = pmov %p3697_p4 }
  0x76   : > { %p997_p3 = scmp.lt.s32.totalorder %s3389_s0, 1  ;;  %v3201_v0 = vmov 0.0   ;;  %vm3202_vm0 = vmmov 0   ;;  %vm1035_vm1 = vcmask 1043456   ;;  %v1022_v1 = vld [vmem:[%s3237_s21] sm:$0xf]  ;;  %v1216_v54 = vlaneseq }
  0x77   : > { %3160 = vsyncadd (%p3698_p5), [#allocation6], 4294967280  ;;  %2825 = vmatprep.subr.bf16.mxu0 %v3201_v0  ;;  %2827 = vmatprep.mubr.msk.bf16.mxu0 %vm3202_vm0, %v3201_v0  ;;  %v1037_v4 = vsel %vm1035_vm1, %v1022_v1, 0  ;;  %vm1031_vm2 = vcmask 64512   ;;  %v3033_v6 = vld [vmem:[%s3247_s29] sm:$0xff]   ;;  %v3034_v7 = vld [vmem:[%s3247_s29 + $0x8] sm:$0xff]  }
  0x78   : > { %s3425_s11 = scalar_select %p997_p3, %s3389_s0, 1  ;;  %2831 = vmatprep.subr.bf16.mxu1 %v3201_v0  ;;  %2835 = vmatprep.mubr.msk.bf16.mxu1 %vm3202_vm0, %v3201_v0  ;;  %v2707_v8 = vld [vmem:[%s3242_s25] ss:$0 sm:$0xff]  ;;  %vm1106_vm3 = vcmask 261120   ;;  %v3036_v19 = vld [vmem:[%s3257_s8 + $0x8] sm:$0xff]   ;;  %vm1302_vm4 = vcmask 130048  }
  0x79   : > { %2826 = vmatpush3.bf16.msra.mxu0 %v1037_v4  ;;  %2832 = vmatpush3.bf16.msra.mxu1 %v3033_v6  ;;  %v3035_v18 = vld [vmem:[%s3257_s8] sm:$0xff]   ;;  %v3038_v31 = vld [vmem:[%s3262_s14 + $0x8] sm:$0xff]   ;;  %s3203_s18 = smov 112   ;;  %s3204_s5 = smov 96   ;;  %v3492_v55 = vshrl.u32 %v1216_v54, 7  ;;  %v3494_v56 = vand.u32 127, %v1216_v54 }
  0x7a   : > { %s2770_s20 = sshll.u32 %s3425_s11, 4  ;;  %2839 = vmatprep.subr.bf16.mxu0 %v3201_v0  ;;  %2833 = vmatprep.subr.bf16.mxu1 %v3201_v0  ;;  %v2709_v20 = vld [vmem:[%s3252_s3] ss:$0 sm:$0xff]  ;;  %v1159_v34 = vld [vmem:[%s3232_s17 + $0x8] sm:$0xff]  ;;  %s3205_s22 = smov 80   ;;  %vm2378_vm11 = vcmask 523264  }
  0x7b   : > { %s1001_s15 = scalar_lea.vmem %s3222_s9, %s2770_s20  ;;  %v3037_v30 = vld [vmem:[%s3262_s14] sm:$0xff]   ;;  %s1018_s26 = sld [smem:[#allocation4 + %s3389_s0]]  ;;  %v3499_v58 = vadd.s32 8, %v3492_v55  ;;  %vm1221_vm5 = vcmp.le.s32.totalorder %v3494_v56, %v3492_v55  ;;  %v3206_v60 = vmov -1e+09   ;;  %vm2545_vm13 = vcmask 72704  }
  0x7c   : > { %v1019_v2 = vld [vmem:[%s1001_s15] sm:$0xff]  ;;  %v1020_v3 = vld [vmem:[%s1001_s15 + $0x8] sm:$0xff]  ;;  %s3207_s10 = smov 48   ;;  %s3208_s28 = smov 64  }
  0x7d   : > { %v1024_v5 = vpack.c.bf16 %v1020_v3, %v1019_v2  ;;  %2834 = vmatpush3.bf16.msra.mxu1 %v3034_v7  ;;  %v1158_v32 = vld [vmem:[%s3232_s17] sm:$0xff]  ;;  %vm1222_vm7 = vcmp.le.s32.totalorder %v3494_v56, %v3499_v58  ;;  %s3699_s2 = sld [smem:[#allocation11_spill]]  ;;  %s2702_s12 = sshll.u32 %s3425_s11, 3 }
  0x7e   : > { %2847 = vmatprep.subr.bf16.mxu1 %v3201_v0  ;;  %v2716_v41 = vld [vmem:[%s3267_s19] ss:$0 sm:$0xff]  ;;  %s1005_s7 = scalar_lea.vmem %s3227_s13, %s2702_s12  ;;  %s3700_s15 = sld [smem:[#allocation9_spill]] }
  0x7f   : > { %2828 = vmatmul.mubr.msk.bf16.vlgmr.msra.gmra.mrb[0].mxu0 %vm1031_vm2, %v1024_v5  ;;  %s1017_s12 = sld [smem:[#allocation3 + %s3389_s0]]  ;;  %s2772_s0 = sshll.u32 %s3425_s11, 5 }
  0x80   : > { %2843 = vmatprep.mubr.msk.bf16.mxu0 %vm3202_vm0, %v3201_v0  ;;  %2840 = vmatpush3.bf16.msra.mxu0 %v3035_v18 }
  0x81   : > { %2841 = vmatprep.subr.bf16.mxu0 %v3201_v0  ;;  %v3496_v57 = vstv %s1018_s26  ;;  %s3701_s26 = sld [smem:[#allocation10_spill]] }
  0x82   : > { %vm1224_vm6 = vcmp.lt.s32.totalorder %v3494_v56, %v3496_v57  ;;  %vm2537_vm12 = vcmp.lt.s32.totalorder %v3492_v55, %v3496_v57  ;;  %vm2538_vm14 = vcmp.lt.s32.totalorder %v3499_v58, %v3496_v57 }
  0x83   : > { %vm1225_vm8 = vmand %vm1221_vm5, %vm1224_vm6 }
  0x84   : > { %2842 = vmatpush3.bf16.msra.mxu0 %v3036_v19  ;;  %vm1226_vm9 = vmand %vm1222_vm7, %vm1224_vm6  ;;  %v1227_v61 = vsel %vm1225_vm8, 0.0, %v3206_v60 }
  0x85   : > { %2855 = vmatprep.subr.bf16.mxu0 %v3201_v0  ;;  %v1228_v2 = vsel %vm1226_vm9, 0.0, %v3206_v60 }
 0x152   : > { %v1073_v9 = vpop.f32.mrb[0].mxu0 }
 0x153   : > { %v1074_v10 = vadd.f32 %v2707_v8, %v1073_v9  ;;  %v2829_v11 = vpop.f32.mrb[1].mxu0 }
 0x154   : > { %v1076_v12 = vpop.f32.mrb[2].mxu0 }
 0x155   : > { %v1077_v13 = vadd.f32 %v2707_v8, %v1076_v12  ;;  %v2830_v14 = vpop.f32.mrb[3].mxu0  ;;  %v1080_v15 = vmax.f32 %v1074_v10, 0.0 }
 0x157   : > { %v1081_v16 = vmax.f32 %v1077_v13, 0.0 }
 0x159   : > { %v1087_v17 = vpack.c.bf16 %v1081_v16, %v1080_v15 }
 0x15b   : > { %2836 = vmatmul.mubr.msk.bf16.vlgmr.msra.gmra.mrb[0].mxu1 %vm1106_vm3, %v1087_v17 }
 0x15c   : > { %2851 = vmatprep.mubr.msk.bf16.mxu1 %vm3202_vm0, %v3201_v0  ;;  %2848 = vmatpush3.bf16.msra.mxu1 %v3037_v30 }
 0x15d   : > { %2849 = vmatprep.subr.bf16.mxu1 %v3201_v0 }
 0x160   : > { %2850 = vmatpush3.bf16.msra.mxu1 %v3038_v31 }
 0x161   : > { %2861 = vmatprep.subr.bf16.mxu1 %v3201_v0 }
 0x22e   : > { %v1144_v21 = vpop.f32.mrb[0].mxu1 }
 0x22f   : > { %v1145_v22 = vadd.f32 %v2709_v20, %v1144_v21  ;;  %v2837_v23 = vpop.f32.mrb[1].mxu1 }
 0x230   : > { %v1147_v24 = vpop.f32.mrb[2].mxu1 }
 0x231   : > { %v1148_v25 = vadd.f32 %v2709_v20, %v1147_v24  ;;  %v2838_v26 = vpop.f32.mrb[3].mxu1  ;;  %v1151_v27 = vmax.f32 %v1145_v22, 0.0 }
 0x233   : > { %v1152_v28 = vmax.f32 %v1148_v25, 0.0 }
 0x235   : > { %v1157_v29 = vpack.c.bf16 %v1152_v28, %v1151_v27 }
 0x237   : > { %2844 = vmatmul.mubr.msk.bf16.vlgmr.msra.gmra.mrb[4].mxu0 %vm1106_vm3, %v1157_v29 }
 0x238   : > { %2857 = vmatprep.mubr.msk.bf16.mxu0 %vm3202_vm0, %v3201_v0 }
 0x30a   : > { %v1209_v33 = vpop.f32.mrb[4].mxu0 }
 0x30b   : > { %v2845_v35 = vpop.f32.mrb[5].mxu0  ;;  %v3462_v37 = vadd.f32 %v1209_v33, %v1158_v32 }
 0x30c   : > { %v1212_v36 = vpop.f32.mrb[6].mxu0 }
 0x30d   : > { %v3464_v38 = vadd.f32 %v1212_v36, %v1159_v34  ;;  %v2846_v39 = vpop.f32.mrb[7].mxu0 }
 0x30f   : > { %v1234_v40 = vpack.c.bf16 %v3464_v38, %v3462_v37 }
 0x311   : > { %2852 = vmatmul.mubr.msk.bf16.vlgmr.msra.gmra.mrb[4].mxu1 %vm1106_vm3, %v1234_v40 }
 0x312   : > { %2863 = vmatprep.mubr.msk.bf16.mxu1 %vm3202_vm0, %v3201_v0 }
 0x3e4   : > { %v1290_v42 = vpop.f32.mrb[4].mxu1 }
 0x3e5   : > { %v2853_v43 = vpop.f32.mrb[5].mxu1  ;;  %v1291_v45 = vadd.f32 %v2716_v41, %v1290_v42 }
 0x3e6   : > { %v1293_v44 = vpop.f32.mrb[6].mxu1 }
 0x3e7   : > { %v1294_v46 = vadd.f32 %v2716_v41, %v1293_v44  ;;  %v2854_v47 = vpop.f32.mrb[7].mxu1 }
 0x3e9   : > { %v3472_v48 = vpack.c.bf16 %v1294_v46, %v1291_v45 }
 0x3eb   : > { %1427 = vrot.lane.b32.xlu1 %v3472_v48, %s3203_s18  ;;  %1300 = vrot.lane.b32.xlu0 %v3472_v48, %s3204_s5 }
 0x3ef   : > { %1429 = vrot.lane.b32.xlu0 %v3472_v48, %s3205_s22 }
 0x45d   : > { %v1301_v49 = vpop.permute.xlu0 %1300  ;;  %v1428_v53 = vpop.permute.xlu1 %1427 }
 0x45e   : > { %v1307_v50 = vsel %vm1302_vm4, %v1301_v49, 0 }
 0x45f   : > { %2856 = vmatpush3.bf16.xpose.msra.mxu0 %v1307_v50 }
 0x460   : > { %2867 = vmatprep.subr.bf16.mxu0 %v3201_v0 }
 0x461   : > { %v1430_v51 = vpop.permute.xlu0 %1429 }
 0x462   : > { %v1435_v52 = vsel %vm1302_vm4, %v1430_v51, 0 }
 0x466   : > { %2858 = vmatmul.mubr.msk.bf16.vlgmr.msra.gmra.mrb[8].mxu0 %vm1302_vm4, %v3472_v48 }
 0x467   : > { %2868 = vmatpush3.bf16.xpose.msra.mxu0 %v1435_v52  ;;  %2869 = vmatprep.mubr.msk.bf16.mxu0 %vm3202_vm0, %v3201_v0 }
 0x468   : > { %2879 = vmatprep.subr.bf16.mxu0 %v3201_v0 }
 0x46e   : > { %2870 = vmatmul.mubr.msk.bf16.vlgmr.msra.gmra.mrb[12].mxu0 %vm1302_vm4, %v1428_v53 }
 0x46f   : > { %2881 = vmatprep.mubr.msk.bf16.mxu0 %vm3202_vm0, %v3201_v0 }
 0x539   : > { %v1343_v59 = vpop.f32.mrb[8].mxu0 }
 0x53a   : > { %v1350_v62 = vmul.f32 0.25, %v1343_v59  ;;  %v2859_v63 = vpop.f32.mrb[9].mxu0 }
 0x53b   : > { %v1346_v1 = vpop.f32.mrb[10].mxu0  ;;  %v3040_v63 = vld [vmem:[%s3272_s24 + $0x8] sm:$0xff]  }
 0x53c   : > { %v1351_v3 = vmul.f32 0.25, %v1346_v1  ;;  %v2860_v4 = vpop.f32.mrb[11].mxu0  ;;  %v1352_v5 = vadd.f32 %v1350_v62, %v1227_v61  ;;  %v3039_v62 = vld [vmem:[%s3272_s24] sm:$0xff]   ;;  %2880 = vmatpush3.bf16.msra.mxu0 %v3040_v63 }
 0x53d   : > { %2891 = vmatprep.subr.bf16.mxu0 %v3201_v0 }
 0x53e   : > { %v1354_v6 = vsel %vm1302_vm4, %v1352_v5, -inf  ;;  %v1353_v7 = vadd.f32 %v1351_v3, %v1228_v2 }
 0x53f   : > { %1355 = vmax.xlane.f32.xlu1 %v1354_v6 }
 0x540   : > { %v1357_v8 = vsel %vm1302_vm4, %v1353_v7, -inf }
 0x541   : > { %v1471_v9 = vpop.f32.mrb[12].mxu0  ;;  %1358 = vmax.xlane.f32.xlu0 %v1357_v8 }
 0x542   : > { %v1478_v10 = vmul.f32 0.25, %v1471_v9  ;;  %v2871_v11 = vpop.f32.mrb[13].mxu0 }
 0x543   : > { %v1474_v12 = vpop.f32.mrb[14].mxu0 }
 0x544   : > { %v1479_v13 = vmul.f32 0.25, %v1474_v12  ;;  %v2872_v14 = vpop.f32.mrb[15].mxu0  ;;  %v1480_v15 = vadd.f32 %v1478_v10, %v1227_v61 }
 0x546   : > { %v1482_v16 = vsel %vm1302_vm4, %v1480_v15, -inf  ;;  %v1481_v17 = vadd.f32 %v1479_v13, %v1228_v2 }
 0x547   : > { %1483 = vmax.xlane.f32.xlu0 %v1482_v16 }
 0x548   : > { %v1485_v18 = vsel %vm1302_vm4, %v1481_v17, -inf }
 0x549   : > { %1486 = vmax.xlane.f32.xlu1 %v1485_v18 }
 0x5cc   : > { %v1356_v19 = vpop.xlane.xlu1 %1355 }
 0x5cd   : > { %v1360_v20 = vsub.f32 %v1352_v5, %v1356_v19 }
 0x5ce   : > { %v1359_v21 = vpop.xlane.xlu0 %1358 }
 0x5cf   : > { %v1362_v22 = vmul.f32 1.442695, %v1360_v20  ;;  %v1361_v23 = vsub.f32 %v1353_v7, %v1359_v21 }
 0x5d1   : > { %3055 = vpow2.f32 %v1362_v22  ;;  %v1364_v24 = vmul.f32 1.442695, %v1361_v23 }
 0x5d3   : > { %3057 = vpow2.f32 %v1364_v24 }
 0x5d4   : > { %v1484_v25 = vpop.xlane.xlu0 %1483 }
 0x5d5   : > { %v1488_v26 = vsub.f32 %v1480_v15, %v1484_v25  ;;  %v2728_v15 = vld [vmem:[%s3277_s30] ss:$0 sm:$0xff] }
 0x5d6   : > { %v1487_v27 = vpop.xlane.xlu1 %1486 }
 0x5d7   : > { %v1490_v28 = vmul.f32 1.442695, %v1488_v26  ;;  %v1489_v29 = vsub.f32 %v1481_v17, %v1487_v27 }
 0x5d9   : > { %3059 = vpow2.f32 %v1490_v28  ;;  %v1492_v30 = vmul.f32 1.442695, %v1489_v29 }
 0x5db   : > { %v3056_v31 = vpop.eup %3055  ;;  %3061 = vpow2.f32 %v1492_v30 }
 0x5dc   : > { %v1366_v32 = vsel %vm1302_vm4, %v3056_v31, 0.0 }
 0x5dd   : > { %v3058_v33 = vpop.eup %3057  ;;  %1367 = vadd.xlane.f32.xlu0 %v1366_v32 }
 0x5de   : > { %v1369_v34 = vsel %vm1302_vm4, %v3058_v33, 0.0 }
 0x5df   : > { %1370 = vadd.xlane.f32.xlu1 %v1369_v34 }
 0x5e3   : > { %v3060_v35 = vpop.eup %3059 }
 0x5e4   : > { %v1494_v36 = vsel %vm1302_vm4, %v3060_v35, 0.0 }
 0x5e5   : > { %v3062_v39 = vpop.eup %3061  ;;  %1495 = vadd.xlane.f32.xlu0 %v1494_v36  ;;  %v3041_v36 = vld [vmem:[%s3302_s4] sm:$0xff]  }
 0x5e6   : > { %v1497_v40 = vsel %vm1302_vm4, %v3062_v39, 0.0 }
 0x5e7   : > { %1498 = vadd.xlane.f32.xlu1 %v1497_v40  ;;  %v1021_v40 = vld [vmem:[%s1005_s7] sm:$0xff]  ;;  %s3706_s7 = sld [smem:[#allocation18_spill]] }
 0x5f8   : > { %1505 = vrot.lane.b32.xlu1 %v3472_v48, %s3207_s10  ;;  %s3702_s10 = sld [smem:[#allocation13_spill]] }
 0x5fb   : > { %1377 = vrot.lane.b32.xlu0 %v3472_v48, %s3208_s28  ;;  %s3703_s28 = sld [smem:[#allocation12_spill]] }
 0x66a   : > { %v1368_v41 = vpop.xlane.xlu0 %1367 }
 0x66b   : > { %3063 = vrcp.f32 %v1368_v41  ;;  %v1786_v41 = vpack.c.bf16 %v1021_v40, %v1021_v40 }
 0x66c   : > { %v1371_v42 = vpop.xlane.xlu1 %1370 }
 0x66d   : > { %3065 = vrcp.f32 %v1371_v42  ;;  %v3043_v42 = vld [vmem:[%s3699_s2] sm:$0xff]  }
 0x672   : > { %v1496_v43 = vpop.xlane.xlu0 %1495 }
 0x673   : > { %3067 = vrcp.f32 %v1496_v43  ;;  %v3044_v43 = vld [vmem:[%s3699_s2 + $0x8] sm:$0xff]  }
 0x674   : > { %v1499_v44 = vpop.xlane.xlu1 %1498 }
 0x675   : > { %v3064_v45 = vpop.eup %3063  ;;  %3069 = vrcp.f32 %v1499_v44 }
 0x676   : > { %v1378_v46 = vpop.permute.xlu0 %1377  ;;  %v1374_v49 = vmul.f32 %v3064_v45, %v3056_v31 }
 0x677   : > { %v3066_v47 = vpop.eup %3065  ;;  %2862 = vmatpush3.bf16.msra.mxu1 %v1378_v46 }
 0x678   : > { %v1375_v50 = vmul.f32 %v3066_v47, %v3058_v33  ;;  %2873 = vmatprep.subr.bf16.mxu1 %v3201_v0  ;;  %v1506_v48 = vpop.permute.xlu1 %1505 }
 0x67a   : > { %v1376_v51 = vpack.c.bf16 %v1375_v50, %v1374_v49 }
 0x67c   : > { %2864 = vmatmul.mubr.msk.bf16.vlgmr.msra.gmra.mrb[8].mxu1 %vm1302_vm4, %v1376_v51 }
 0x67d   : > { %v3068_v52 = vpop.eup %3067  ;;  %2874 = vmatpush3.bf16.msra.mxu1 %v1506_v48  ;;  %2875 = vmatprep.mubr.msk.bf16.mxu1 %vm3202_vm0, %v3201_v0  ;;  %v2729_v48 = vld [vmem:[%s3700_s15] ss:$0 sm:$0xff]  ;;  %s3707_s15 = sld [smem:[#allocation20_spill]] }
 0x67e   : > { %2885 = vmatprep.subr.bf16.mxu1 %v3201_v0  ;;  %v1502_v54 = vmul.f32 %v3068_v52, %v3060_v35 }
 0x67f   : > { %v3070_v53 = vpop.eup %3069 }
 0x680   : > { %v1503_v59 = vmul.f32 %v3070_v53, %v3062_v39  ;;  %v3042_v39 = vld [vmem:[%s3302_s4 + $0x8] sm:$0xff]  }
 0x682   : > { %v1504_v61 = vpack.c.bf16 %v1503_v59, %v1502_v54 }
 0x684   : > { %2876 = vmatmul.mubr.msk.bf16.vlgmr.msra.gmra.mrb[12].mxu1 %vm1302_vm4, %v1504_v61  ;;  %v2730_v61 = vld [vmem:[%s3701_s26] ss:$0 sm:$0xff]  ;;  %s3708_s26 = sld [smem:[#allocation16_spill]] }
 0x685   : > { %2887 = vmatprep.mubr.msk.bf16.mxu1 %vm3202_vm0, %v3201_v0  ;;  %2886 = vmatpush3.bf16.msra.mxu1 %v3039_v62 }
 0x686   : > { %2899 = vmatprep.subr.bf16.mxu1 %v3201_v0 }
 0x74f   : > { %v1417_v1 = vpop.f32.mrb[8].mxu1 }
 0x750   : > { %v2865_v2 = vpop.f32.mrb[9].mxu1 }
 0x751   : > { %v1420_v3 = vpop.f32.mrb[10].mxu1 }
 0x752   : > { %v1426_v4 = vpack.c.bf16 %v1420_v3, %v1417_v1  ;;  %v2866_v5 = vpop.f32.mrb[11].mxu1  ;;  %v2735_v3 = vld [vmem:[%s3702_s10] ss:$0 sm:$0xff]  ;;  %s3709_s10 = sld [smem:[#allocation17_spill]] }
 0x754   : > { %2888 = vmatmul.mubr.msk.bf16.vlgmr.msra.gmra.mrb[16].mxu1 %vm1302_vm4, %v1426_v4 }
 0x755   : > { %2903 = vmatprep.mubr.msk.bf16.mxu1 %vm3202_vm0, %v3201_v0  ;;  %2900 = vmatpush3.bf16.msra.mxu1 %v3041_v36 }
 0x756   : > { %2901 = vmatprep.subr.bf16.mxu1 %v3201_v0 }
 0x757   : > { %v1545_v6 = vpop.f32.mrb[12].mxu1 }
 0x758   : > { %v2877_v7 = vpop.f32.mrb[13].mxu1 }
 0x759   : > { %v1548_v8 = vpop.f32.mrb[14].mxu1  ;;  %2902 = vmatpush3.bf16.msra.mxu1 %v3042_v39 }
 0x75a   : > { %v1554_v9 = vpack.c.bf16 %v1548_v8, %v1545_v6  ;;  %v2878_v10 = vpop.f32.mrb[15].mxu1  ;;  %2913 = vmatprep.subr.bf16.mxu1 %v3201_v0 }
 0x75c   : > { %2882 = vmatmul.mubr.msk.bf16.vlgmr.msra.gmra.mrb[16].mxu0 %vm1302_vm4, %v1554_v9  ;;  %2904 = vmatmul.mubr.msk.bf16.vlgmr.msra.gmra.mrb[20].mxu1 %vm1106_vm3, %v1786_v41 }
 0x75d   : > { %2895 = vmatprep.mubr.msk.bf16.mxu0 %vm3202_vm0, %v3201_v0  ;;  %2915 = vmatprep.mubr.msk.bf16.mxu1 %vm3202_vm0, %v3201_v0 }
 0x75e   : > { %2892 = vmatpush3.bf16.msra.mxu0 %v3043_v42 }
 0x75f   : > { %2893 = vmatprep.subr.bf16.mxu0 %v3201_v0 }
 0x762   : > { %2894 = vmatpush3.bf16.msra.mxu0 %v3044_v43 }
 0x763   : > { %2907 = vmatprep.subr.bf16.mxu0 %v3201_v0 }
 0x827   : > { %v1648_v11 = vpop.f32.mrb[16].mxu1 }
 0x828   : > { %v2889_v12 = vpop.f32.mrb[17].mxu1 }
 0x829   : > { %v1651_v13 = vpop.f32.mrb[18].mxu1 }
 0x82a   : > { %v2890_v14 = vpop.f32.mrb[19].mxu1 }
 0x82f   : > { %v1598_v16 = vpop.f32.mrb[16].mxu0  ;;  %v1842_v4 = vpop.f32.mrb[20].mxu1 }
 0x830   : > { %v1649_v17 = vadd.f32 %v1648_v11, %v1598_v16  ;;  %v2883_v18 = vpop.f32.mrb[17].mxu0  ;;  %v1843_v5 = vadd.f32 %v2735_v3, %v1842_v4  ;;  %v2905_v6 = vpop.f32.mrb[21].mxu1  ;;  %v2731_v11 = vld [vmem:[%s3703_s28] ss:$0 sm:$0xff]  ;;  %s3710_s28 = sld [smem:[#allocation19_spill]] }
 0x831   : > { %v1601_v19 = vpop.f32.mrb[18].mxu0  ;;  %v1845_v7 = vpop.f32.mrb[22].mxu1 }
 0x832   : > { %v1661_v20 = vadd.f32 %v2728_v15, %v1649_v17  ;;  %v1652_v21 = vadd.f32 %v1651_v13, %v1601_v19  ;;  %v2884_v22 = vpop.f32.mrb[19].mxu0  ;;  %v3569_v8 = vpack.c.bf16 %v1843_v5, %v1843_v5  ;;  %v2906_v9 = vpop.f32.mrb[23].mxu1 }
 0x833   : > { %v1710_v22 = vstv %s1017_s12  ;;  %s3711_s12 = sld [smem:[#allocation21_spill]] }
 0x834   : > { %v1662_v23 = vadd.f32 %v2728_v15, %v1652_v21  ;;  %v1663_v24 = vadd.f32 %v1661_v20, %v3462_v37  ;;  %v1855_v10 = vsel %vm1302_vm4, %v3569_v8, 0  ;;  %vm1711_vm10 = vcmp.lt.s32.totalorder %v3494_v56, %v1710_v22 }
 0x836   : > { %v1667_v25 = vsel %vm1106_vm3, %v1663_v24, 0.0  ;;  %v1664_v26 = vadd.f32 %v1662_v23, %v3464_v38 }
 0x837   : > { %1668 = vadd.xlane.f32.xlu1 %v1667_v25 }
 0x838   : > { %v1670_v27 = vsel %vm1106_vm3, %v1664_v26, 0.0 }
 0x839   : > { %1671 = vadd.xlane.f32.xlu0 %v1670_v27 }
 0x8c4   : > { %v1669_v28 = vpop.xlane.xlu1 %1668 }
 0x8c5   : > { %v1674_v29 = vmul.f32 0.03125, %v1669_v28 }
 0x8c6   : > { %v1672_v30 = vpop.xlane.xlu0 %1671 }
 0x8c7   : > { %v1676_v31 = vsub.f32 %v1663_v24, %v1674_v29  ;;  %v1675_v32 = vmul.f32 0.03125, %v1672_v30  ;;  %v1712_v24 = vsel %vm1711_vm10, 0.0, %v3206_v60 }
 0x8c9   : > { %v1677_v33 = vsub.f32 %v1664_v26, %v1675_v32  ;;  %v1678_v34 = vmul.f32 %v1676_v31, %v1676_v31 }
 0x8cb   : > { %v1680_v37 = vsel %vm1106_vm3, %v1678_v34, 0.0  ;;  %v1679_v35 = vmul.f32 %v1677_v33, %v1677_v33 }
 0x8cc   : > { %1681 = vadd.xlane.f32.xlu0 %v1680_v37 }
 0x8cd   : > { %v1683_v38 = vsel %vm1106_vm3, %v1679_v35, 0.0 }
 0x8ce   : > { %1684 = vadd.xlane.f32.xlu1 %v1683_v38 }
 0x8e2   : > { %1981 = vrot.lane.b32.xlu0 %v3569_v8, %s3203_s18 }
 0x959   : > { %v1682_v44 = vpop.xlane.xlu0 %1681 }
 0x95a   : > { %v1686_v45 = vmul.f32 0.03125, %v1682_v44 }
 0x95b   : > { %v1685_v46 = vpop.xlane.xlu1 %1684 }
 0x95c   : > { %v1688_v47 = vadd.f32 1e-05, %v1686_v45  ;;  %v1687_v49 = vmul.f32 0.03125, %v1685_v46 }
 0x95d   : > { %v1982_v15 = vpop.permute.xlu0 %1981 }
 0x95e   : > { %3071 = vrsqrt.f32 %v1688_v47  ;;  %v1689_v50 = vadd.f32 1e-05, %v1687_v49  ;;  %v1987_v20 = vsel %vm1302_vm4, %v1982_v15, 0 }
 0x960   : > { %3073 = vrsqrt.f32 %v1689_v50 }
 0x968   : > { %v3072_v51 = vpop.eup %3071 }
 0x969   : > { %v1692_v52 = vmul.f32 %v3072_v51, %v1676_v31 }
 0x96a   : > { %v3074_v53 = vpop.eup %3073 }
 0x96b   : > { %v1700_v54 = vmul.f32 %v2729_v48, %v1692_v52  ;;  %v1693_v59 = vmul.f32 %v3074_v53, %v1677_v33 }
 0x96d   : > { %v1701_v62 = vmul.f32 %v2729_v48, %v1693_v59  ;;  %v3559_v63 = vadd.f32 %v2730_v61, %v1700_v54 }
 0x96f   : > { %v3561_v1 = vadd.f32 %v2730_v61, %v1701_v62 }
 0x971   : > { %v1718_v2 = vpack.c.bf16 %v3561_v1, %v3559_v63 }
 0x973   : > { %2896 = vmatmul.mubr.msk.bf16.vlgmr.msra.gmra.mrb[20].mxu0 %vm1106_vm3, %v1718_v2 }
 0x974   : > { %2909 = vmatprep.mubr.msk.bf16.mxu0 %vm3202_vm0, %v3201_v0  ;;  %2908 = vmatpush3.bf16.xpose.msra.mxu0 %v1855_v10 }
 0x975   : > { %2919 = vmatprep.subr.bf16.mxu0 %v3201_v0 }
 0xa46   : > { %v1774_v12 = vpop.f32.mrb[20].mxu0 }
 0xa47   : > { %v2897_v13 = vpop.f32.mrb[21].mxu0  ;;  %v1775_v16 = vadd.f32 %v2731_v11, %v1774_v12 }
 0xa48   : > { %v1777_v14 = vpop.f32.mrb[22].mxu0 }
 0xa49   : > { %v1778_v17 = vadd.f32 %v2731_v11, %v1777_v14  ;;  %v2898_v18 = vpop.f32.mrb[23].mxu0 }
 0xa4b   : > { %v1849_v19 = vpack.c.bf16 %v1778_v17, %v1775_v16 }
 0xa4d   : > { %1979 = vrot.lane.b32.xlu1 %v1849_v19, %s3203_s18  ;;  %2910 = vmatmul.mubr.msk.bf16.vlgmr.msra.gmra.mrb[24].mxu0 %vm1302_vm4, %v1849_v19  ;;  %s1015_s18 = scalar_lea.vmem %s3377_s1, %s2772_s0  ;;  %s3712_s0 = sld [smem:[#allocation22_spill]] }
 0xa4e   : > { %2920 = vmatpush3.bf16.xpose.msra.mxu0 %v1987_v20  ;;  %2921 = vmatprep.mubr.msk.bf16.mxu0 %vm3202_vm0, %v3201_v0 }
 0xa4f   : > { %2931 = vmatprep.subr.bf16.mxu0 %v3201_v0 }
 0xabf   : > { %v1980_v21 = vpop.permute.xlu1 %1979 }
 0xac0   : > { %2922 = vmatmul.mubr.msk.bf16.vlgmr.msra.gmra.mrb[28].mxu0 %vm1302_vm4, %v1980_v21 }
 0xac1   : > { %2933 = vmatprep.mubr.msk.bf16.mxu0 %vm3202_vm0, %v3201_v0 }
 0xb20   : > { %v1891_v23 = vpop.f32.mrb[24].mxu0 }
 0xb21   : > { %v1898_v25 = vmul.f32 0.25, %v1891_v23  ;;  %v2911_v26 = vpop.f32.mrb[25].mxu0 }
 0xb22   : > { %v1894_v27 = vpop.f32.mrb[26].mxu0 }
 0xb23   : > { %v1899_v28 = vmul.f32 0.25, %v1894_v27  ;;  %v2912_v29 = vpop.f32.mrb[27].mxu0  ;;  %v1900_v30 = vadd.f32 %v1898_v25, %v1712_v24 }
 0xb25   : > { %v1902_v31 = vsel %vm1031_vm2, %v1900_v30, -inf  ;;  %v1901_v32 = vadd.f32 %v1899_v28, %v1712_v24 }
 0xb26   : > { %1903 = vmax.xlane.f32.xlu1 %v1902_v31 }
 0xb27   : > { %v1905_v33 = vsel %vm1031_vm2, %v1901_v32, -inf }
 0xb28   : > { %1906 = vmax.xlane.f32.xlu0 %v1905_v33 }
 0xb93   : > { %v2023_v34 = vpop.f32.mrb[28].mxu0 }
 0xb94   : > { %v2030_v37 = vmul.f32 0.25, %v2023_v34  ;;  %v2923_v35 = vpop.f32.mrb[29].mxu0 }
 0xb95   : > { %v2026_v56 = vpop.f32.mrb[30].mxu0 }
 0xb96   : > { %v2031_v38 = vmul.f32 0.25, %v2026_v56  ;;  %v2924_v36 = vpop.f32.mrb[31].mxu0  ;;  %v2032_v60 = vadd.f32 %v2030_v37, %v1712_v24 }
 0xb98   : > { %v2034_v39 = vsel %vm1031_vm2, %v2032_v60, -inf  ;;  %v2033_v40 = vadd.f32 %v2031_v38, %v1712_v24 }
 0xb99   : > { %2035 = vmax.xlane.f32.xlu0 %v2034_v39 }
 0xb9a   : > { %v2037_v41 = vsel %vm1031_vm2, %v2033_v40, -inf }
 0xb9b   : > { %2038 = vmax.xlane.f32.xlu1 %v2037_v41 }
 0xbb3   : > { %v1904_v42 = vpop.xlane.xlu1 %1903 }
 0xbb4   : > { %v1908_v43 = vsub.f32 %v1900_v30, %v1904_v42 }
 0xbb5   : > { %v1907_v44 = vpop.xlane.xlu0 %1906 }
 0xbb6   : > { %v1910_v45 = vmul.f32 1.442695, %v1908_v43  ;;  %v1909_v46 = vsub.f32 %v1901_v32, %v1907_v44 }
 0xbb8   : > { %3075 = vpow2.f32 %v1910_v45  ;;  %v1912_v47 = vmul.f32 1.442695, %v1909_v46 }
 0xbba   : > { %3077 = vpow2.f32 %v1912_v47 }
 0xbc2   : > { %v3076_v49 = vpop.eup %3075 }
 0xbc3   : > { %v1914_v50 = vsel %vm1031_vm2, %v3076_v49, 0.0 }
 0xbc4   : > { %v3078_v51 = vpop.eup %3077  ;;  %1915 = vadd.xlane.f32.xlu0 %v1914_v50 }
 0xbc5   : > { %v1917_v48 = vsel %vm1031_vm2, %v3078_v51, 0.0 }
 0xbc6   : > { %1918 = vadd.xlane.f32.xlu1 %v1917_v48 }
 0xc26   : > { %v2036_v52 = vpop.xlane.xlu0 %2035 }
 0xc27   : > { %v2040_v53 = vsub.f32 %v2032_v60, %v2036_v52 }
 0xc28   : > { %v2039_v54 = vpop.xlane.xlu1 %2038 }
 0xc29   : > { %v2042_v59 = vmul.f32 1.442695, %v2040_v53  ;;  %v2041_v61 = vsub.f32 %v2033_v40, %v2039_v54 }
 0xc2b   : > { %3079 = vpow2.f32 %v2042_v59  ;;  %v2044_v62 = vmul.f32 1.442695, %v2041_v61 }
 0xc2d   : > { %3081 = vpow2.f32 %v2044_v62 }
 0xc35   : > { %v3080_v2 = vpop.eup %3079 }
 0xc36   : > { %v2046_v3 = vsel %vm1031_vm2, %v3080_v2, 0.0 }
 0xc37   : > { %v3082_v4 = vpop.eup %3081  ;;  %2047 = vadd.xlane.f32.xlu0 %v2046_v3  ;;  %v3047_v3 = vld [vmem:[%s3706_s7] sm:$0xff]  }
 0xc38   : > { %v2049_v5 = vsel %vm1031_vm2, %v3082_v4, 0.0 }
 0xc39   : > { %2050 = vadd.xlane.f32.xlu1 %v2049_v5  ;;  %v3049_v5 = vld [vmem:[%s3707_s15] sm:$0xff]  }
 0xc4a   : > { %2057 = vrot.lane.b32.xlu1 %v3569_v8, %s3205_s22  ;;  %s3705_s22 = sld [smem:[#allocation15_spill]] }
 0xc4d   : > { %1926 = vrot.lane.b32.xlu0 %v3569_v8, %s3204_s5  ;;  %s3704_s5 = sld [smem:[#allocation14_spill]] }
 0xc50   : > { %v2747_v60 = vld [vmem:[%s3705_s22] ss:$0 sm:$0xff]  ;;  %s1010_s22 = scalar_lea.vmem %s3372_s23, %s2770_s20 }
 0xc51   : > { %v1916_v6 = vpop.xlane.xlu0 %1915 }
 0xc52   : > { %3083 = vrcp.f32 %v1916_v6  ;;  %v3050_v6 = vld [vmem:[%s3707_s15 + $0x8] sm:$0xff]  }
 0xc53   : > { %v1919_v7 = vpop.xlane.xlu1 %1918  ;;  %v3045_v24 = vld [vmem:[%s3704_s5] sm:$0xff]   ;;  %v3046_v25 = vld [vmem:[%s3704_s5 + $0x8] sm:$0xff]  }
 0xc54   : > { %3085 = vrcp.f32 %v1919_v7  ;;  %2932 = vmatpush3.bf16.msra.mxu0 %v3046_v25  ;;  %v3052_v25 = vld [vmem:[%s3707_s15 + $0x18] sm:$0xff]  }
 0xc55   : > { %2943 = vmatprep.subr.bf16.mxu0 %v3201_v0 }
 0xc5c   : > { %v3084_v9 = vpop.eup %3083 }
 0xc5d   : > { %v1922_v10 = vmul.f32 %v3084_v9, %v3076_v49 }
 0xc5e   : > { %v3086_v11 = vpop.eup %3085 }
 0xc5f   : > { %2263 = vst.msk [vmem:[%s1015_s18] sm:$0xff] %vm1031_vm2, %v1922_v10  ;;  %v1923_v12 = vmul.f32 %v3086_v11, %v3078_v51 }
 0xc61   : > { %2264 = vst.msk [vmem:[%s1015_s18 + $0x8] sm:$0xff] %vm1031_vm2, %v1923_v12  ;;  %v1924_v13 = vpack.c.bf16 %v1923_v12, %v1922_v10 }
 0xcc4   : > { %v2048_v14 = vpop.xlane.xlu0 %2047 }
 0xcc5   : > { %3087 = vrcp.f32 %v2048_v14 }
 0xcc6   : > { %v2051_v15 = vpop.xlane.xlu1 %2050 }
 0xcc7   : > { %3089 = vrcp.f32 %v2051_v15  ;;  %v2748_v15 = vld [vmem:[%s3708_s26] ss:$0 sm:$0xff] }
 0xcc8   : > { %v1927_v8 = vpop.permute.xlu0 %1926 }
 0xcc9   : > { %v1932_v16 = vsel %vm1035_vm1, %v1927_v8, 0 }
 0xcca   : > { %2914 = vmatpush3.bf16.msra.mxu1 %v1932_v16  ;;  %v2058_v17 = vpop.permute.xlu1 %2057 }
 0xccb   : > { %2925 = vmatprep.subr.bf16.mxu1 %v3201_v0  ;;  %v2063_v18 = vsel %vm1035_vm1, %v2058_v17, 0 }
 0xccd   : > { %2916 = vmatmul.mubr.msk.bf16.vlgmr.msra.gmra.mrb[24].mxu1 %vm1031_vm2, %v1924_v13 }
 0xcce   : > { %2926 = vmatpush3.bf16.msra.mxu1 %v2063_v18  ;;  %2927 = vmatprep.mubr.msk.bf16.mxu1 %vm3202_vm0, %v3201_v0 }
 0xccf   : > { %v3088_v19 = vpop.eup %3087  ;;  %2937 = vmatprep.subr.bf16.mxu1 %v3201_v0 }
 0xcd0   : > { %v2054_v20 = vmul.f32 %v3088_v19, %v3080_v2  ;;  %v2749_v19 = vld [vmem:[%s3709_s10] ss:$0 sm:$0xff] }
 0xcd1   : > { %v3090_v21 = vpop.eup %3089 }
 0xcd2   : > { %2750 = vst.msk [vmem:[%s1015_s18 + $0x10] sm:$0xff] %vm1031_vm2, %v2054_v20  ;;  %v2055_v22 = vmul.f32 %v3090_v21, %v3082_v4  ;;  %v3048_v4 = vld [vmem:[%s3706_s7 + $0x8] sm:$0xff]  }
 0xcd4   : > { %2751 = vst.msk [vmem:[%s1015_s18 + $0x18] sm:$0xff] %vm1031_vm2, %v2055_v22  ;;  %v2056_v23 = vpack.c.bf16 %v2055_v22, %v2054_v20  ;;  %s3713_s18 = sld [smem:[#allocation23_spill]] }
 0xcd6   : > { %2928 = vmatmul.mubr.msk.bf16.vlgmr.msra.gmra.mrb[28].mxu1 %vm1031_vm2, %v2056_v23 }
 0xcd7   : > { %2939 = vmatprep.mubr.msk.bf16.mxu1 %vm3202_vm0, %v3201_v0  ;;  %2938 = vmatpush3.bf16.msra.mxu1 %v3045_v24  ;;  %v3051_v24 = vld [vmem:[%s3707_s15 + $0x10] sm:$0xff]  }
 0xcd8   : > { %2951 = vmatprep.subr.bf16.mxu1 %v3201_v0 }
 0xda0   : > { %v1968_v26 = vpop.f32.mrb[24].mxu1 }
 0xda1   : > { %v2917_v27 = vpop.f32.mrb[25].mxu1 }
 0xda2   : > { %v1971_v28 = vpop.f32.mrb[26].mxu1 }
 0xda3   : > { %v1977_v29 = vpack.c.bf16 %v1971_v28, %v1968_v26  ;;  %v2918_v30 = vpop.f32.mrb[27].mxu1  ;;  %v2752_v26 = vld [vmem:[%s3710_s28] ss:$0 sm:$0xff] }
 0xda5   : > { %2940 = vmatmul.mubr.msk.bf16.vlgmr.msra.gmra.mrb[32].mxu1 %vm1302_vm4, %v1977_v29 }
 0xda6   : > { %2959 = vmatprep.mubr.msk.bf16.mxu1 %vm3202_vm0, %v3201_v0  ;;  %2952 = vmatpush3.bf16.msra.mxu1 %v3049_v5 }
 0xda7   : > { %2953 = vmatprep.subr.bf16.mxu1 %v3201_v0 }
 0xda9   : > { %v2099_v31 = vpop.f32.mrb[28].mxu1 }
 0xdaa   : > { %v2929_v32 = vpop.f32.mrb[29].mxu1  ;;  %2954 = vmatpush3.bf16.msra.mxu1 %v3050_v6  ;;  %v2762_v6 = vld [vmem:[%s3712_s0] ss:$0 sm:$0xff] }
 0xdab   : > { %v2102_v33 = vpop.f32.mrb[30].mxu1  ;;  %2955 = vmatprep.subr.bf16.mxu1 %v3201_v0 }
 0xdac   : > { %v2108_v34 = vpack.c.bf16 %v2102_v33, %v2099_v31  ;;  %v2930_v37 = vpop.f32.mrb[31].mxu1 }
 0xdae   : > { %2934 = vmatmul.mubr.msk.bf16.vlgmr.msra.gmra.mrb[32].mxu0 %vm1302_vm4, %v2108_v34  ;;  %2956 = vmatpush3.bf16.msra.mxu1 %v3051_v24 }
 0xdaf   : > { %2947 = vmatprep.mubr.msk.bf16.mxu0 %vm3202_vm0, %v3201_v0  ;;  %2944 = vmatpush3.bf16.msra.mxu0 %v3047_v3 }
 0xdb0   : > { %2945 = vmatprep.subr.bf16.mxu0 %v3201_v0  ;;  %2957 = vmatprep.subr.bf16.mxu1 %v3201_v0 }
 0xdb2   : > { %2958 = vmatpush3.bf16.msra.mxu1 %v3052_v25 }
 0xdb3   : > { %2946 = vmatpush3.bf16.msra.mxu0 %v3048_v4 }
 0xdb4   : > { %2963 = vmatprep.subr.bf16.mxu0 %v3201_v0 }
 0xe78   : > { %v2202_v35 = vpop.f32.mrb[32].mxu1 }
 0xe79   : > { %v2941_v56 = vpop.f32.mrb[33].mxu1 }
 0xe7a   : > { %v2205_v38 = vpop.f32.mrb[34].mxu1 }
 0xe7b   : > { %v2942_v36 = vpop.f32.mrb[35].mxu1 }
 0xe81   : > { %v2152_v39 = vpop.f32.mrb[32].mxu0 }
 0xe82   : > { %v2203_v40 = vadd.f32 %v2202_v35, %v2152_v39  ;;  %v2935_v41 = vpop.f32.mrb[33].mxu0  ;;  %v2756_v35 = vld [vmem:[%s3711_s12] ss:$0 sm:$0xff] }
 0xe83   : > { %v2155_v42 = vpop.f32.mrb[34].mxu0 }
 0xe84   : > { %v2215_v43 = vadd.f32 %v2747_v60, %v2203_v40  ;;  %v2206_v44 = vadd.f32 %v2205_v38, %v2155_v42  ;;  %v2936_v45 = vpop.f32.mrb[35].mxu0 }
 0xe86   : > { %v2216_v46 = vadd.f32 %v2747_v60, %v2206_v44  ;;  %v2217_v47 = vadd.f32 %v2215_v43, %v3559_v63 }
 0xe88   : > { %v2221_v49 = vsel %vm1106_vm3, %v2217_v47, 0.0  ;;  %v2218_v50 = vadd.f32 %v2216_v46, %v3561_v1 }
 0xe89   : > { %2222 = vadd.xlane.f32.xlu1 %v2221_v49 }
 0xe8a   : > { %v2224_v51 = vsel %vm1106_vm3, %v2218_v50, 0.0 }
 0xe8b   : > { %2225 = vadd.xlane.f32.xlu0 %v2224_v51 }
 0xf16   : > { %v2223_v48 = vpop.xlane.xlu1 %2222 }
 0xf17   : > { %v2227_v52 = vmul.f32 0.03125, %v2223_v48 }
 0xf18   : > { %v2226_v53 = vpop.xlane.xlu0 %2225 }
 0xf19   : > { %v2229_v54 = vsub.f32 %v2217_v47, %v2227_v52  ;;  %v2228_v59 = vmul.f32 0.03125, %v2226_v53 }
 0xf1b   : > { %v2230_v61 = vsub.f32 %v2218_v50, %v2228_v59  ;;  %v2231_v62 = vmul.f32 %v2229_v54, %v2229_v54  ;;  %v3053_v59 = vld [vmem:[%s3362_s6] sm:$0xff]  }
 0xf1d   : > { %v2233_v63 = vsel %vm1106_vm3, %v2231_v62, 0.0  ;;  %v2232_v2 = vmul.f32 %v2230_v61, %v2230_v61 }
 0xf1e   : > { %2234 = vadd.xlane.f32.xlu0 %v2233_v63 }
 0xf1f   : > { %v2236_v1 = vsel %vm1106_vm3, %v2232_v2, 0.0 }
 0xf20   : > { %2237 = vadd.xlane.f32.xlu1 %v2236_v1 }
 0xfab   : > { %v2235_v7 = vpop.xlane.xlu0 %2234 }
 0xfac   : > { %v2239_v9 = vmul.f32 0.03125, %v2235_v7 }
 0xfad   : > { %v2238_v10 = vpop.xlane.xlu1 %2237 }
 0xfae   : > { %v2241_v11 = vadd.f32 1e-05, %v2239_v9  ;;  %v2240_v12 = vmul.f32 0.03125, %v2238_v10 }
 0xfb0   : > { %3091 = vrsqrt.f32 %v2241_v11  ;;  %v2242_v13 = vadd.f32 1e-05, %v2240_v12  ;;  %v2763_v12 = vld [vmem:[%s3713_s18] ss:$0 sm:$0xff] }
 0xfb2   : > { %3093 = vrsqrt.f32 %v2242_v13 }
 0xfba   : > { %v3092_v14 = vpop.eup %3091 }
 0xfbb   : > { %v2245_v8 = vmul.f32 %v3092_v14, %v2229_v54 }
 0xfbc   : > { %v3094_v16 = vpop.eup %3093 }
 0xfbd   : > { %v2253_v17 = vmul.f32 %v2748_v15, %v2245_v8  ;;  %v2246_v18 = vmul.f32 %v3094_v16, %v2230_v61  ;;  %v3054_v61 = vld [vmem:[%s3362_s6 + $0x8] sm:$0xff]   ;;  %v2764_v8 = vld [vmem:[#allocation5] ss:$0 sm:$0xff] }
 0xfbf   : > { %v2254_v20 = vmul.f32 %v2748_v15, %v2246_v18  ;;  %v2261_v21 = vadd.f32 %v2749_v19, %v2253_v17 }
 0xfc1   : > { %v2262_v22 = vadd.f32 %v2749_v19, %v2254_v20 }
 0xfc3   : > { %v2273_v23 = vpack.c.bf16 %v2262_v22, %v2261_v21 }
 0xfc5   : > { %2948 = vmatmul.mubr.msk.bf16.vlgmr.msra.gmra.mrb[36].mxu0 %vm1106_vm3, %v2273_v23 }
 0xfc6   : > { %2967 = vmatprep.mubr.msk.bf16.mxu0 %vm3202_vm0, %v3201_v0  ;;  %2964 = vmatpush3.bf16.msra.mxu0 %v3053_v59 }
 0xfc7   : > { %2965 = vmatprep.subr.bf16.mxu0 %v3201_v0 }
 0xfca   : > { %2966 = vmatpush3.bf16.msra.mxu0 %v3054_v61 }
0x1098   : > { %v2329_v27 = vpop.f32.mrb[36].mxu0 }
0x1099   : > { %v2330_v28 = vadd.f32 %v2752_v26, %v2329_v27  ;;  %v2949_v29 = vpop.f32.mrb[37].mxu0 }
0x109a   : > { %v2332_v30 = vpop.f32.mrb[38].mxu0 }
0x109b   : > { %v2333_v31 = vadd.f32 %v2752_v26, %v2332_v30  ;;  %v2950_v32 = vpop.f32.mrb[39].mxu0  ;;  %v2336_v33 = vmax.f32 %v2330_v28, 0.0 }
0x109d   : > { %v2337_v34 = vmax.f32 %v2333_v31, 0.0 }
0x109f   : > { %v2347_v37 = vpack.c.bf16 %v2337_v34, %v2336_v33 }
0x10a1   : > { %2960 = vmatmul.mubr.msk.bf16.vlgmr.msra.gmra.mrb[36].mxu1 %vm2378_vm11, %v2347_v37 }
0x1174   : > { %v2416_v56 = vpop.f32.mrb[36].mxu1 }
0x1175   : > { %v2417_v38 = vadd.f32 %v2756_v35, %v2416_v56  ;;  %v2961_v36 = vpop.f32.mrb[37].mxu1 }
0x1176   : > { %v2419_v60 = vpop.f32.mrb[38].mxu1 }
0x1177   : > { %v2420_v39 = vadd.f32 %v2756_v35, %v2419_v60  ;;  %v2962_v40 = vpop.f32.mrb[39].mxu1  ;;  %v2423_v41 = vadd.f32 %v2417_v38, %v2261_v21 }
0x1179   : > { %v2427_v42 = vsel %vm1106_vm3, %v2423_v41, 0.0  ;;  %v2424_v43 = vadd.f32 %v2420_v39, %v2262_v22 }
0x117a   : > { %2428 = vadd.xlane.f32.xlu0 %v2427_v42 }
0x117b   : > { %v2430_v44 = vsel %vm1106_vm3, %v2424_v43, 0.0 }
0x117c   : > { %2431 = vadd.xlane.f32.xlu1 %v2430_v44 }
0x1207   : > { %v2429_v45 = vpop.xlane.xlu0 %2428 }
0x1208   : > { %v2433_v46 = vmul.f32 0.03125, %v2429_v45 }
0x1209   : > { %v2432_v47 = vpop.xlane.xlu1 %2431 }
0x120a   : > { %v2435_v49 = vsub.f32 %v2423_v41, %v2433_v46  ;;  %v2434_v50 = vmul.f32 0.03125, %v2432_v47 }
0x120c   : > { %v2436_v51 = vsub.f32 %v2424_v43, %v2434_v50  ;;  %v2437_v48 = vmul.f32 %v2435_v49, %v2435_v49 }
0x120e   : > { %v2439_v52 = vsel %vm1106_vm3, %v2437_v48, 0.0  ;;  %v2438_v53 = vmul.f32 %v2436_v51, %v2436_v51 }
0x120f   : > { %2440 = vadd.xlane.f32.xlu0 %v2439_v52 }
0x1210   : > { %v2442_v54 = vsel %vm1106_vm3, %v2438_v53, 0.0 }
0x1211   : > { %2443 = vadd.xlane.f32.xlu1 %v2442_v54 }
0x129c   : > { %v2441_v62 = vpop.xlane.xlu0 %2440 }
0x129d   : > { %v2445_v63 = vmul.f32 0.03125, %v2441_v62 }
0x129e   : > { %v2444_v2 = vpop.xlane.xlu1 %2443 }
0x129f   : > { %v2447_v1 = vadd.f32 1e-05, %v2445_v63  ;;  %v2446_v3 = vmul.f32 0.03125, %v2444_v2 }
0x12a1   : > { %3095 = vrsqrt.f32 %v2447_v1  ;;  %v2448_v4 = vadd.f32 1e-05, %v2446_v3 }
0x12a3   : > { %3097 = vrsqrt.f32 %v2448_v4 }
0x12ab   : > { %v3096_v5 = vpop.eup %3095 }
0x12ac   : > { %v2451_v7 = vmul.f32 %v3096_v5, %v2435_v49 }
0x12ad   : > { %v3098_v9 = vpop.eup %3097 }
0x12ae   : > { %v2459_v10 = vmul.f32 %v2762_v6, %v2451_v7  ;;  %v2452_v11 = vmul.f32 %v3098_v9, %v2436_v51 }
0x12b0   : > { %v2460_v0 = vmul.f32 %v2762_v6, %v2452_v11  ;;  %v2467_v13 = vadd.f32 %v2763_v12, %v2459_v10 }
0x12b2   : > { %v2468_v14 = vadd.f32 %v2763_v12, %v2460_v0 }
0x12b4   : > { %v2474_v15 = vpack.c.bf16 %v2468_v14, %v2467_v13 }
0x12b6   : > { %2968 = vmatmul.mubr.msk.bf16.vlgmr.msra.gmra.mrb[40].mxu0 %vm1106_vm3, %v2474_v15 }
0x1389   : > { %v2530_v16 = vpop.f32.mrb[40].mxu0 }
0x138a   : > { %v2531_v17 = vadd.f32 %v2764_v8, %v2530_v16  ;;  %v2969_v18 = vpop.f32.mrb[41].mxu0 }
0x138b   : > { %v2533_v19 = vpop.f32.mrb[42].mxu0 }
0x138c   : > { %v2543_v20 = vsel %vm2537_vm12, %v2531_v17, 0.0  ;;  %v2534_v21 = vadd.f32 %v2764_v8, %v2533_v19  ;;  %v2970_v22 = vpop.f32.mrb[43].mxu0 }
0x138d   : > { %2546 = vst.msk [vmem:[%s1010_s22] sm:$0xff] %vm2545_vm13, %v2543_v20 }
0x138e   : > { %v2544_v23 = vsel %vm2538_vm14, %v2534_v21, 0.0 }
0x138f   : > { %2547 = vst.msk [vmem:[%s1010_s22 + $0x8] sm:$0xff] %vm2545_vm13, %v2544_v23 }
0x1390 PF: > { %s89_s27 = sadd.s32 1, %s3163_s27  }
0x1391   : > { %p86_p12 = scmp.ge.s32.totalorder %s89_s27, 4  }
0x1393   :  { %88 = sbr.rel (!%p86_p12) target bundleno = 78 (0x4e), region = 224 }
0x139a   :  { %2585 = vsyncpa [#allocation6], 1 }
0x139b   :  { %2587 = vsyncpa [#allocation6 + $0x1], 1 }

</bundles_post_ra>
